<compile_context>
chip_gen: v5e
topology: v5e:2x2
jax: 0.10.0
libtpu: 0.0.40
codegen_flags: <defaults>
</compile_context>

<pallas_src>
import functools

import jax
import jax.numpy as jnp
from jax.experimental import pallas as pl
from jax.experimental.pallas import tpu as pltpu


def _round_up(x, m):
    return (x + m - 1) // m * m


def _vmem_capacity_bytes():
    """Physical VMEM of the local TPU generation (fallback 64 MiB: safe on v7x)."""
    try:
        info = pltpu.get_tpu_info()
        cap = getattr(info, "vmem_capacity_bytes", None)
        if cap:
            return int(cap)
    except Exception:
        pass
    return 64 * 1024 * 1024


def _pick_tile_k(n_e):
    """Codebook chunk width: a multiple of 128 dividing n_e, at most 2048."""
    if n_e <= 2048:
        return n_e
    for c in (2048, 1024, 512, 256, 128):
        if n_e % c == 0:
            return c
    return n_e  # ragged codebook size -> single chunk


def _pick_tile_n(n_rows, n_e, e_dim, tile_k, itemsize, return_d, vmem_limit):
    """Largest 128-multiple row tile whose working set fits the VMEM budget."""
    resident = n_e * e_dim * itemsize + n_e * 4              # codebook + ||e||^2
    budget = max(vmem_limit - resident - (4 << 20), 4 << 20)  # headroom
    per_row = (2 * 2 * e_dim * itemsize                      # z in + z_q out (double-buffered)
               + 2 * 4                                       # idx out
               + 6 * 4 * tile_k                              # chunk temporaries
               + 4 * (e_dim + 2)                             # f32 z_q/min/argmin state
               + (2 * 4 * n_e if return_d else 0))           # d out (double-buffered)
    t = int(budget // per_row)
    t = max(128, min(t // 128 * 128, 2048))
    return min(t, _round_up(n_rows, 128))


def _vq_kernel(z_ref, emb_ref, ee_ref, *out_refs, n_valid, tile_k, with_d):
    # z_ref:   (TN, e_dim)   tile of flattened activations (input dtype)
    # emb_ref: (n_e, e_dim)  full codebook (matmul dtype), resident block
    # ee_ref:  (1, n_e)      precomputed ||e||^2 (f32), resident block
    if with_d:
        d_ref, idx_ref, zq_ref, loss_ref = out_refs
    else:
        idx_ref, zq_ref, loss_ref = out_refs

    tn, e_dim = z_ref.shape
    n_e = emb_ref.shape[0]
    n_chunks = n_e // tile_k  # wrapper guarantees divisibility

    z = z_ref[...]
    z_f32 = z.astype(jnp.float32)
    z_mm = z.astype(emb_ref.dtype)            # bf16 matmul path when requested

    # ||z||^2 only when the full distance matrix is materialized; it is
    # constant per row and cannot change the argmin (perf-review item 1).
    zz = jnp.sum(z_f32 * z_f32, axis=1, keepdims=True) if with_d else None

    col = jax.lax.broadcasted_iota(jnp.int32, (tn, tile_k), 1)
    best = jnp.full((tn, 1), jnp.inf, jnp.float32)
    best_idx = jnp.zeros((tn, 1), jnp.int32)
    zq_acc = jnp.zeros((tn, e_dim), jnp.float32)

    # Chunk the codebook axis so no (TN, n_e) temporary is ever live
    # (static unroll; n_chunks is small — at most n_e/128).
    for c in range(n_chunks):
        emb_c = emb_ref[pl.ds(c * tile_k, tile_k), :]             # (tile_k, e_dim)
        ee_c = ee_ref[:, pl.ds(c * tile_k, tile_k)]               # (1, tile_k)
        # z @ emb_c.T as an NT matmul on the MXU (no transpose materialized).
        cross = jax.lax.dot_general(
            z_mm, emb_c, (((1,), (1,)), ((), ())),
            preferred_element_type=jnp.float32)                   # (TN, tile_k)
        score = ee_c - 2.0 * cross                                # = d - ||z||^2
        # First-occurrence argmin within the chunk (torch tie-breaking).
        cmin = jnp.min(score, axis=1, keepdims=True)
        lidx = jnp.min(jnp.where(score == cmin, col, tile_k),
                       axis=1, keepdims=True)                     # (TN, 1)
        # Codebook lookup as one-hot matmul (exact even in bf16).
        # TODO(synk): for n_e >> e_dim a per-row gather of the winning rows
        # would halve MXU work (review item 4); the row-gather lowering is not
        # exercised at these shapes, so the one-hot matmul is kept.
        onehot = (col == lidx).astype(emb_ref.dtype)
        zq_c = jnp.dot(onehot, emb_c, preferred_element_type=jnp.float32)
        # Strict < keeps the earlier (lower-index) chunk on exact ties, which
        # together with the in-chunk rule reproduces torch's first-occurrence.
        improved = cmin < best
        best = jnp.where(improved, cmin, best)
        best_idx = jnp.where(improved, lidx + c * tile_k, best_idx)
        zq_acc = jnp.where(improved, zq_c, zq_acc)
        if with_d:
            d_ref[:, pl.ds(c * tile_k, tile_k)] = zz + score

    # TODO(synk): idx stays int32 (torch returns int64); the (TN, 1) store is a
    # masked 1-lane vst — a lane-dense (1, TN) layout needs an in-kernel
    # column->row relayout, left as a follow-up (few-% win per the review).
    idx_ref[...] = best_idx
    zq_ref[...] = zq_acc.astype(zq_ref.dtype)

    # Per-tile partial loss (no cross-tile accumulator -> the grid axis stays
    # "parallel" / shardable across v7x's two TensorCores).  Padded rows from
    # the ragged-N path are masked out.
    row = pl.program_id(0) * tn + jax.lax.broadcasted_iota(jnp.int32, (tn, 1), 0)
    diff = zq_acc - z_f32
    per_row = jnp.sum(diff * diff, axis=1, keepdims=True)
    part = jnp.sum(jnp.where(row < n_valid, per_row, 0.0), axis=0, keepdims=True)
    loss_ref[...] = part.reshape(1, 1, 1)


def _resident_spec(shape, single_buffer):
    """BlockSpec for a grid-constant (resident) input block."""
    ndim = len(shape)
    index_map = lambda i: (0,) * ndim
    if single_buffer and hasattr(pl, "Buffered"):
        try:
            # Constant-index blocks are fetched once; one buffer is enough
            # (halves the resident-codebook footprint — review item 2).
            return pl.BlockSpec(shape, index_map, pipeline_mode=pl.Buffered(1))
        except TypeError:
            pass
    return pl.BlockSpec(shape, index_map)


@functools.partial(
    jax.jit,
    static_argnames=("beta", "tile_n", "tile_k", "return_d",
                     "vmem_limit_bytes", "use_bf16_matmul",
                     "single_buffer_resident"))
def _vq_forward_impl(z, emb_weight, *, beta, tile_n, tile_k, return_d,
                     vmem_limit_bytes, use_bf16_matmul, single_buffer_resident):
    B, C, H, W = z.shape
    n_e, e_dim = emb_weight.shape
    assert C == e_dim
    assert tile_n % 128 == 0

    # TODO(synk): the NCHW<->NHWC transposes (and the ragged-N pad) are still
    # wrapper-side XLA passes (review item 5); fusing them into the kernel
    # needs a Mosaic-safe (C, HW)->(HW, C) relayout for arbitrary C and is
    # left as a follow-up.
    z_nhwc = jnp.transpose(z, (0, 2, 3, 1))          # b c h w -> b h w c
    z_flat = z_nhwc.reshape(-1, e_dim)               # (N, e_dim)
    N = z_flat.shape[0]

    eff_tile = min(tile_n, _round_up(N, 128))
    n_pad = _round_up(N, eff_tile)
    if n_pad != N:
        z_flat = jnp.pad(z_flat, ((0, n_pad - N), (0, 0)))
    num_tiles = n_pad // eff_tile

    # Hoisted, codebook-invariant pieces (computed once by XLA, not per tile).
    matmul_dtype = (jnp.bfloat16
                    if (use_bf16_matmul and z.dtype == jnp.float32)
                    else z.dtype)
    emb_c = emb_weight.astype(matmul_dtype)
    ee = jnp.sum(emb_weight.astype(jnp.float32) ** 2, axis=1)[None, :]  # (1, n_e)

    kernel = functools.partial(_vq_kernel, n_valid=N, tile_k=tile_k,
                               with_d=return_d)

    out_shapes = []
    out_specs = []
    if return_d:
        out_shapes.append(jax.ShapeDtypeStruct((n_pad, n_e), jnp.float32))
        out_specs.append(pl.BlockSpec((eff_tile, n_e), lambda i: (i, 0)))
    out_shapes += [
        jax.ShapeDtypeStruct((n_pad, 1), jnp.int32),
        jax.ShapeDtypeStruct((n_pad, e_dim), z.dtype),
        jax.ShapeDtypeStruct((num_tiles, 1, 1), jnp.float32),  # per-tile loss
    ]
    out_specs += [
        pl.BlockSpec((eff_tile, 1), lambda i: (i, 0)),
        pl.BlockSpec((eff_tile, e_dim), lambda i: (i, 0)),
        pl.BlockSpec((1, 1, 1), lambda i: (i, 0, 0)),
    ]

    outs = pl.pallas_call(
        kernel,
        out_shape=tuple(out_shapes),
        grid_spec=pltpu.PrefetchScalarGridSpec(
            num_scalar_prefetch=0,
            grid=(num_tiles,),
            in_specs=[
                pl.BlockSpec((eff_tile, e_dim), lambda i: (i, 0)),
                _resident_spec((n_e, e_dim), single_buffer_resident),
                _resident_spec((1, n_e), single_buffer_resident),
            ],
            out_specs=out_specs,
        ),
        compiler_params=pltpu.CompilerParams(
            dimension_semantics=("parallel",),
            vmem_limit_bytes=vmem_limit_bytes),
    )(z_flat, emb_c, ee)

    if return_d:
        d_pad, idx_pad, zq_pad, loss_parts = outs
        d = d_pad[:N]
    else:
        idx_pad, zq_pad, loss_parts = outs
        d = None

    # legacy loss: mean((z_q.detach()-z)^2) + beta*mean((z_q-z.detach())^2)
    # -> forward value is (1+beta) * mean((z_q - z)^2).
    mse = jnp.sum(loss_parts) / jnp.float32(N * e_dim)
    loss = (1.0 + beta) * mse

    # Straight-through: forward value of z + (z_q - z).detach() == z_q.
    # TODO(synk): forward-only (no custom_vjp); gradients through this are not
    # straight-through like the PyTorch module.
    z_q = zq_pad[:N].reshape(B, H, W, C)
    z_q_nchw = jnp.transpose(z_q, (0, 3, 1, 2))      # b h w c -> b c h w

    min_encoding_indices = idx_pad[:N].reshape(-1)   # (N,) int32
    min_encodings = None                             # matches PyTorch (None)
    # TODO(synk): remap_to_used / sane_index_shape paths not implemented
    # (remap=None, sane_index_shape=False in this configuration).
    return z_q_nchw, loss, (d, min_encodings, min_encoding_indices)


def vector_quantizer_forward(z, emb_weight, *, beta=0.25, tile_n=None,
                             return_d=False, vmem_limit_bytes=None,
                             use_bf16_matmul=False):
    """Forward pass of VectorQuantizer (legacy=True, remap=None).

    z:          (B, C, H, W) float input, C == e_dim (NCHW like PyTorch).
    emb_weight: (n_e, e_dim) codebook.
    return_d:   also materialize the full (N, n_e) distance matrix.
    Returns (z_q_nchw, loss, (d_or_None, None, min_encoding_indices)).
    """
    assert z.ndim == 4
    B, C, H, W = z.shape
    n_e, e_dim = emb_weight.shape
    N = B * H * W
    itemsize = z.dtype.itemsize

    if vmem_limit_bytes is None:
        # ~75% of physical VMEM, per generation (96 MiB v5e/v6e, 48 MiB v7x).
        vmem_limit_bytes = min(_vmem_capacity_bytes() * 3 // 4,
                               100 * 1024 * 1024)
    tile_k = _pick_tile_k(n_e)
    if tile_n is None:
        tile_n = _pick_tile_n(N, n_e, e_dim, tile_k, itemsize, return_d,
                              vmem_limit_bytes)

    kwargs = dict(beta=float(beta), tile_n=int(tile_n), tile_k=int(tile_k),
                  return_d=bool(return_d),
                  vmem_limit_bytes=int(vmem_limit_bytes),
                  use_bf16_matmul=bool(use_bf16_matmul))
    try:
        return _vq_forward_impl(z, emb_weight, single_buffer_resident=True,
                                **kwargs)
    except Exception:
        # pl.Buffered(1) on resident blocks not supported by this build ->
        # retry with default double buffering (identical semantics).
        return _vq_forward_impl(z, emb_weight, single_buffer_resident=False,
                                **kwargs)


# ----------------------------- test utilities -------------------------------

def _reference_forward(z, emb, beta):
    """Plain-JAX reference (same formulas as the PyTorch module)."""
    B, C, H, W = z.shape
    z_nhwc = jnp.transpose(z, (0, 2, 3, 1))
    zf = z_nhwc.reshape(-1, C)
    d = (jnp.sum(zf ** 2, axis=1, keepdims=True)
         + jnp.sum(emb ** 2, axis=1)[None, :]
         - 2.0 * zf @ emb.T)
    idx = jnp.argmin(d, axis=1)
    zq = emb[idx].reshape(B, H, W, C)
    loss = (1.0 + beta) * jnp.mean((zq - z_nhwc) ** 2)
    return jnp.transpose(zq, (0, 3, 1, 2)), loss, d, idx


def _assert_indices_optimal(z, emb, idx, tol):
    """The kernel argmin uses d - ||z||^2 (equal in exact arithmetic), so on
    float-level near-ties it may pick a different index than the reference;
    assert the chosen code attains the per-row minimum distance within tol."""
    B, C, H, W = z.shape
    zf = jnp.transpose(z, (0, 2, 3, 1)).reshape(-1, C)
    d = (jnp.sum(zf ** 2, axis=1, keepdims=True)
         + jnp.sum(emb ** 2, axis=1)[None, :]
         - 2.0 * zf @ emb.T)
    picked = jnp.take_along_axis(d, idx[:, None].astype(jnp.int32), axis=1)[:, 0]
    assert jnp.all(picked <= jnp.min(d, axis=1) + tol)


if __name__ == "__main__":
    beta = 0.25
    key = jax.random.PRNGKey(0)
    kz, ke, kz2 = jax.random.split(key, 3)

    # Case 1: tile-divisible shapes, full output set (including d).
    B, e_dim, H, W = 2, 8, 16, 16
    n_e = 128
    z = jax.random.normal(kz, (B, e_dim, H, W), dtype=jnp.float32)
    # nn.Embedding(n_e, e_dim).weight.data.uniform_(-1/n_e, 1/n_e)
    emb_weight = jax.random.uniform(
        ke, (n_e, e_dim), dtype=jnp.float32,
        minval=-1.0 / n_e, maxval=1.0 / n_e)

    z_q, loss, (d, min_encodings, min_idx) = vector_quantizer_forward(
        z, emb_weight, beta=beta, tile_n=128, return_d=True)
    jax.block_until_ready((z_q, loss, d, min_idx))

    zq_ref, loss_ref, d_ref, idx_ref = _reference_forward(z, emb_weight, beta)
    N1 = B * H * W
    assert z_q.shape == (B, e_dim, H, W)
    assert d.shape == (N1, n_e)
    assert min_idx.shape == (N1,)
    assert min_encodings is None
    # Distance matrix and loss match the module reference.
    assert jnp.allclose(d, d_ref, atol=1e-4)
    assert jnp.allclose(loss, loss_ref, rtol=1e-5, atol=1e-6)
    # Chosen codes are (per-row) optimal and z_q is the gather of those codes.
    _assert_indices_optimal(z, emb_weight, min_idx, tol=1e-5)
    zq_from_idx = jnp.transpose(
        emb_weight[min_idx].reshape(B, H, W, e_dim), (0, 3, 1, 2))
    assert jnp.allclose(z_q, zq_from_idx, atol=1e-6)
    # Indices agree with the reference argmin except possibly f32 near-ties.
    assert jnp.mean((min_idx == idx_ref.astype(jnp.int32)).astype(jnp.float32)) >= 0.99

    # Case 2: ragged N (padding + masked loss), fast path without d, and
    # generation-derived tile_n / vmem_limit_bytes.
    B2, H2, W2 = 2, 10, 10
    z2 = jax.random.normal(kz2, (B2, e_dim, H2, W2), dtype=jnp.float32)
    z_q2, loss2, (d2, _, min_idx2) = vector_quantizer_forward(
        z2, emb_weight, beta=beta, return_d=False)
    jax.block_until_ready((z_q2, loss2, min_idx2))

    _, loss2_ref, _, idx2_ref = _reference_forward(z2, emb_weight, beta)
    assert d2 is None
    assert z_q2.shape == (B2, e_dim, H2, W2)
    assert min_idx2.shape == (B2 * H2 * W2,)
    assert jnp.allclose(loss2, loss2_ref, rtol=1e-5, atol=1e-6)
    _assert_indices_optimal(z2, emb_weight, min_idx2, tol=1e-5)
    zq2_from_idx = jnp.transpose(
        emb_weight[min_idx2].reshape(B2, H2, W2, e_dim), (0, 3, 1, 2))
    assert jnp.allclose(z_q2, zq2_from_idx, atol=1e-6)
    assert jnp.mean((min_idx2 == idx2_ref.astype(jnp.int32)).astype(jnp.float32)) >= 0.99

    # Case 3: bf16 distance-matmul option (f32 inputs) — looser tolerances.
    z_q3, loss3, (_, _, min_idx3) = vector_quantizer_forward(
        z, emb_weight, beta=beta, return_d=False, use_bf16_matmul=True)
    jax.block_until_ready((z_q3, loss3, min_idx3))
    assert z_q3.shape == (B, e_dim, H, W)
    _assert_indices_optimal(z, emb_weight, min_idx3, tol=1e-2)
    assert jnp.allclose(loss3, loss_ref, rtol=1e-3, atol=1e-4)

    print("KERNEL_OK")
</pallas_src>

<mosaic_0001>
module attributes {stable_mosaic.version = 11 : i64} {
  func.func @_vq_kernel(%arg0: i32, %arg1: memref<128x8xf32, #tpu.memory_space<vmem>>, %arg2: memref<128x8xf32, #tpu.memory_space<vmem>>, %arg3: memref<1x128xf32, #tpu.memory_space<vmem>>, %arg4: memref<128x128xf32, #tpu.memory_space<vmem>>, %arg5: memref<128x1xi32, #tpu.memory_space<vmem>>, %arg6: memref<128x8xf32, #tpu.memory_space<vmem>>, %arg7: memref<1x1x1xf32, #tpu.memory_space<vmem>>) attributes {dimension_semantics = [#tpu.dimension_semantics<parallel>], iteration_bounds = array<i64: 4>, scalar_prefetch = 0 : i64, scratch_operands = 0 : i64, tpu.core_type = #tpu.core_type<tc>, window_params = [{transform_indices = @transform_0, window_bounds = array<i64: 128, 8>}, {pipeline_mode = #tpu.pipeline_mode<synchronous>, transform_indices = @transform_1, window_bounds = array<i64: 128, 8>}, {pipeline_mode = #tpu.pipeline_mode<synchronous>, transform_indices = @transform_2, window_bounds = array<i64: 1, 128>}, {transform_indices = @transform_3, window_bounds = array<i64: 128, 128>}, {transform_indices = @transform_4, window_bounds = array<i64: 128, 1>}, {transform_indices = @transform_5, window_bounds = array<i64: 128, 8>}, {transform_indices = @transform_6, window_bounds = array<i64: 1, 1, 1>}]} {
    %c0 = arith.constant 0 : index
    %c0_0 = arith.constant 0 : index
    %0 = vector.load %arg1[%c0, %c0_0] : memref<128x8xf32, #tpu.memory_space<vmem>>, vector<128x8xf32>
    %1 = arith.mulf %0, %0 : vector<128x8xf32>
    %cst = arith.constant dense<0.000000e+00> : vector<128xf32>
    %2 = vector.multi_reduction <add>, %1, %cst [1] : vector<128x8xf32> to vector<128xf32>
    %3 = vector.shape_cast %2 : vector<128xf32> to vector<128x1xf32>
    %4 = tpu.iota {dimensions = array<i32: 1>} : vector<128x128xi32>
    %cst_1 = arith.constant 0x7F800000 : f32
    %5 = vector.broadcast %cst_1 : f32 to vector<128x1xf32>
    %c0_i32 = arith.constant 0 : i32
    %6 = vector.broadcast %c0_i32 : i32 to vector<128x1xi32>
    %cst_2 = arith.constant 0.000000e+00 : f32
    %7 = vector.broadcast %cst_2 : f32 to vector<128x8xf32>
    %c0_3 = arith.constant 0 : index
    %c0_4 = arith.constant 0 : index
    %8 = vector.load %arg2[%c0_3, %c0_4] : memref<128x8xf32, #tpu.memory_space<vmem>>, vector<128x8xf32>
    %c0_5 = arith.constant 0 : index
    %c0_6 = arith.constant 0 : index
    %9 = vector.load %arg3[%c0_5, %c0_6] : memref<1x128xf32, #tpu.memory_space<vmem>>, vector<1x128xf32>
    %cst_7 = arith.constant dense<0.000000e+00> : vector<128x128xf32>
    %10 = tpu.matmul %0, %8, %cst_7 {dimension_numbers = #tpu.dot_dimension_numbers<[1], [1], [0], [0], [0, 0, 1, 0], [], []>} : vector<128x8xf32>, vector<128x8xf32>, vector<128x128xf32> -> vector<128x128xf32>
    %cst_8 = arith.constant 2.000000e+00 : f32
    %11 = vector.broadcast %cst_8 : f32 to vector<128x128xf32>
    %12 = arith.mulf %11, %10 : vector<128x128xf32>
    %13 = vector.broadcast %9 : vector<1x128xf32> to vector<128x128xf32>
    %14 = arith.subf %13, %12 : vector<128x128xf32>
    %cst_9 = arith.constant dense<0x7F800000> : vector<128xf32>
    %15 = vector.multi_reduction <minimumf>, %14, %cst_9 [1] : vector<128x128xf32> to vector<128xf32>
    %16 = vector.shape_cast %15 : vector<128xf32> to vector<128x1xf32>
    %17 = vector.broadcast %16 : vector<128x1xf32> to vector<128x128xf32>
    %18 = arith.cmpf oeq, %14, %17 : vector<128x128xf32>
    %c128_i32 = arith.constant 128 : i32
    %19 = vector.broadcast %c128_i32 : i32 to vector<128x128xi32>
    %20 = arith.select %18, %4, %19 : vector<128x128xi1>, vector<128x128xi32>
    %cst_10 = arith.constant dense<2147483647> : vector<128xi32>
    %21 = vector.multi_reduction <minsi>, %20, %cst_10 [1] : vector<128x128xi32> to vector<128xi32>
    %22 = vector.shape_cast %21 : vector<128xi32> to vector<128x1xi32>
    %23 = vector.broadcast %22 : vector<128x1xi32> to vector<128x128xi32>
    %24 = arith.cmpi eq, %4, %23 : vector<128x128xi32>
    %25 = arith.extui %24 : vector<128x128xi1> to vector<128x128xi32>
    %26 = arith.sitofp %25 : vector<128x128xi32> to vector<128x128xf32>
    %cst_11 = arith.constant dense<0.000000e+00> : vector<128x8xf32>
    %27 = tpu.matmul %26, %8, %cst_11 {dimension_numbers = #tpu.dot_dimension_numbers<[1], [0], [0], [1], [0, 0, 1, 1], [], []>} : vector<128x128xf32>, vector<128x8xf32>, vector<128x8xf32> -> vector<128x8xf32>
    %28 = arith.cmpf olt, %16, %5 : vector<128x1xf32>
    %c0_i32_12 = arith.constant 0 : i32
    %29 = vector.broadcast %c0_i32_12 : i32 to vector<128x1xi32>
    %30 = arith.addi %22, %29 : vector<128x1xi32>
    %31 = arith.select %28, %30, %6 : vector<128x1xi1>, vector<128x1xi32>
    %32 = vector.shape_cast %28 : vector<128x1xi1> to vector<128x1xi1>
    %33 = vector.broadcast %32 : vector<128x1xi1> to vector<128x8xi1>
    %34 = arith.select %33, %27, %7 : vector<128x8xi1>, vector<128x8xf32>
    %35 = vector.broadcast %3 : vector<128x1xf32> to vector<128x128xf32>
    %36 = arith.addf %35, %14 : vector<128x128xf32>
    %c0_13 = arith.constant 0 : index
    %c0_14 = arith.constant 0 : index
    %37 = vector.load %arg4[%c0_13, %c0_14] : memref<128x128xf32, #tpu.memory_space<vmem>>, vector<128x128xf32>
    tpu.vector_store %arg4[%c0_13, %c0_14], %36 {strides = array<i32>} : memref<128x128xf32, #tpu.memory_space<vmem>>, vector<128x128xf32>,
    %c0_15 = arith.constant 0 : index
    %c0_16 = arith.constant 0 : index
    %38 = vector.load %arg5[%c0_15, %c0_16] : memref<128x1xi32, #tpu.memory_space<vmem>>, vector<128x1xi32>
    tpu.vector_store %arg5[%c0_15, %c0_16], %31 {strides = array<i32>} : memref<128x1xi32, #tpu.memory_space<vmem>>, vector<128x1xi32>,
    %c0_17 = arith.constant 0 : index
    %c0_18 = arith.constant 0 : index
    %39 = vector.load %arg6[%c0_17, %c0_18] : memref<128x8xf32, #tpu.memory_space<vmem>>, vector<128x8xf32>
    tpu.vector_store %arg6[%c0_17, %c0_18], %34 {strides = array<i32>} : memref<128x8xf32, #tpu.memory_space<vmem>>, vector<128x8xf32>,
    %c128_i32_19 = arith.constant 128 : i32
    %40 = arith.muli %arg0, %c128_i32_19 : i32
    %41 = tpu.iota {dimensions = array<i32: 0>} : vector<128x1xi32>
    %42 = vector.broadcast %40 : i32 to vector<128x1xi32>
    %43 = arith.addi %42, %41 : vector<128x1xi32>
    %44 = arith.subf %34, %0 : vector<128x8xf32>
    %45 = arith.mulf %44, %44 : vector<128x8xf32>
    %cst_20 = arith.constant dense<0.000000e+00> : vector<128xf32>
    %46 = vector.multi_reduction <add>, %45, %cst_20 [1] : vector<128x8xf32> to vector<128xf32>
    %47 = vector.shape_cast %46 : vector<128xf32> to vector<128x1xf32>
    %c512_i32 = arith.constant 512 : i32
    %48 = vector.broadcast %c512_i32 : i32 to vector<128x1xi32>
    %49 = arith.cmpi slt, %43, %48 : vector<128x1xi32>
    %cst_21 = arith.constant 0.000000e+00 : f32
    %50 = vector.broadcast %cst_21 : f32 to vector<128x1xf32>
    %51 = arith.select %49, %47, %50 : vector<128x1xi1>, vector<128x1xf32>
    %cst_22 = arith.constant dense<0.000000e+00> : vector<1xf32>
    %52 = vector.multi_reduction <add>, %51, %cst_22 [0] : vector<128x1xf32> to vector<1xf32>
    %53 = vector.shape_cast %52 : vector<1xf32> to vector<1x1xf32>
    %54 = vector.shape_cast %53 : vector<1x1xf32> to vector<1x1x1xf32>
    %c0_23 = arith.constant 0 : index
    %c0_24 = arith.constant 0 : index
    %c0_25 = arith.constant 0 : index
    %55 = vector.load %arg7[%c0_23, %c0_24, %c0_25] : memref<1x1x1xf32, #tpu.memory_space<vmem>>, vector<1x1x1xf32>
    tpu.vector_store %arg7[%c0_23, %c0_24, %c0_25], %54 {strides = array<i32>} : memref<1x1x1xf32, #tpu.memory_space<vmem>>, vector<1x1x1xf32>,
    return
  }
  func.func @transform_0(%arg0: i32) -> (i32, i32) {
    %c0_i32 = arith.constant 0 : i32
    %c0_i32_0 = arith.constant 0 : i32
    return %arg0, %c0_i32 : i32, i32
  }
  func.func @transform_1(%arg0: i32) -> (i32, i32) {
    %c0_i32 = arith.constant 0 : i32
    %c0_i32_0 = arith.constant 0 : i32
    %c0_i32_1 = arith.constant 0 : i32
    return %c0_i32, %c0_i32_0 : i32, i32
  }
  func.func @transform_2(%arg0: i32) -> (i32, i32) {
    %c0_i32 = arith.constant 0 : i32
    %c0_i32_0 = arith.constant 0 : i32
    %c0_i32_1 = arith.constant 0 : i32
    return %c0_i32, %c0_i32_0 : i32, i32
  }
  func.func @transform_3(%arg0: i32) -> (i32, i32) {
    %c0_i32 = arith.constant 0 : i32
    %c0_i32_0 = arith.constant 0 : i32
    return %arg0, %c0_i32 : i32, i32
  }
  func.func @transform_4(%arg0: i32) -> (i32, i32) {
    %c0_i32 = arith.constant 0 : i32
    %c0_i32_0 = arith.constant 0 : i32
    return %arg0, %c0_i32 : i32, i32
  }
  func.func @transform_5(%arg0: i32) -> (i32, i32) {
    %c0_i32 = arith.constant 0 : i32
    %c0_i32_0 = arith.constant 0 : i32
    return %arg0, %c0_i32 : i32, i32
  }
  func.func @transform_6(%arg0: i32) -> (i32, i32, i32) {
    %c0_i32 = arith.constant 0 : i32
    %c0_i32_0 = arith.constant 0 : i32
    %c0_i32_1 = arith.constant 0 : i32
    return %arg0, %c0_i32, %c0_i32_0 : i32, i32, i32
  }
}

module attributes {stable_mosaic.version = 11 : i64} {
  func.func @_vq_kernel(%arg0: i32, %arg1: memref<128x8xf32, #tpu.memory_space<vmem>>, %arg2: memref<128x8xf32, #tpu.memory_space<vmem>>, %arg3: memref<1x128xf32, #tpu.memory_space<vmem>>, %arg4: memref<128x128xf32, #tpu.memory_space<vmem>>, %arg5: memref<128x1xi32, #tpu.memory_space<vmem>>, %arg6: memref<128x8xf32, #tpu.memory_space<vmem>>, %arg7: memref<1x1x1xf32, #tpu.memory_space<vmem>>) attributes {dimension_semantics = [#tpu.dimension_semantics<parallel>], iteration_bounds = array<i64: 4>, scalar_prefetch = 0 : i64, scratch_operands = 0 : i64, tpu.core_type = #tpu.core_type<tc>, window_params = [{transform_indices = @transform_0, window_bounds = array<i64: 128, 8>}, {pipeline_mode = #tpu.pipeline_mode<synchronous>, transform_indices = @transform_1, window_bounds = array<i64: 128, 8>}, {pipeline_mode = #tpu.pipeline_mode<synchronous>, transform_indices = @transform_2, window_bounds = array<i64: 1, 128>}, {transform_indices = @transform_3, window_bounds = array<i64: 128, 128>}, {transform_indices = @transform_4, window_bounds = array<i64: 128, 1>}, {transform_indices = @transform_5, window_bounds = array<i64: 128, 8>}, {transform_indices = @transform_6, window_bounds = array<i64: 1, 1, 1>}]} {
    %c0 = arith.constant 0 : index
    %c0_0 = arith.constant 0 : index
    %0 = vector.load %arg1[%c0, %c0_0] : memref<128x8xf32, #tpu.memory_space<vmem>>, vector<128x8xf32>
    %1 = arith.mulf %0, %0 : vector<128x8xf32>
    %cst = arith.constant dense<0.000000e+00> : vector<128xf32>
    %2 = vector.multi_reduction <add>, %1, %cst [1] : vector<128x8xf32> to vector<128xf32>
    %3 = vector.shape_cast %2 : vector<128xf32> to vector<128x1xf32>
    %4 = tpu.iota {dimensions = array<i32: 1>} : vector<128x128xi32>
    %cst_1 = arith.constant 0x7F800000 : f32
    %5 = vector.broadcast %cst_1 : f32 to vector<128x1xf32>
    %c0_i32 = arith.constant 0 : i32
    %6 = vector.broadcast %c0_i32 : i32 to vector<128x1xi32>
    %cst_2 = arith.constant 0.000000e+00 : f32
    %7 = vector.broadcast %cst_2 : f32 to vector<128x8xf32>
    %c0_3 = arith.constant 0 : index
    %c0_4 = arith.constant 0 : index
    %8 = vector.load %arg2[%c0_3, %c0_4] : memref<128x8xf32, #tpu.memory_space<vmem>>, vector<128x8xf32>
    %c0_5 = arith.constant 0 : index
    %c0_6 = arith.constant 0 : index
    %9 = vector.load %arg3[%c0_5, %c0_6] : memref<1x128xf32, #tpu.memory_space<vmem>>, vector<1x128xf32>
    %cst_7 = arith.constant dense<0.000000e+00> : vector<128x128xf32>
    %10 = tpu.matmul %0, %8, %cst_7 {dimension_numbers = #tpu.dot_dimension_numbers<[1], [1], [0], [0], [0, 0, 1, 0], [], []>} : vector<128x8xf32>, vector<128x8xf32>, vector<128x128xf32> -> vector<128x128xf32>
    %cst_8 = arith.constant 2.000000e+00 : f32
    %11 = vector.broadcast %cst_8 : f32 to vector<128x128xf32>
    %12 = arith.mulf %11, %10 : vector<128x128xf32>
    %13 = vector.broadcast %9 : vector<1x128xf32> to vector<128x128xf32>
    %14 = arith.subf %13, %12 : vector<128x128xf32>
    %cst_9 = arith.constant dense<0x7F800000> : vector<128xf32>
    %15 = vector.multi_reduction <minimumf>, %14, %cst_9 [1] : vector<128x128xf32> to vector<128xf32>
    %16 = vector.shape_cast %15 : vector<128xf32> to vector<128x1xf32>
    %17 = vector.broadcast %16 : vector<128x1xf32> to vector<128x128xf32>
    %18 = arith.cmpf oeq, %14, %17 : vector<128x128xf32>
    %c128_i32 = arith.constant 128 : i32
    %19 = vector.broadcast %c128_i32 : i32 to vector<128x128xi32>
    %20 = arith.select %18, %4, %19 : vector<128x128xi1>, vector<128x128xi32>
    %cst_10 = arith.constant dense<2147483647> : vector<128xi32>
    %21 = vector.multi_reduction <minsi>, %20, %cst_10 [1] : vector<128x128xi32> to vector<128xi32>
    %22 = vector.shape_cast %21 : vector<128xi32> to vector<128x1xi32>
    %23 = vector.broadcast %22 : vector<128x1xi32> to vector<128x128xi32>
    %24 = arith.cmpi eq, %4, %23 : vector<128x128xi32>
    %25 = arith.extui %24 : vector<128x128xi1> to vector<128x128xi32>
    %26 = arith.sitofp %25 : vector<128x128xi32> to vector<128x128xf32>
    %cst_11 = arith.constant dense<0.000000e+00> : vector<128x8xf32>
    %27 = tpu.matmul %26, %8, %cst_11 {dimension_numbers = #tpu.dot_dimension_numbers<[1], [0], [0], [1], [0, 0, 1, 1], [], []>} : vector<128x128xf32>, vector<128x8xf32>, vector<128x8xf32> -> vector<128x8xf32>
    %28 = arith.cmpf olt, %16, %5 : vector<128x1xf32>
    %c0_i32_12 = arith.constant 0 : i32
    %29 = vector.broadcast %c0_i32_12 : i32 to vector<128x1xi32>
    %30 = arith.addi %22, %29 : vector<128x1xi32>
    %31 = arith.select %28, %30, %6 : vector<128x1xi1>, vector<128x1xi32>
    %32 = vector.shape_cast %28 : vector<128x1xi1> to vector<128x1xi1>
    %33 = vector.broadcast %32 : vector<128x1xi1> to vector<128x8xi1>
    %34 = arith.select %33, %27, %7 : vector<128x8xi1>, vector<128x8xf32>
    %35 = vector.broadcast %3 : vector<128x1xf32> to vector<128x128xf32>
    %36 = arith.addf %35, %14 : vector<128x128xf32>
    %c0_13 = arith.constant 0 : index
    %c0_14 = arith.constant 0 : index
    %37 = vector.load %arg4[%c0_13, %c0_14] : memref<128x128xf32, #tpu.memory_space<vmem>>, vector<128x128xf32>
    tpu.vector_store %arg4[%c0_13, %c0_14], %36 {strides = array<i32>} : memref<128x128xf32, #tpu.memory_space<vmem>>, vector<128x128xf32>,
    %c0_15 = arith.constant 0 : index
    %c0_16 = arith.constant 0 : index
    %38 = vector.load %arg5[%c0_15, %c0_16] : memref<128x1xi32, #tpu.memory_space<vmem>>, vector<128x1xi32>
    tpu.vector_store %arg5[%c0_15, %c0_16], %31 {strides = array<i32>} : memref<128x1xi32, #tpu.memory_space<vmem>>, vector<128x1xi32>,
    %c0_17 = arith.constant 0 : index
    %c0_18 = arith.constant 0 : index
    %39 = vector.load %arg6[%c0_17, %c0_18] : memref<128x8xf32, #tpu.memory_space<vmem>>, vector<128x8xf32>
    tpu.vector_store %arg6[%c0_17, %c0_18], %34 {strides = array<i32>} : memref<128x8xf32, #tpu.memory_space<vmem>>, vector<128x8xf32>,
    %c128_i32_19 = arith.constant 128 : i32
    %40 = arith.muli %arg0, %c128_i32_19 : i32
    %41 = tpu.iota {dimensions = array<i32: 0>} : vector<128x1xi32>
    %42 = vector.broadcast %40 : i32 to vector<128x1xi32>
    %43 = arith.addi %42, %41 : vector<128x1xi32>
    %44 = arith.subf %34, %0 : vector<128x8xf32>
    %45 = arith.mulf %44, %44 : vector<128x8xf32>
    %cst_20 = arith.constant dense<0.000000e+00> : vector<128xf32>
    %46 = vector.multi_reduction <add>, %45, %cst_20 [1] : vector<128x8xf32> to vector<128xf32>
    %47 = vector.shape_cast %46 : vector<128xf32> to vector<128x1xf32>
    %c512_i32 = arith.constant 512 : i32
    %48 = vector.broadcast %c512_i32 : i32 to vector<128x1xi32>
    %49 = arith.cmpi slt, %43, %48 : vector<128x1xi32>
    %cst_21 = arith.constant 0.000000e+00 : f32
    %50 = vector.broadcast %cst_21 : f32 to vector<128x1xf32>
    %51 = arith.select %49, %47, %50 : vector<128x1xi1>, vector<128x1xf32>
    %cst_22 = arith.constant dense<0.000000e+00> : vector<1xf32>
    %52 = vector.multi_reduction <add>, %51, %cst_22 [0] : vector<128x1xf32> to vector<1xf32>
    %53 = vector.shape_cast %52 : vector<1xf32> to vector<1x1xf32>
    %54 = vector.shape_cast %53 : vector<1x1xf32> to vector<1x1x1xf32>
    %c0_23 = arith.constant 0 : index
    %c0_24 = arith.constant 0 : index
    %c0_25 = arith.constant 0 : index
    %55 = vector.load %arg7[%c0_23, %c0_24, %c0_25] : memref<1x1x1xf32, #tpu.memory_space<vmem>>, vector<1x1x1xf32>
    tpu.vector_store %arg7[%c0_23, %c0_24, %c0_25], %54 {strides = array<i32>} : memref<1x1x1xf32, #tpu.memory_space<vmem>>, vector<1x1x1xf32>,
    return
  }
  func.func @transform_0(%arg0: i32) -> (i32, i32) {
    %c0_i32 = arith.constant 0 : i32
    %c0_i32_0 = arith.constant 0 : i32
    return %arg0, %c0_i32 : i32, i32
  }
  func.func @transform_1(%arg0: i32) -> (i32, i32) {
    %c0_i32 = arith.constant 0 : i32
    %c0_i32_0 = arith.constant 0 : i32
    %c0_i32_1 = arith.constant 0 : i32
    return %c0_i32, %c0_i32_0 : i32, i32
  }
  func.func @transform_2(%arg0: i32) -> (i32, i32) {
    %c0_i32 = arith.constant 0 : i32
    %c0_i32_0 = arith.constant 0 : i32
    %c0_i32_1 = arith.constant 0 : i32
    return %c0_i32, %c0_i32_0 : i32, i32
  }
  func.func @transform_3(%arg0: i32) -> (i32, i32) {
    %c0_i32 = arith.constant 0 : i32
    %c0_i32_0 = arith.constant 0 : i32
    return %arg0, %c0_i32 : i32, i32
  }
  func.func @transform_4(%arg0: i32) -> (i32, i32) {
    %c0_i32 = arith.constant 0 : i32
    %c0_i32_0 = arith.constant 0 : i32
    return %arg0, %c0_i32 : i32, i32
  }
  func.func @transform_5(%arg0: i32) -> (i32, i32) {
    %c0_i32 = arith.constant 0 : i32
    %c0_i32_0 = arith.constant 0 : i32
    return %arg0, %c0_i32 : i32, i32
  }
  func.func @transform_6(%arg0: i32) -> (i32, i32, i32) {
    %c0_i32 = arith.constant 0 : i32
    %c0_i32_0 = arith.constant 0 : i32
    %c0_i32_1 = arith.constant 0 : i32
    return %arg0, %c0_i32, %c0_i32_0 : i32, i32, i32
  }
}

</mosaic_0001>

<bundles_post_ra>
// kernel: _vq_forward_impl.1
= control target key start
LH: loop header
LB: loop body
LE: loop exit
PB: predicated region body
PF: predicated region fallthrough
CT: control target
= control target key end

     0   :  { %12 = vsyncpa [#allocation3], 0  ;;  %s2835_s0 = inlined_call_operand.vmem [shape: f32[512,8], index: 0, kind: input, shape index: {}]   ;;  %s2836_s1 = inlined_call_operand.vmem [shape: f32[128,8], index: 1, kind: input, shape index: {}]   ;;  %s2837_s2 = inlined_call_operand.vmem [shape: f32[1,128], index: 2, kind: input, shape index: {}]   ;;  %s2838_s3 = inlined_call_operand.hbm [shape: f32[512,128], index: 3, kind: output, shape index: {0}]   ;;  %s2839_s4 = inlined_call_operand.vmem [shape: s32[512,1], index: 4, kind: output, shape index: {1}]   ;;  %s2840_s5 = inlined_call_operand.vmem [shape: f32[512,8], index: 5, kind: output, shape index: {2}]   ;;  %s2841_s6 = inlined_call_operand.vmem [shape: f32[4,1,1], index: 6, kind: output, shape index: {3}]  }
   0x1   :  { %14 = vsyncpa [#allocation3 + $0x1], 0  ;;  %s1777_s21 = smov 0   ;;  %s1779_s22 = smov 0  }
   0x2   :  { %s1781_s23 = smov 0   ;;  %s1783_s24 = smov 0  }
   0x3 LB: > { %s1798_s25 = sadd.s32 4294967295, %s1737_s24   ;;  %s1471_s26 = sadd.s32 4294967294, %s1737_s24   ;;  %s1737_s24 = sphi %s1783_s24, %s2909_s24   ;;  %s1733_s23 = sphi %s1781_s23, %s2908_s23   ;;  %s1729_s22 = sphi %s1779_s22, %s2907_s22   ;;  %s1725_s21 = sphi %s1777_s21, %s2906_s21  }
   0x4   : > { %s1802_s27 = sadd.s32 1, %s1737_s24   ;;  %s95_s28 = sadd.s32 1, %s1733_s23 }
   0x5   : > { %s92_s29 = ssub.s32 %s1737_s24, %s1802_s27  ;;  %p105_p0 = scmp.ne.s32.totalorder %s1733_s23, %s1729_s22 }
   0x6   : > { %p93_p1 = scmp.eq.s32.totalorder %s92_s29, 0  ;;  %p106_p2 = scmp.eq.s32.totalorder %s1798_s25, 3 }
   0x7   : > { %p111_p3 = scmp.ne.s32.totalorder %s1729_s22, %s1725_s21  ;;  %p112_p4 = scmp.eq.s32.totalorder %s1471_s26, 3 }
   0x8   : > { %s1813_s30 = scalar_select %p93_p1, %s1733_s23, %s95_s28  }
   0x9   : > { %p1815_p5 = por %p106_p2, %p105_p0  ;;  %p1819_p6 = por %p112_p4, %p111_p3 }
   0xa   : > { %p1474_p7 = scmp.ge.s32.totalorder %s1737_s24, 1  ;;  %p223_p8 = scmp.lt.s32.totalorder %s1737_s24, 5 }
   0xc   : > { %p224_p9 = pnand %p1474_p7, %p223_p8 }
   0xe   : > { %227 = sbr.rel (%p224_p9) target bundleno = 978 (0x3d2), region = 32 }
  0x13   : > { %vm320_vm0 = vcmask 64512   ;;  %v1828_v0 = vld [vmem:[%s2836_s1 + $0x78] sm:$0xff]  ;;  %v1837_v1 = vld [vmem:[%s2836_s1 + $0x70] sm:$0xff]  ;;  %v1850_v2 = vld [vmem:[%s2836_s1 + $0x68] sm:$0xff]  ;;  %s1476_s11 = sshll.u32 %s1798_s25, 4  ;;  %s244_s26 = sand.u32 1, %s1729_s22  }
  0x14   : > { %1482 = vmatpush.xpose.msk.msra.mxu0 %vm320_vm0, %v1828_v0  ;;  %1553 = vmatpush.xpose.msk.msra.mxu2 %vm320_vm0, %v1828_v0  ;;  %v1858_v3 = vld [vmem:[%s2836_s1 + $0x60] sm:$0xff]  ;;  %v1868_v4 = vld [vmem:[%s2836_s1 + $0x58] sm:$0xff]  ;;  %v1876_v5 = vld [vmem:[%s2836_s1 + $0x50] sm:$0xff]  ;;  %p267_p10 = scmp.lt.s32.totalorder %s1476_s11, 63  ;;  %s1475_s28 = sshll.u32 %s244_s26, 7 }
  0x15   : > { %1554 = vmatpush.xpose.msk.msra.mxu3 %vm320_vm0, %v1828_v0  ;;  %1585 = vmatpush.msra.mxu1 %v1828_v0  ;;  %v1886_v6 = vld [vmem:[%s2836_s1 + $0x48] sm:$0xff]  ;;  %v1894_v7 = vld [vmem:[%s2836_s1 + $0x40] sm:$0xff]  ;;  %v1904_v8 = vld [vmem:[%s2836_s1 + $0x38] sm:$0xff]  ;;  %s2572_s29 = scalar_lea.vmem [#allocation2], %s1475_s28  ;;  %p285_p11 = scmp.lt.s32.totalorder %s1798_s25, 3 }
  0x16   : > { %v1912_v9 = vld [vmem:[%s2836_s1 + $0x30] sm:$0xff]  ;;  %v1922_v10 = vld [vmem:[%s2836_s1 + $0x28] sm:$0xff]  ;;  %v1930_v11 = vld [vmem:[%s2836_s1 + $0x20] sm:$0xff]  ;;  %s2911_s11 = smov (!%p267_p10, %s1476_s11), 63  ;;  %s1326_s28 = sshll.u32 %s2572_s29, 4  ;;  %s1327_s28 = int_to_ptr.vmem [resolvable:$true] %s1326_s28 }
  0x17   : > { %1587 = vmatpush.msra.mxu1 %v1837_v1  ;;  %v1940_v12 = vld [vmem:[%s2836_s1 + $0x18] sm:$0xff]  ;;  %v1948_v13 = vld [vmem:[%s2836_s1 + $0x10] sm:$0xff]  ;;  %v1958_v14 = vld [vmem:[%s2836_s1 + $0x8] sm:$0xff]  ;;  %s2006_s12 = sshll.u32 %s2911_s11, 3 }
  0x18   : > { %1483 = vmatpush.xpose.msk.msra.mxu0 %vm320_vm0, %v1837_v1  ;;  %1555 = vmatpush.xpose.msk.msra.mxu2 %vm320_vm0, %v1837_v1  ;;  %v1966_v15 = vld [vmem:[%s2836_s1] sm:$0xff]  ;;  %s2016_s15 = scalar_lea.vmem %s2835_s0, %s2006_s12  ;;  %s2447_s20 = scalar_lea.vmem %s2839_s4, %s2006_s12 }
  0x19   : > { %1556 = vmatpush.xpose.msk.msra.mxu3 %vm320_vm0, %v1837_v1  ;;  %1589 = vmatpush.msra.mxu1 %v1850_v2  ;;  %v2025_v16 = vld [vmem:[%s2016_s15] sm:$0xff]  ;;  %v2028_v17 = vld [vmem:[%s2016_s15 + $0x28] sm:$0xff]  ;;  %v2048_v20 = vld [vmem:[%s2016_s15 + $0x30] sm:$0xff]  ;;  %s2599_s11 = scalar_lea.vmem %s2840_s5, %s2006_s12  ;;  %s1546_s12 = sshll.u32 %s1798_s25, 7 }
  0x1a   : > { %v300_v18 = vld [vmem:[%s2016_s15 + $0x60] sm:$0xff]  ;;  %v2045_v19 = vld [vmem:[%s2016_s15 + $0x8] sm:$0xff]  ;;  %v2064_v22 = vld [vmem:[%s2016_s15 + $0x10] sm:$0xff]  ;;  %s286_s13 = scalar_select %p285_p11, %s1798_s25, 3 }
  0x1b   : > { %1591 = vmatpush.msra.mxu1 %v1858_v3  ;;  %v301_v21 = vld [vmem:[%s2016_s15 + $0x68] sm:$0xff]  ;;  %v295_v23 = vld [vmem:[%s2016_s15 + $0x38] sm:$0xff]  ;;  %v302_v24 = vld [vmem:[%s2016_s15 + $0x70] sm:$0xff]  ;;  %s1325_s16 = scalar_lea.hbm %s2838_s3, %s1546_s12  ;;  %s1301_s25 = scalar_lea.sflag [#allocation3], %s244_s26 }
  0x1c   : > { %1484 = vmatpush.xpose.msk.msra.mxu0 %vm320_vm0, %v1850_v2  ;;  %1557 = vmatpush.xpose.msk.msra.mxu2 %vm320_vm0, %v1850_v2  ;;  %v2080_v25 = vld [vmem:[%s2016_s15 + $0x18] sm:$0xff]  ;;  %v296_v26 = vld [vmem:[%s2016_s15 + $0x40] sm:$0xff]  ;;  %v297_v29 = vld [vmem:[%s2016_s15 + $0x48] sm:$0xff]  ;;  %s287_s19 = scalar_lea.vmem %s2841_s6, %s286_s13  ;;  %s1695_s13 = scalar_lea.hbm %s2838_s3, 512 }
  0x1d   : > { %1558 = vmatpush.xpose.msk.msra.mxu3 %vm320_vm0, %v1850_v2  ;;  %1593 = vmatpush.msra.mxu1 %v1868_v4  ;;  %v303_v27 = vld [vmem:[%s2016_s15 + $0x78] sm:$0xff]  ;;  %v2096_v28 = vld [vmem:[%s2016_s15 + $0x20] sm:$0xff]  ;;  %v298_v30 = vld [vmem:[%s2016_s15 + $0x50] sm:$0xff] }
  0x1e   : > { %v299_v31 = vld [vmem:[%s2016_s15 + $0x58] sm:$0xff]  ;;  %v1659_v36 = vld [vmem:[%s2837_s2] ss:$0 sm:$0xff] }
  0x1f   : > { %1595 = vmatpush.msra.mxu1 %v1876_v5 }
  0x20   : > { %1485 = vmatpush.xpose.msk.msra.mxu0 %vm320_vm0, %v1858_v3  ;;  %1559 = vmatpush.xpose.msk.msra.mxu2 %vm320_vm0, %v1858_v3 }
  0x21   : > { %1560 = vmatpush.xpose.msk.msra.mxu3 %vm320_vm0, %v1858_v3  ;;  %1597 = vmatpush.msra.mxu1 %v1886_v6 }
  0x23   : > { %1599 = vmatpush.msra.mxu1 %v1894_v7 }
  0x24   : > { %1486 = vmatpush.xpose.msk.msra.mxu0 %vm320_vm0, %v1868_v4  ;;  %1561 = vmatpush.xpose.msk.msra.mxu2 %vm320_vm0, %v1868_v4 }
  0x25   : > { %1562 = vmatpush.xpose.msk.msra.mxu3 %vm320_vm0, %v1868_v4  ;;  %1601 = vmatpush.msra.mxu1 %v1904_v8 }
  0x27   : > { %1603 = vmatpush.msra.mxu1 %v1912_v9 }
  0x28   : > { %1487 = vmatpush.xpose.msk.msra.mxu0 %vm320_vm0, %v1876_v5  ;;  %1563 = vmatpush.xpose.msk.msra.mxu2 %vm320_vm0, %v1876_v5 }
  0x29   : > { %1564 = vmatpush.xpose.msk.msra.mxu3 %vm320_vm0, %v1876_v5  ;;  %1605 = vmatpush.msra.mxu1 %v1922_v10 }
  0x2b   : > { %1607 = vmatpush.msra.mxu1 %v1930_v11 }
  0x2c   : > { %1488 = vmatpush.xpose.msk.msra.mxu0 %vm320_vm0, %v1886_v6  ;;  %1565 = vmatpush.xpose.msk.msra.mxu2 %vm320_vm0, %v1886_v6 }
  0x2d   : > { %1566 = vmatpush.xpose.msk.msra.mxu3 %vm320_vm0, %v1886_v6  ;;  %1609 = vmatpush.msra.mxu1 %v1940_v12 }
  0x2f   : > { %1611 = vmatpush.msra.mxu1 %v1948_v13 }
  0x30   : > { %1489 = vmatpush.xpose.msk.msra.mxu0 %vm320_vm0, %v1894_v7  ;;  %1567 = vmatpush.xpose.msk.msra.mxu2 %vm320_vm0, %v1894_v7 }
  0x31   : > { %1568 = vmatpush.xpose.msk.msra.mxu3 %vm320_vm0, %v1894_v7  ;;  %1613 = vmatpush.msra.mxu1 %v1958_v14 }
  0x33   : > { %1615 = vmatpush.msra.mxu1 %v1966_v15 }
  0x34   : > { %1490 = vmatpush.xpose.msk.msra.mxu0 %vm320_vm0, %v1904_v8  ;;  %1569 = vmatpush.xpose.msk.msra.mxu2 %vm320_vm0, %v1904_v8 }
  0x35   : > { %1570 = vmatpush.xpose.msk.msra.mxu3 %vm320_vm0, %v1904_v8 }
  0x38   : > { %1491 = vmatpush.xpose.msk.msra.mxu0 %vm320_vm0, %v1912_v9  ;;  %1571 = vmatpush.xpose.msk.msra.mxu2 %vm320_vm0, %v1912_v9 }
  0x39   : > { %1572 = vmatpush.xpose.msk.msra.mxu3 %vm320_vm0, %v1912_v9 }
  0x3c   : > { %1492 = vmatpush.xpose.msk.msra.mxu0 %vm320_vm0, %v1922_v10  ;;  %1573 = vmatpush.xpose.msk.msra.mxu2 %vm320_vm0, %v1922_v10 }
  0x3d   : > { %1574 = vmatpush.xpose.msk.msra.mxu3 %vm320_vm0, %v1922_v10 }
  0x40   : > { %1493 = vmatpush.xpose.msk.msra.mxu0 %vm320_vm0, %v1930_v11  ;;  %1575 = vmatpush.xpose.msk.msra.mxu2 %vm320_vm0, %v1930_v11 }
  0x41   : > { %1576 = vmatpush.xpose.msk.msra.mxu3 %vm320_vm0, %v1930_v11 }
  0x44   : > { %1494 = vmatpush.xpose.msk.msra.mxu0 %vm320_vm0, %v1940_v12  ;;  %1577 = vmatpush.xpose.msk.msra.mxu2 %vm320_vm0, %v1940_v12 }
  0x45   : > { %1578 = vmatpush.xpose.msk.msra.mxu3 %vm320_vm0, %v1940_v12 }
  0x48   : > { %1495 = vmatpush.xpose.msk.msra.mxu0 %vm320_vm0, %v1948_v13  ;;  %1579 = vmatpush.xpose.msk.msra.mxu2 %vm320_vm0, %v1948_v13 }
  0x49   : > { %1580 = vmatpush.xpose.msk.msra.mxu3 %vm320_vm0, %v1948_v13 }
  0x4c   : > { %1496 = vmatpush.xpose.msk.msra.mxu0 %vm320_vm0, %v1958_v14  ;;  %1581 = vmatpush.xpose.msk.msra.mxu2 %vm320_vm0, %v1958_v14 }
  0x4d   : > { %1582 = vmatpush.xpose.msk.msra.mxu3 %vm320_vm0, %v1958_v14 }
  0x50   : > { %1497 = vmatpush.xpose.msk.msra.mxu0 %vm320_vm0, %v1966_v15  ;;  %1583 = vmatpush.xpose.msk.msra.mxu2 %vm320_vm0, %v1966_v15 }
  0x51   : > { %1584 = vmatpush.xpose.msk.msra.mxu3 %vm320_vm0, %v1966_v15 }
  0x53   : > { %1498 = vmatmul.msk.f32.vlgmr.msra.gmra.mxu0 %vm320_vm0, %v2025_v16  ;;  %1503 = vmatmul.msk.f32.vlgmr.msra.gmra.mxu2 %vm320_vm0, %v2028_v17 }
  0x54   : > { %920 = vmatpush.msrb.mxu0 %v1828_v0  ;;  %1510 = vmatmul.msk.f32.vlgmr.msra.gmra.mxu3 %vm320_vm0, %v300_v18 }
  0x55   : > { %1586 = vmatpush.msrb.mxu3 %v1828_v0 }
  0x56   : > { %921 = vmatpush.msrb.mxu0 %v1837_v1 }
  0x57   : > { %1588 = vmatpush.msrb.mxu3 %v1837_v1 }
  0x58   : > { %922 = vmatpush.msrb.mxu0 %v1850_v2 }
  0x59   : > { %1590 = vmatpush.msrb.mxu3 %v1850_v2 }
  0x5a   : > { %923 = vmatpush.msrb.mxu0 %v1858_v3 }
  0x5b   : > { %1592 = vmatpush.msrb.mxu3 %v1858_v3  ;;  %1499 = vmatmul.msk.f32.gmra.mxu0 %vm320_vm0, %v2045_v19 }
  0x5c   : > { %924 = vmatpush.msrb.mxu0 %v1868_v4  ;;  %1504 = vmatmul.msk.f32.gmra.mxu2 %vm320_vm0, %v2048_v20 }
  0x5d   : > { %1511 = vmatmul.msk.f32.gmra.mxu3 %vm320_vm0, %v301_v21  ;;  %v2842_v21 = vlaneseq }
  0x5e   : > { %925 = vmatpush.msrb.mxu0 %v1876_v5  ;;  %1594 = vmatpush.msrb.mxu3 %v1868_v4 }
  0x60   : > { %926 = vmatpush.msrb.mxu0 %v1886_v6  ;;  %1596 = vmatpush.msrb.mxu3 %v1876_v5 }
  0x62   : > { %927 = vmatpush.msrb.mxu0 %v1894_v7  ;;  %1598 = vmatpush.msrb.mxu3 %v1886_v6 }
  0x63   : > { %1500 = vmatmul.msk.f32.gmra.mxu0 %vm320_vm0, %v2064_v22 }
  0x64   : > { %928 = vmatpush.msrb.mxu0 %v1904_v8  ;;  %1505 = vmatmul.msk.f32.gmra.mxu2 %vm320_vm0, %v295_v23  ;;  %v2163_v23 = vand.u32 127, %v2842_v21 }
  0x65   : > { %1512 = vmatmul.msk.f32.gmra.mxu3 %vm320_vm0, %v302_v24 }
  0x66   : > { %929 = vmatpush.msrb.mxu0 %v1912_v9  ;;  %1600 = vmatpush.msrb.mxu3 %v1894_v7 }
  0x68   : > { %930 = vmatpush.msrb.mxu0 %v1922_v10  ;;  %1602 = vmatpush.msrb.mxu3 %v1904_v8 }
  0x6a   : > { %931 = vmatpush.msrb.mxu0 %v1930_v11  ;;  %1604 = vmatpush.msrb.mxu3 %v1912_v9 }
  0x6b   : > { %1501 = vmatmul.msk.f32.gmra.mxu0 %vm320_vm0, %v2080_v25 }
  0x6c   : > { %932 = vmatpush.msrb.mxu0 %v1940_v12  ;;  %1506 = vmatmul.msk.f32.gmra.mxu2 %vm320_vm0, %v296_v26 }
  0x6d   : > { %1513 = vmatmul.msk.f32.gmra.mxu3 %vm320_vm0, %v303_v27 }
  0x6e   : > { %933 = vmatpush.msrb.mxu0 %v1948_v13  ;;  %1606 = vmatpush.msrb.mxu3 %v1922_v10 }
  0x70   : > { %934 = vmatpush.msrb.mxu0 %v1958_v14  ;;  %1608 = vmatpush.msrb.mxu3 %v1930_v11 }
  0x72   : > { %935 = vmatpush.msrb.mxu0 %v1966_v15  ;;  %1610 = vmatpush.msrb.mxu3 %v1940_v12 }
  0x73   : > { %1502 = vmatmul.msk.f32.gmra.mxu0 %vm320_vm0, %v2096_v28 }
  0x74   : > { %1507 = vmatmul.msk.f32.gmra.mxu2 %vm320_vm0, %v297_v29  ;;  %1612 = vmatpush.msrb.mxu3 %v1948_v13 }
  0x76   : > { %1614 = vmatpush.msrb.mxu3 %v1958_v14 }
  0x78   : > { %1616 = vmatpush.msrb.mxu3 %v1966_v15 }
  0x7c   : > { %1508 = vmatmul.msk.f32.gmra.mxu2 %vm320_vm0, %v298_v30 }
  0x84   : > { %1509 = vmatmul.msk.f32.gmra.mxu2 %vm320_vm0, %v299_v31 }
  0xd0   : > { %v501_v32 = vpop.f32.mrf.mxu0 }
  0xd1   : > { %v549_v49 = vmul.f32 2.0, %v501_v32 }
  0xd3   : > { %v2126_v51 = vsub.f32 %v1659_v36, %v549_v49 }
  0xd5   : > { %2871 = vst [vmem:[#allocation9_spill] sm:$0xff] %v2126_v51 }
  0xd6   : > { %v516_v33 = vpop.f32.mrf.mxu2 }
  0xd7   : > { %v537_v47 = vpop.f32.mrf.mxu3  ;;  %v554_v56 = vmul.f32 2.0, %v516_v33 }
  0xd8   : > { %v504_v34 = vpop.f32.mrf.mxu0  ;;  %v561_v15 = vmul.f32 2.0, %v537_v47 }
  0xd9   : > { %v550_v57 = vmul.f32 2.0, %v504_v34  ;;  %v2132_v58 = vsub.f32 %v1659_v36, %v554_v56 }
  0xda   : > { %v2159_v18 = vsub.f32 %v1659_v36, %v561_v15 }
  0xdb   : > { %2873 = vst [vmem:[#allocation11_spill] sm:$0xff] %v2132_v58  ;;  %v2134_v59 = vsub.f32 %v1659_v36, %v550_v57 }
  0xdc   : > { %2882 = vst [vmem:[#allocation20_spill] sm:$0xff] %v2159_v18 }
  0xdd   : > { %2874 = vst [vmem:[#allocation12_spill] sm:$0xff] %v2134_v59 }
  0xdf   : > { %v519_v35 = vpop.f32.mrf.mxu2 }
  0xe0   : > { %v555_v37 = vmul.f32 2.0, %v519_v35  ;;  %v507_v38 = vpop.f32.mrf.mxu0  ;;  %v540_v54 = vpop.f32.mrf.mxu3 }
  0xe1   : > { %v551_v40 = vmul.f32 2.0, %v507_v38  ;;  %v562_v60 = vmul.f32 2.0, %v540_v54 }
  0xe2   : > { %v2114_v39 = vsub.f32 %v1659_v36, %v555_v37 }
  0xe3   : > { %v2116_v41 = vsub.f32 %v1659_v36, %v551_v40  ;;  %v2138_v0 = vsub.f32 %v1659_v36, %v562_v60 }
  0xe4   : > { %2867 = vst [vmem:[#allocation5_spill] sm:$0xff] %v2114_v39  ;;  %596 = vmin.xlane.f32.xlu2 %v2114_v39 }
  0xe5   : > { %2868 = vst [vmem:[#allocation6_spill] sm:$0xff] %v2116_v41  ;;  %588 = vmin.xlane.f32.xlu0 %v2116_v41 }
  0xe6   : > { %2875 = vst [vmem:[#allocation13_spill] sm:$0xff] %v2138_v0 }
  0xe7   : > { %v522_v42 = vpop.f32.mrf.mxu2 }
  0xe8   : > { %v556_v43 = vmul.f32 2.0, %v522_v42  ;;  %v510_v44 = vpop.f32.mrf.mxu0  ;;  %v543_v62 = vpop.f32.mrf.mxu3 }
  0xe9   : > { %v552_v46 = vmul.f32 2.0, %v510_v44  ;;  %v563_v2 = vmul.f32 2.0, %v543_v62 }
  0xea   : > { %v2120_v45 = vsub.f32 %v1659_v36, %v556_v43 }
  0xeb   : > { %v2122_v48 = vsub.f32 %v1659_v36, %v552_v46  ;;  %v2144_v4 = vsub.f32 %v1659_v36, %v563_v2 }
  0xec   : > { %2869 = vst [vmem:[#allocation7_spill] sm:$0xff] %v2120_v45  ;;  %598 = vmin.xlane.f32.xlu2 %v2120_v45 }
  0xed   : > { %2870 = vst [vmem:[#allocation8_spill] sm:$0xff] %v2122_v48  ;;  %590 = vmin.xlane.f32.xlu0 %v2122_v48 }
  0xee   : > { %2877 = vst [vmem:[#allocation15_spill] sm:$0xff] %v2144_v4 }
  0xef   : > { %v525_v55 = vpop.f32.mrf.mxu2 }
  0xf0   : > { %v513_v50 = vpop.f32.mrf.mxu0  ;;  %v557_v61 = vmul.f32 2.0, %v525_v55  ;;  %v546_v5 = vpop.f32.mrf.mxu3 }
  0xf1   : > { %v553_v52 = vmul.f32 2.0, %v513_v50  ;;  %v564_v8 = vmul.f32 2.0, %v546_v5 }
  0xf2   : > { %v2140_v1 = vsub.f32 %v1659_v36, %v557_v61 }
  0xf3   : > { %v2128_v53 = vsub.f32 %v1659_v36, %v553_v52  ;;  %v2150_v10 = vsub.f32 %v1659_v36, %v564_v8 }
  0xf4   : > { %584 = vmin.xlane.f32.xlu2 %v2126_v51  ;;  %2876 = vst [vmem:[#allocation14_spill] sm:$0xff] %v2140_v1 }
  0xf5   : > { %2872 = vst [vmem:[#allocation10_spill] sm:$0xff] %v2128_v53  ;;  %592 = vmin.xlane.f32.xlu1 %v2128_v53 }
  0xf6   : > { %2879 = vst [vmem:[#allocation17_spill] sm:$0xff] %v2150_v10 }
  0xf7   : > { %v528_v63 = vpop.f32.mrf.mxu2 }
  0xf8   : > { %v558_v3 = vmul.f32 2.0, %v528_v63 }
  0xfa   : > { %v2146_v7 = vsub.f32 %v1659_v36, %v558_v3 }
  0xfc   : > { %586 = vmin.xlane.f32.xlu2 %v2134_v59  ;;  %2878 = vst [vmem:[#allocation16_spill] sm:$0xff] %v2146_v7 }
  0xfd   : > { %594 = vmin.xlane.f32.xlu1 %v2132_v58 }
  0xff   : > { %v531_v6 = vpop.f32.mrf.mxu2 }
 0x100   : > { %v559_v9 = vmul.f32 2.0, %v531_v6 }
 0x102   : > { %v2152_v11 = vsub.f32 %v1659_v36, %v559_v9 }
 0x104   : > { %610 = vmin.xlane.f32.xlu2 %v2138_v0  ;;  %2880 = vst [vmem:[#allocation18_spill] sm:$0xff] %v2152_v11 }
 0x105   : > { %600 = vmin.xlane.f32.xlu1 %v2140_v1 }
 0x107   : > { %v534_v12 = vpop.f32.mrf.mxu2 }
 0x108   : > { %v560_v13 = vmul.f32 2.0, %v534_v12 }
 0x10a   : > { %v2156_v14 = vsub.f32 %v1659_v36, %v560_v13 }
 0x10c   : > { %612 = vmin.xlane.f32.xlu2 %v2144_v4  ;;  %2881 = vst [vmem:[#allocation19_spill] sm:$0xff] %v2156_v14 }
 0x10d   : > { %602 = vmin.xlane.f32.xlu1 %v2146_v7 }
 0x114   : > { %614 = vmin.xlane.f32.xlu2 %v2150_v10 }
 0x115   : > { %604 = vmin.xlane.f32.xlu1 %v2152_v11 }
 0x11d   : > { %606 = vmin.xlane.f32.xlu1 %v2156_v14 }
 0x125   : > { %608 = vmin.xlane.f32.xlu1 %v2159_v18 }
 0x157   : > { %v2184_v33 = vpop.xlane.xlu2 %596 }
 0x158   : > { %v2165_v24 = vpop.xlane.xlu0 %588  ;;  %vm622_vm5 = vcmp.eq.f32.partialorder %v2114_v39, %v2184_v33 }
 0x159   : > { %vm618_vm1 = vcmp.eq.f32.partialorder %v2116_v41, %v2165_v24  ;;  %v2215_v47 = vsel %vm622_vm5, %v2163_v23, 128 }
 0x15a   : > { %v2170_v26 = vsel %vm618_vm1, %v2163_v23, 128  ;;  %v733_v52 = vshra.s32 %v2215_v47, 16 }
 0x15b   : > { %v677_v27 = vshra.s32 %v2170_v26, 16 }
 0x15c   : > { %v2231_v56 = vcvt.s32.f32 %v733_v52 }
 0x15d   : > { %v2173_v29 = vcvt.s32.f32 %v677_v27 }
 0x15f   : > { %680 = vmin.xlane.f32.xlu0 %v2173_v29  ;;  %v2199_v40 = vpop.xlane.xlu2 %598 }
 0x160   : > { %v2176_v30 = vpop.xlane.xlu0 %590  ;;  %vm623_vm7 = vcmp.eq.f32.partialorder %v2120_v45, %v2199_v40 }
 0x161   : > { %vm619_vm2 = vcmp.eq.f32.partialorder %v2122_v48, %v2176_v30  ;;  %v2236_v60 = vsel %vm623_vm7, %v2163_v23, 128  ;;  %v676_v48 = vand.u32 65535, %v2170_v26 }
 0x162   : > { %v2181_v31 = vsel %vm619_vm2, %v2163_v23, 128  ;;  %v747_v62 = vshra.s32 %v2236_v60, 16 }
 0x163   : > { %v691_v32 = vshra.s32 %v2181_v31, 16  ;;  %v678_v41 = vcvt.s32.f32 %v676_v48 }
 0x164   : > { %v2253_v5 = vcvt.s32.f32 %v747_v62 }
 0x165   : > { %v2186_v34 = vcvt.s32.f32 %v691_v32 }
 0x167   : > { %694 = vmin.xlane.f32.xlu0 %v2186_v34  ;;  %v2218_v49 = vpop.xlane.xlu2 %584 }
 0x168   : > { %v2189_v35 = vpop.xlane.xlu1 %592  ;;  %vm616_vm9 = vcmp.eq.f32.partialorder %v2126_v51, %v2218_v49 }
 0x169   : > { %vm620_vm3 = vcmp.eq.f32.partialorder %v2128_v53, %v2189_v35  ;;  %v2258_v8 = vsel %vm616_vm9, %v2163_v23, 128 }
 0x16a   : > { %v2194_v36 = vsel %vm620_vm3, %v2163_v23, 128  ;;  %v649_v12 = vshra.s32 %v2258_v8, 16 }
 0x16b   : > { %v705_v37 = vshra.s32 %v2194_v36, 16  ;;  %v704_v26 = vand.u32 65535, %v2194_v36 }
 0x16c   : > { %v2275_v32 = vcvt.s32.f32 %v649_v12 }
 0x16d   : > { %v2197_v38 = vcvt.s32.f32 %v705_v37  ;;  %v706_v48 = vcvt.s32.f32 %v704_v26 }
 0x16f   : > { %708 = vmin.xlane.f32.xlu0 %v2197_v38  ;;  %v2245_v63 = vpop.xlane.xlu2 %586 }
 0x170   : > { %v2202_v42 = vpop.xlane.xlu1 %594  ;;  %vm617_vm11 = vcmp.eq.f32.partialorder %v2134_v59, %v2245_v63 }
 0x171   : > { %vm621_vm4 = vcmp.eq.f32.partialorder %v2132_v58, %v2202_v42 }
 0x172   : > { %v2207_v43 = vsel %vm621_vm4, %v2163_v23, 128 }
 0x173   : > { %v719_v44 = vshra.s32 %v2207_v43, 16 }
 0x175   : > { %v2212_v46 = vcvt.s32.f32 %v719_v44  ;;  %v2280_v44 = vsel %vm617_vm11, %v2163_v23, 128 }
 0x177   : > { %722 = vmin.xlane.f32.xlu0 %v2212_v46  ;;  %v2273_v27 = vpop.xlane.xlu2 %610 }
 0x178   : > { %v2220_v50 = vpop.xlane.xlu1 %600  ;;  %vm629_vm13 = vcmp.eq.f32.partialorder %v2138_v0, %v2273_v27 }
 0x179   : > { %vm624_vm6 = vcmp.eq.f32.partialorder %v2140_v1, %v2220_v50  ;;  %v2300_v21 = vsel %vm629_vm13, %v2163_v23, 128 }
 0x17a   : > { %v2226_v54 = vsel %vm624_vm6, %v2163_v23, 128  ;;  %v831_v0 = vshra.s32 %v2300_v21, 16 }
 0x17b   : > { %v761_v55 = vshra.s32 %v2226_v54, 16  ;;  %v760_v36 = vand.u32 65535, %v2226_v54 }
 0x17d   : > { %v2233_v57 = vcvt.s32.f32 %v761_v55  ;;  %v663_v55 = vshra.s32 %v2280_v44, 16  ;;  %v762_v26 = vcvt.s32.f32 %v760_v36 }
 0x17f   : > { %736 = vmin.xlane.f32.xlu0 %v2231_v56  ;;  %764 = vmin.xlane.f32.xlu2 %v2233_v57  ;;  %v2295_v12 = vcvt.s32.f32 %v663_v55 }
 0x180   : > { %v2240_v61 = vpop.xlane.xlu1 %602 }
 0x181   : > { %vm625_vm8 = vcmp.eq.f32.partialorder %v2146_v7, %v2240_v61 }
 0x182   : > { %v2248_v2 = vsel %vm625_vm8, %v2163_v23, 128 }
 0x183   : > { %v775_v3 = vshra.s32 %v2248_v2, 16 }
 0x185   : > { %v2255_v6 = vcvt.s32.f32 %v775_v3 }
 0x187   : > { %750 = vmin.xlane.f32.xlu0 %v2253_v5  ;;  %778 = vmin.xlane.f32.xlu2 %v2255_v6 }
 0x188   : > { %v2262_v9 = vpop.xlane.xlu1 %604 }
 0x189   : > { %vm626_vm10 = vcmp.eq.f32.partialorder %v2152_v11, %v2262_v9  ;;  %v2302_v11 = vpop.xlane.xlu2 %612 }
 0x18a   : > { %v2268_v13 = vsel %vm626_vm10, %v2163_v23, 128  ;;  %vm630_vm15 = vcmp.eq.f32.partialorder %v2144_v4, %v2302_v11 }
 0x18b   : > { %v789_v15 = vshra.s32 %v2268_v13, 16  ;;  %v2322_v1 = vsel %vm630_vm15, %v2163_v23, 128 }
 0x18c   : > { %v845_v58 = vshra.s32 %v2322_v1, 16 }
 0x18d   : > { %v2277_v37 = vcvt.s32.f32 %v789_v15 }
 0x18e   : > { %v2331_v4 = vcvt.s32.f32 %v845_v58 }
 0x18f   : > { %652 = vmin.xlane.f32.xlu0 %v2275_v32  ;;  %792 = vmin.xlane.f32.xlu2 %v2277_v37 }
 0x190   : > { %v2284_v52 = vpop.xlane.xlu1 %606 }
 0x191   : > { %vm627_vm12 = vcmp.eq.f32.partialorder %v2156_v14, %v2284_v52  ;;  %v2317_v14 = vcvt.s32.f32 %v831_v0 }
 0x192   : > { %v2290_v62 = vsel %vm627_vm12, %v2163_v23, 128 }
 0x193   : > { %v803_v3 = vshra.s32 %v2290_v62, 16 }
 0x195   : > { %v2297_v15 = vcvt.s32.f32 %v803_v3 }
 0x197   : > { %666 = vmin.xlane.f32.xlu0 %v2295_v12  ;;  %806 = vmin.xlane.f32.xlu2 %v2297_v15 }
 0x198   : > { %v2306_v45 = vpop.xlane.xlu1 %608 }
 0x199   : > { %vm628_vm14 = vcmp.eq.f32.partialorder %v2159_v18, %v2306_v45  ;;  %v2326_v18 = vpop.xlane.xlu2 %614 }
 0x19a   : > { %v2312_v55 = vsel %vm628_vm14, %v2163_v23, 128  ;;  %2883 = vst [vmem:[#allocation21_spill] sm:$0xff] %v2326_v18  ;;  %vm631_vm1 = vcmp.eq.f32.partialorder %v2150_v10, %v2326_v18  ;;  %v690_v10 = vand.u32 65535, %v2181_v31 }
 0x19b   : > { %v817_v3 = vshra.s32 %v2312_v55, 16  ;;  %v2334_v0 = vsel %vm631_vm1, %v2163_v23, 128 }
 0x19c   : > { %v692_v51 = vcvt.s32.f32 %v690_v10 }
 0x19d   : > { %v2319_v7 = vcvt.s32.f32 %v817_v3  ;;  %v859_v3 = vshra.s32 %v2334_v0, 16 }
 0x19f   : > { %834 = vmin.xlane.f32.xlu0 %v2317_v14  ;;  %820 = vmin.xlane.f32.xlu2 %v2319_v7  ;;  %v2338_v39 = vcvt.s32.f32 %v859_v3 }
 0x1a7   : > { %848 = vmin.xlane.f32.xlu0 %v2331_v4 }
 0x1af   : > { %862 = vmin.xlane.f32.xlu0 %v2338_v39 }
 0x1d2   : > { %v2342_v53 = vpop.xlane.xlu0 %680 }
 0x1d3   : > { %vm682_vm2 = vcmp.eq.f32.partialorder %v2173_v29, %v2342_v53  ;;  %v718_v29 = vand.u32 65535, %v2207_v43 }
 0x1d4   : > { %v683_v58 = vsel %vm682_vm2, %v678_v41, inf }
 0x1d5   : > { %684 = vmin.xlane.f32.xlu1 %v683_v58  ;;  %v720_v10 = vcvt.s32.f32 %v718_v29 }
 0x1da   : > { %v2347_v18 = vpop.xlane.xlu0 %694 }
 0x1db   : > { %vm696_vm3 = vcmp.eq.f32.partialorder %v2186_v34, %v2347_v18  ;;  %v732_v34 = vand.u32 65535, %v2215_v47  ;;  %v746_v47 = vand.u32 65535, %v2236_v60 }
 0x1dc   : > { %v697_v3 = vsel %vm696_vm3, %v692_v51, inf  ;;  %vm1097_vm3 = vcmask 7168  }
 0x1dd   : > { %698 = vmin.xlane.f32.xlu1 %v697_v3 }
 0x1e2   : > { %v2352_v59 = vpop.xlane.xlu0 %708 }
 0x1e3   : > { %vm710_vm4 = vcmp.eq.f32.partialorder %v2197_v38, %v2352_v59  ;;  %v734_v38 = vcvt.s32.f32 %v732_v34 }
 0x1e4   : > { %v711_v41 = vsel %vm710_vm4, %v706_v48, inf  ;;  %vm987_vm4 = vcmp.lt.f32.partialorder %v2165_v24, inf }
 0x1e5   : > { %712 = vmin.xlane.f32.xlu1 %v711_v41  ;;  %v748_v41 = vcvt.s32.f32 %v746_v47 }
 0x1ea   : > { %v2357_v31 = vpop.xlane.xlu0 %722 }
 0x1eb   : > { %vm724_vm5 = vcmp.eq.f32.partialorder %v2212_v46, %v2357_v31 }
 0x1ec   : > { %v725_v51 = vsel %vm724_vm5, %v720_v10, inf }
 0x1ed   : > { %726 = vmin.xlane.f32.xlu1 %v725_v51 }
 0x1f2   : > { %v2363_v58 = vpop.xlane.xlu0 %736  ;;  %v2365_v3 = vpop.xlane.xlu2 %764 }
 0x1f3   : > { %vm738_vm6 = vcmp.eq.f32.partialorder %v2231_v56, %v2363_v58  ;;  %vm766_vm7 = vcmp.eq.f32.partialorder %v2233_v57, %v2365_v3  ;;  %v648_v56 = vand.u32 65535, %v2258_v8  ;;  %v774_v57 = vand.u32 65535, %v2248_v2 }
 0x1f4   : > { %v739_v43 = vsel %vm738_vm6, %v734_v38, inf  ;;  %v767_v46 = vsel %vm766_vm7, %v762_v26, inf  ;;  %v788_v8 = vand.u32 65535, %v2268_v13  ;;  %v662_v2 = vand.u32 65535, %v2280_v44 }
 0x1f5   : > { %740 = vmin.xlane.f32.xlu1 %v739_v43  ;;  %768 = vmin.xlane.f32.xlu2 %v767_v46  ;;  %v650_v51 = vcvt.s32.f32 %v648_v56  ;;  %v776_v34 = vcvt.s32.f32 %v774_v57  ;;  %v830_v13 = vand.u32 65535, %v2300_v21  ;;  %v802_v44 = vand.u32 65535, %v2290_v62 }
 0x1f6   : > { %v790_v38 = vcvt.s32.f32 %v788_v8  ;;  %v664_v26 = vcvt.s32.f32 %v662_v2  ;;  %v844_v21 = vand.u32 65535, %v2322_v1  ;;  %v816_v62 = vand.u32 65535, %v2312_v55 }
 0x1f7   : > { %v832_v47 = vcvt.s32.f32 %v830_v13  ;;  %v305_v1 = vmul.f32 %v2045_v19, %v2045_v19  ;;  %v304_v55 = vmul.f32 %v2025_v16, %v2025_v16  ;;  %v306_v19 = vmul.f32 %v2064_v22, %v2064_v22 }
 0x1f8   : > { %v846_v57 = vcvt.s32.f32 %v844_v21  ;;  %v308_v16 = vmul.f32 %v2096_v28, %v2096_v28  ;;  %v687_v13 = vcvt.f32.s32 %v2342_v53  ;;  %v1739_v53 = vmov 1.0  }
 0x1f9   : > { %v324_v8 = vsel %vm320_vm0, %v305_v1, 0.0  ;;  %vm988_vm6 = vcmp.lt.f32.partialorder %v2176_v30, inf }
 0x1fa   : > { %v2372_v48 = vpop.xlane.xlu0 %750  ;;  %v2374_v54 = vpop.xlane.xlu2 %778 }
 0x1fb   : > { %vm752_vm8 = vcmp.eq.f32.partialorder %v2253_v5, %v2372_v48  ;;  %vm780_vm9 = vcmp.eq.f32.partialorder %v2255_v6, %v2374_v54 }
 0x1fc   : > { %v753_v29 = vsel %vm752_vm8, %v748_v41, inf  ;;  %v781_v5 = vsel %vm780_vm9, %v776_v34, inf  ;;  %v804_v41 = vcvt.s32.f32 %v802_v44  ;;  %vm989_vm8 = vcmp.lt.f32.partialorder %v2189_v35, inf }
 0x1fd   : > { %754 = vmin.xlane.f32.xlu1 %v753_v29 }
 0x202   : > { %v2382_v10 = vpop.xlane.xlu0 %652  ;;  %v2384_v60 = vpop.xlane.xlu2 %792 }
 0x203   : > { %vm654_vm10 = vcmp.eq.f32.partialorder %v2275_v32, %v2382_v10  ;;  %vm794_vm11 = vcmp.eq.f32.partialorder %v2277_v37, %v2384_v60 }
 0x204   : > { %v655_v36 = vsel %vm654_vm10, %v650_v51, inf  ;;  %v795_v32 = vsel %vm794_vm11, %v790_v38, inf  ;;  %v818_v51 = vcvt.s32.f32 %v816_v62  ;;  %v327_v38 = vsel %vm320_vm0, %v306_v19, 0.0 }
 0x205   : > { %656 = vmin.xlane.f32.xlu0 %v655_v36  ;;  %782 = vmin.xlane.f32.xlu1 %v781_v5  ;;  %v858_v36 = vand.u32 65535, %v2334_v0  ;;  %v307_v0 = vmul.f32 %v2080_v25, %v2080_v25  ;;  %vm990_vm10 = vcmp.lt.f32.partialorder %v2202_v42, inf  ;;  %v743_v19 = vcvt.f32.s32 %v2363_v58 }
 0x207   : > { %v860_v5 = vcvt.s32.f32 %v858_v36 }
 0x20a   : > { %v2392_v6 = vpop.xlane.xlu0 %666  ;;  %v2396_v43 = vpop.xlane.xlu2 %806 }
 0x20b   : > { %vm668_vm12 = vcmp.eq.f32.partialorder %v2295_v12, %v2392_v6  ;;  %vm808_vm13 = vcmp.eq.f32.partialorder %v2297_v15, %v2396_v43 }
 0x20c   : > { %v669_v46 = vsel %vm668_vm12, %v664_v26, inf  ;;  %v809_v29 = vsel %vm808_vm13, %v804_v41, inf  ;;  %v333_v26 = vsel %vm320_vm0, %v308_v16, 0.0  ;;  %v771_v16 = vcvt.f32.s32 %v2365_v3 }
 0x20d   : > { %796 = vmin.xlane.f32.xlu0 %v795_v32  ;;  %670 = vmin.xlane.f32.xlu2 %v669_v46  ;;  %v310_v32 = vmul.f32 %v2048_v20, %v2048_v20  ;;  %v309_v46 = vmul.f32 %v2028_v17, %v2028_v17  ;;  %v701_v17 = vcvt.f32.s32 %v2347_v18  ;;  %vm991_vm12 = vcmp.lt.f32.partialorder %v2184_v33, inf }
 0x20e   : > { %vm993_vm13 = vcmp.lt.f32.partialorder %v2220_v50, inf  ;;  %v757_v3 = vcvt.f32.s32 %v2372_v48  ;;  %v785_v48 = vcvt.f32.s32 %v2374_v54 }
 0x20f   : > { %v339_v28 = vsel %vm320_vm0, %v310_v32, 0.0  ;;  %v336_v25 = vsel %vm320_vm0, %v309_v46, 0.0  ;;  %v702_v21 = vshll.u32 %v701_v17, 16  ;;  %v659_v17 = vcvt.f32.s32 %v2382_v10 }
 0x210   : > { %v799_v10 = vcvt.f32.s32 %v2384_v60 }
 0x212   : > { %v2402_v37 = vpop.xlane.xlu0 %834  ;;  %v2406_v56 = vpop.xlane.xlu2 %820 }
 0x213   : > { %vm836_vm14 = vcmp.eq.f32.partialorder %v2317_v14, %v2402_v37  ;;  %vm822_vm15 = vcmp.eq.f32.partialorder %v2319_v7, %v2406_v56 }
 0x214   : > { %v837_v12 = vsel %vm836_vm14, %v832_v47, inf  ;;  %v823_v34 = vsel %vm822_vm15, %v818_v51, inf  ;;  %v688_v47 = vshll.u32 %v687_v13, 16  ;;  %v715_v51 = vcvt.f32.s32 %v2352_v59 }
 0x215   : > { %838 = vmin.xlane.f32.xlu1 %v837_v12  ;;  %810 = vmin.xlane.f32.xlu2 %v809_v29  ;;  %vm992_vm15 = vcmp.lt.f32.partialorder %v2199_v40, inf }
 0x21a   : > { %v2412_v15 = vpop.xlane.xlu0 %848 }
 0x21b   : > { %vm850_vm1 = vcmp.eq.f32.partialorder %v2331_v4, %v2412_v15  ;;  %v321_v4 = vsel %vm320_vm0, %v304_v55, 0.0  ;;  %v729_v55 = vcvt.f32.s32 %v2357_v31 }
 0x21c   : > { %v851_v14 = vsel %vm850_vm1, %v846_v57, inf }
 0x21d   : > { %852 = vmin.xlane.f32.xlu0 %v851_v14  ;;  %824 = vmin.xlane.f32.xlu1 %v823_v34  ;;  %v716_v34 = vshll.u32 %v715_v51, 16 }
 0x222   : > { %v2421_v7 = vpop.xlane.xlu0 %862 }
 0x223   : > { %vm864_vm2 = vcmp.eq.f32.partialorder %v2338_v39, %v2421_v7  ;;  %v330_v39 = vsel %vm320_vm0, %v307_v0, 0.0 }
 0x224   : > { %v865_v2 = vsel %vm864_vm2, %v860_v5, inf  ;;  %vm985_vm2 = vcmp.lt.f32.partialorder %v2218_v49, inf }
 0x225   : > { %866 = vmin.xlane.f32.xlu2 %v865_v2  ;;  %325 = vadd.xlane.f32.xlu1 %v324_v8  ;;  %v730_v8 = vshll.u32 %v729_v55, 16  ;;  %v800_v55 = vshll.u32 %v799_v10, 16  ;;  %v2885_v10 = vld [vmem:[#allocation9_spill] sm:$0xff] }
 0x226   : > { %322 = vadd.xlane.f32.xlu0 %v321_v4 }
 0x22d   : > { %328 = vadd.xlane.f32.xlu2 %v327_v38  ;;  %334 = vadd.xlane.f32.xlu1 %v333_v26  ;;  %v744_v26 = vshll.u32 %v743_v19, 16  ;;  %v813_v19 = vcvt.f32.s32 %v2396_v43 }
 0x22e   : > { %331 = vadd.xlane.f32.xlu0 %v330_v39  ;;  %v772_v39 = vshll.u32 %v771_v16, 16  ;;  %v841_v16 = vcvt.f32.s32 %v2402_v37 }
 0x235   : > { %340 = vadd.xlane.f32.xlu1 %v339_v28 }
 0x236   : > { %337 = vadd.xlane.f32.xlu0 %v336_v25 }
 0x248   : > { %v685_v44 = vpop.xlane.xlu1 %684 }
 0x249   : > { %v686_v41 = vcvt.f32.s32 %v685_v44 }
 0x24b   : > { %v689_v12 = vadd.s32 %v688_v47, %v686_v41  ;;  %v758_v47 = vshll.u32 %v757_v3, 16  ;;  %v855_v3 = vcvt.f32.s32 %v2412_v15 }
 0x24d   : > { %vm874_vm5 = vcmp.eq.s32.totalorder %v2163_v23, %v689_v12  ;;  %v1003_v20 = vsel %vm987_vm4, %v689_v12, 0 }
 0x24e   : > { %1532 = vmatmul.msk.f32.vlgmr.msra.gmra.mxu1 %vm874_vm5, %v1739_v53  ;;  %1100 = vst.msk [vmem:[%s2447_s20 + $0x10] sm:$0xff] %vm1097_vm3, %v1003_v20  ;;  %vm994_vm5 = vcmp.lt.f32.partialorder %v2240_v61, inf }
 0x250   : > { %v699_v29 = vpop.xlane.xlu1 %698 }
 0x251   : > { %v700_v62 = vcvt.f32.s32 %v699_v29 }
 0x253   : > { %v703_v57 = vadd.s32 %v702_v21, %v700_v62  ;;  %v786_v62 = vshll.u32 %v785_v48, 16 }
 0x255   : > { %vm875_vm7 = vcmp.eq.s32.totalorder %v2163_v23, %v703_v57  ;;  %v1004_v18 = vsel %vm988_vm6, %v703_v57, 0  ;;  %v660_v57 = vshll.u32 %v659_v17, 16 }
 0x256   : > { %1533 = vmatmul.msk.f32.gmra.mxu1 %vm875_vm7, %v1739_v53  ;;  %1101 = vst.msk [vmem:[%s2447_s20 + $0x18] sm:$0xff] %vm1097_vm3, %v1004_v18 }
 0x258   : > { %v713_v14 = vpop.xlane.xlu1 %712 }
 0x259   : > { %v714_v36 = vcvt.f32.s32 %v713_v14 }
 0x25b   : > { %v717_v1 = vadd.s32 %v716_v34, %v714_v36  ;;  %v673_v34 = vcvt.f32.s32 %v2392_v6 }
 0x25d   : > { %vm876_vm9 = vcmp.eq.s32.totalorder %v2163_v23, %v717_v1  ;;  %v1005_v59 = vsel %vm989_vm8, %v717_v1, 0 }
 0x25e   : > { %1534 = vmatmul.msk.f32.gmra.mxu1 %vm876_vm9, %v1739_v53  ;;  %1102 = vst.msk [vmem:[%s2447_s20 + $0x20] sm:$0xff] %vm1097_vm3, %v1005_v59  ;;  %v674_v59 = vshll.u32 %v673_v34, 16 }
 0x260   : > { %v727_v5 = vpop.xlane.xlu1 %726 }
 0x261   : > { %v728_v4 = vcvt.f32.s32 %v727_v5 }
 0x263   : > { %v731_v2 = vadd.s32 %v730_v8, %v728_v4 }
 0x265   : > { %vm877_vm11 = vcmp.eq.s32.totalorder %v2163_v23, %v731_v2  ;;  %v1006_v31 = vsel %vm990_vm10, %v731_v2, 0 }
 0x266   : > { %1535 = vmatmul.msk.f32.gmra.mxu1 %vm877_vm11, %v1739_v53  ;;  %1103 = vst.msk [vmem:[%s2447_s20 + $0x28] sm:$0xff] %vm1097_vm3, %v1006_v31  ;;  %vm986_vm11 = vcmp.lt.f32.partialorder %v2245_v63, inf }
 0x268   : > { %v769_v0 = vpop.xlane.xlu2 %768  ;;  %v741_v38 = vpop.xlane.xlu1 %740 }
 0x269   : > { %v770_v32 = vcvt.f32.s32 %v769_v0  ;;  %v742_v46 = vcvt.f32.s32 %v741_v38  ;;  %v814_v38 = vshll.u32 %v813_v19, 16 }
 0x26b   : > { %v773_v58 = vadd.s32 %v772_v39, %v770_v32  ;;  %v745_v28 = vadd.s32 %v744_v26, %v742_v46  ;;  %v842_v26 = vshll.u32 %v841_v16, 16 }
 0x26d   : > { %vm878_vm14 = vcmp.eq.s32.totalorder %v2163_v23, %v745_v28  ;;  %v1007_v25 = vsel %vm991_vm12, %v745_v28, 0  ;;  %v1009_v13 = vsel %vm993_vm13, %v773_v58, 0  ;;  %vm880_vm9 = vcmp.eq.s32.totalorder %v2163_v23, %v773_v58 }
 0x26e   : > { %1536 = vmatmul.msk.f32.gmra.mxu1 %vm878_vm14, %v1739_v53  ;;  %1104 = vst.msk [vmem:[%s2447_s20 + $0x30] sm:$0xff] %vm1097_vm3, %v1007_v25  ;;  %vm2861_vm14 = vcmp.lt.f32.partialorder %v2262_v9, inf  ;;  %v827_v28 = vcvt.f32.s32 %v2406_v56 }
 0x26f   : > { %1106 = vst.msk [vmem:[%s2447_s20 + $0x40] sm:$0xff] %vm1097_vm3, %v1009_v13 }
 0x270   : > { %v755_v44 = vpop.xlane.xlu1 %754 }
 0x271   : > { %v756_v41 = vcvt.f32.s32 %v755_v44  ;;  %v828_v44 = vshll.u32 %v827_v28, 16 }
 0x273   : > { %v759_v12 = vadd.s32 %v758_v47, %v756_v41  ;;  %v856_v47 = vshll.u32 %v855_v3, 16 }
 0x275   : > { %vm879_vm1 = vcmp.eq.s32.totalorder %v2163_v23, %v759_v12  ;;  %v1008_v20 = vsel %vm992_vm15, %v759_v12, 0 }
 0x276   : > { %1537 = vmatmul.msk.f32.gmra.mxu1 %vm879_vm1, %v1739_v53  ;;  %1105 = vst.msk [vmem:[%s2447_s20 + $0x38] sm:$0xff] %vm1097_vm3, %v1008_v20  ;;  %v869_v20 = vcvt.f32.s32 %v2421_v7 }
 0x278   : > { %v657_v29 = vpop.xlane.xlu0 %656  ;;  %v783_v21 = vpop.xlane.xlu1 %782 }
 0x279   : > { %v658_v51 = vcvt.f32.s32 %v657_v29  ;;  %v784_v18 = vcvt.f32.s32 %v783_v21 }
 0x27b   : > { %v661_v54 = vadd.s32 %v660_v57, %v658_v51  ;;  %v787_v14 = vadd.s32 %v786_v62, %v784_v18  ;;  %v870_v57 = vshll.u32 %v869_v20, 16  ;;  %v2884_v18 = vld [vmem:[#allocation12_spill] sm:$0xff] }
 0x27d   : > { %vm872_vm7 = vcmp.eq.s32.totalorder %v2163_v23, %v661_v54  ;;  %v1001_v36 = vsel %vm985_vm2, %v661_v54, 0  ;;  %v1010_v1 = vsel %vm994_vm5, %v787_v14, 0 }
 0x27e   : > { %1530 = vmatmul.msk.f32.vlgmr.msrb.gmra.mxu0 %vm872_vm7, %v1739_v53  ;;  %1538 = vmatmul.msk.f32.gmra.mxu1 %vm880_vm9, %v1739_v53  ;;  %1098 = vst.msk [vmem:[%s2447_s20] sm:$0xff] %vm1097_vm3, %v1001_v36  ;;  %vm881_vm7 = vcmp.eq.s32.totalorder %v2163_v23, %v787_v14  ;;  %vm2863_vm9 = vcmp.lt.f32.partialorder %v2273_v27, inf }
 0x27f   : > { %1107 = vst.msk [vmem:[%s2447_s20 + $0x48] sm:$0xff] %vm1097_vm3, %v1010_v1  ;;  %v2886_v1 = vld [vmem:[#allocation21_spill] sm:$0xff] }
 0x280   : > { %v797_v60 = vpop.xlane.xlu0 %796  ;;  %v671_v6 = vpop.xlane.xlu2 %670 }
 0x281   : > { %v798_v5 = vcvt.f32.s32 %v797_v60  ;;  %v672_v8 = vcvt.f32.s32 %v671_v6 }
 0x283   : > { %v801_v4 = vadd.s32 %v800_v55, %v798_v5  ;;  %v675_v2 = vadd.s32 %v674_v59, %v672_v8  ;;  %v2887_v59 = vld [vmem:[#allocation6_spill] sm:$0xff] }
 0x284   : > { %v2888_v8 = vld [vmem:[#allocation10_spill] sm:$0xff] }
 0x285   : > { %vm873_vm1 = vcmp.eq.s32.totalorder %v2163_v23, %v675_v2  ;;  %v1002_v31 = vsel %vm986_vm11, %v675_v2, 0  ;;  %v1011_v0 = vsel %vm2861_vm14, %v801_v4, 0 }
 0x286   : > { %1531 = vmatmul.msk.f32.gmra.mxu0 %vm873_vm1, %v1739_v53  ;;  %1539 = vmatmul.msk.f32.gmra.mxu1 %vm881_vm7, %v1739_v53  ;;  %1099 = vst.msk [vmem:[%s2447_s20 + $0x8] sm:$0xff] %vm1097_vm3, %v1002_v31  ;;  %vm2862_vm1 = vcmp.lt.f32.partialorder %v2284_v52, inf  ;;  %vm882_vm7 = vcmp.eq.s32.totalorder %v2163_v23, %v801_v4  ;;  %v2890_v31 = vld [vmem:[#allocation5_spill] sm:$0xff] }
 0x287   : > { %1108 = vst.msk [vmem:[%s2447_s20 + $0x50] sm:$0xff] %vm1097_vm3, %v1011_v0 }
 0x288   : > { %v811_v43 = vpop.xlane.xlu2 %810  ;;  %v839_v37 = vpop.xlane.xlu1 %838 }
 0x289   : > { %v812_v39 = vcvt.f32.s32 %v811_v43  ;;  %v840_v32 = vcvt.f32.s32 %v839_v37  ;;  %v2891_v43 = vld [vmem:[#allocation11_spill] sm:$0xff] }
 0x28b   : > { %v815_v46 = vadd.s32 %v814_v38, %v812_v39  ;;  %v843_v58 = vadd.s32 %v842_v26, %v840_v32 }
 0x28d   : > { %vm885_vm14 = vcmp.eq.s32.totalorder %v2163_v23, %v843_v58  ;;  %v1014_v25 = vsel %vm2863_vm9, %v843_v58, 0  ;;  %v1012_v13 = vsel %vm2862_vm1, %v815_v46, 0  ;;  %vm883_vm1 = vcmp.eq.s32.totalorder %v2163_v23, %v815_v46 }
 0x28e   : > { %1540 = vmatmul.msk.f32.gmra.mxu1 %vm882_vm7, %v1739_v53  ;;  %1543 = vmatmul.msk.f32.vlgmr.msrb.gmra.mxu3 %vm885_vm14, %v1739_v53  ;;  %1111 = vst.msk [vmem:[%s2447_s20 + $0x68] sm:$0xff] %vm1097_vm3, %v1014_v25  ;;  %vm999_vm14 = vcmp.lt.f32.partialorder %v2302_v11, inf  ;;  %vm2864_vm7 = vcmp.lt.f32.partialorder %v2306_v45, inf }
 0x28f   : > { %1109 = vst.msk [vmem:[%s2447_s20 + $0x58] sm:$0xff] %vm1097_vm3, %v1012_v13 }
 0x290   : > { %v853_v56 = vpop.xlane.xlu0 %852  ;;  %v825_v15 = vpop.xlane.xlu1 %824 }
 0x291   : > { %v854_v41 = vcvt.f32.s32 %v853_v56  ;;  %v826_v12 = vcvt.f32.s32 %v825_v15 }
 0x293   : > { %v857_v48 = vadd.s32 %v856_v47, %v854_v41  ;;  %v829_v17 = vadd.s32 %v828_v44, %v826_v12  ;;  %v1660_v47 = vld [vmem:[%s2016_s15] sm:$0xff]  ;;  %v1661_v12 = vld [vmem:[%s2016_s15 + $0x18] sm:$0xff] }
 0x295   : > { %vm886_vm9 = vcmp.eq.s32.totalorder %v2163_v23, %v857_v48  ;;  %v1015_v29 = vsel %vm999_vm14, %v857_v48, 0  ;;  %v1013_v21 = vsel %vm2864_vm7, %v829_v17, 0 }
 0x296   : > { %1541 = vmatmul.msk.f32.gmra.mxu1 %vm883_vm1, %v1739_v53  ;;  %1544 = vmatmul.msk.f32.gmra.mxu3 %vm886_vm9, %v1739_v53  ;;  %1112 = vst.msk [vmem:[%s2447_s20 + $0x70] sm:$0xff] %vm1097_vm3, %v1015_v29  ;;  %vm1000_vm9 = vcmp.lt.f32.partialorder %v2886_v1, inf  ;;  %vm884_vm1 = vcmp.eq.s32.totalorder %v2163_v23, %v829_v17 }
 0x297   : > { %1110 = vst.msk [vmem:[%s2447_s20 + $0x60] sm:$0xff] %vm1097_vm3, %v1013_v21 }
 0x298   : > { %v867_v7 = vpop.xlane.xlu2 %866  ;;  %v326_v62 = vpop.xlane.xlu1 %325 }
 0x299   : > { %v868_v51 = vcvt.f32.s32 %v867_v7  ;;  %v1066_v54 = vadd.f32 %v2884_v18, %v326_v62  ;;  %v323_v14 = vpop.xlane.xlu0 %322  ;;  %v1662_v7 = vld [vmem:[%s2016_s15 + $0x8] sm:$0xff] }
 0x29a   : > { %v1065_v34 = vadd.f32 %v2885_v10, %v323_v14  ;;  %v2667_v10 = vld [vmem:[%s2016_s15 + $0x68] sm:$0xff] }
 0x29b   : > { %v871_v36 = vadd.s32 %v870_v57, %v868_v51  ;;  %1082 = vst [vmem:[%s2572_s29 + $0x8] sm:$0xff] %v1066_v54 }
 0x29c   : > { %1081 = vst [vmem:[%s2572_s29] sm:$0xff] %v1065_v34 }
 0x29d   : > { %vm887_vm7 = vcmp.eq.s32.totalorder %v2163_v23, %v871_v36  ;;  %v1016_v60 = vsel %vm1000_vm9, %v871_v36, 0  ;;  %v2889_v23 = vld [vmem:[#allocation8_spill] sm:$0xff] }
 0x29e   : > { %1542 = vmatmul.msk.f32.gmra.mxu1 %vm884_vm1, %v1739_v53  ;;  %1545 = vmatmul.msk.f32.gmra.mxu3 %vm887_vm7, %v1739_v53  ;;  %1113 = vst.msk [vmem:[%s2447_s20 + $0x78] sm:$0xff] %vm1097_vm3, %v1016_v60  ;;  %vm2892_vm3 = vcmp.lt.f32.partialorder %v2262_v9, inf  ;;  %s1328_s20 = sshll.u32 %s1325_s16, 4  ;;  %s1329_s20 = int_to_ptr.hbm [resolvable:$true] %s1328_s20 }
 0x29f   : > { %s1689_s9 = sshra.s32 %s1329_s20, 4  ;;  %s1690_s9 = int_to_ptr.hbm [resolvable:$true] %s1689_s9 }
 0x2a0   : > { %v329_v6 = vpop.xlane.xlu2 %328  ;;  %v335_v55 = vpop.xlane.xlu1 %334  ;;  %s1691_s10 = scalar_lea.hbm %s1690_s9, 128  ;;  %p1696_p1 = scmp.lt.s32.totalorder %s1690_s9, %s2838_s3 }
 0x2a1   : > { %v1067_v5 = vadd.f32 %v2887_v59, %v329_v6  ;;  %v1069_v4 = vadd.f32 %v2888_v8, %v335_v55  ;;  %v332_v2 = vpop.xlane.xlu0 %331  ;;  %v1664_v6 = vld [vmem:[%s2016_s15 + $0x20] sm:$0xff]  ;;  %p1692_p12 = scmp.ne.s32.totalorder %s1690_s9, %s1691_s10  ;;  %p1697_p2 = scmp.lt.s32.totalorder %s1695_s13, %s1691_s10 }
 0x2a2   : > { %v1068_v19 = vadd.f32 %v2889_v23, %v332_v2 }
 0x2a3   : > { %1083 = vst [vmem:[%s2572_s29 + $0x10] sm:$0xff] %v1067_v5  ;;  %p1693_p13 = pnand %p1692_p12, %p1815_p5  ;;  %p1698_p3 = por %p1697_p2, %p1696_p1 }
 0x2a4   : > { %1085 = vst [vmem:[%s2572_s29 + $0x20] sm:$0xff] %v1069_v4 }
 0x2a5   : > { %1084 = vst [vmem:[%s2572_s29 + $0x18] sm:$0xff] %v1068_v19  ;;  %p1694_p0 = pneg %p1693_p13 }
 0x2a7   : > { %p1699_p4 = pnand %p1698_p3, %p1694_p0 }
 0x2a8   : > { %v341_v16 = vpop.xlane.xlu1 %340 }
 0x2a9   : > { %v1071_v0 = vadd.f32 %v2890_v31, %v341_v16  ;;  %v338_v53 = vpop.xlane.xlu0 %337  ;;  %v1666_v16 = vld [vmem:[%s2016_s15 + $0x28] sm:$0xff] }
 0x2aa   : > { %v1070_v37 = vadd.f32 %v2891_v43, %v338_v53  ;;  %v1667_v53 = vld [vmem:[%s2016_s15 + $0x38] sm:$0xff] }
 0x2ab   : > { %1087 = vst [vmem:[%s2572_s29 + $0x30] sm:$0xff] %v1071_v0 }
 0x2ac   : > { %1086 = vst [vmem:[%s2572_s29 + $0x28] sm:$0xff] %v1070_v37 }
 0x2cb   : > { %v943_v38 = vpop.f32.mrf.mxu1 }
 0x2cc   : > { %v1051_v26 = vsel %vm987_vm4, %v943_v38, 0.0  ;;  %vm2893_vm4 = vcmp.lt.f32.partialorder %v2273_v27, inf }
 0x2cd   : > { %1116 = vst.msk [vmem:[%s2599_s11 + $0x10] sm:$0xff] %vm320_vm0, %v1051_v26  ;;  %v1167_v39 = vsub.f32 %v1051_v26, %v2064_v22  ;;  %v1668_v26 = vld [vmem:[%s2016_s15 + $0x78] sm:$0xff] }
 0x2cf   : > { %v1183_v32 = vmul.f32 %v1167_v39, %v1167_v39 }
 0x2d1   : > { %v1203_v46 = vsel %vm320_vm0, %v1183_v32, 0.0 }
 0x2d2   : > { %1204 = vadd.xlane.f32.xlu1 %v1203_v46 }
 0x2d3   : > { %v946_v58 = vpop.f32.mrf.mxu1 }
 0x2d4   : > { %v1052_v28 = vsel %vm988_vm6, %v946_v58, 0.0  ;;  %vm2894_vm6 = vcmp.lt.f32.partialorder %v2284_v52, inf  ;;  %v2681_v52 = vld [vmem:[%s2016_s15 + $0x70] sm:$0xff] }
 0x2d5   : > { %1117 = vst.msk [vmem:[%s2599_s11 + $0x18] sm:$0xff] %vm320_vm0, %v1052_v28  ;;  %v1168_v48 = vsub.f32 %v1052_v28, %v1661_v12  ;;  %v1669_v58 = vld [vmem:[%s2016_s15 + $0x30] sm:$0xff] }
 0x2d7   : > { %v1184_v21 = vmul.f32 %v1168_v48, %v1168_v48 }
 0x2d9   : > { %v1206_v51 = vsel %vm320_vm0, %v1184_v21, 0.0 }
 0x2db   : > { %v949_v3 = vpop.f32.mrf.mxu1 }
 0x2dc   : > { %v1053_v24 = vsel %vm989_vm8, %v949_v3, 0.0  ;;  %vm2895_vm8 = vcmp.lt.f32.partialorder %v2306_v45, inf  ;;  %v1670_v3 = vld [vmem:[%s2016_s15 + $0x40] sm:$0xff] }
 0x2dd   : > { %1118 = vst.msk [vmem:[%s2599_s11 + $0x20] sm:$0xff] %vm320_vm0, %v1053_v24  ;;  %v1169_v27 = vsub.f32 %v1053_v24, %v1664_v6  ;;  %v312_v48 = vmul.f32 %v1670_v3, %v1670_v3  ;;  %v319_v6 = vmul.f32 %v1668_v26, %v1668_v26 }
 0x2df   : > { %v1185_v8 = vmul.f32 %v1169_v27, %v1169_v27 }
 0x2e1   : > { %v1209_v0 = vsel %vm320_vm0, %v1185_v8, 0.0 }
 0x2e3   : > { %v952_v22 = vpop.f32.mrf.mxu1 }
 0x2e4   : > { %v1054_v25 = vsel %vm990_vm10, %v952_v22, 0.0 }
 0x2e5   : > { %1119 = vst.msk [vmem:[%s2599_s11 + $0x28] sm:$0xff] %vm320_vm0, %v1054_v25  ;;  %v1170_v11 = vsub.f32 %v1054_v25, %v1666_v16  ;;  %v1671_v25 = vld [vmem:[%s2016_s15 + $0x50] sm:$0xff] }
 0x2e6   : > { %v314_v27 = vmul.f32 %v1671_v25, %v1671_v25 }
 0x2e7   : > { %v1186_v38 = vmul.f32 %v1170_v11, %v1170_v11 }
 0x2e9   : > { %v1212_v22 = vsel %vm320_vm0, %v1186_v38, 0.0 }
 0x2eb   : > { %v955_v30 = vpop.f32.mrf.mxu1 }
 0x2ec   : > { %v2621_v13 = vsel %vm991_vm12, %v955_v30, 0.0 }
 0x2ed   : > { %1120 = vst.msk [vmem:[%s2599_s11 + $0x30] sm:$0xff] %vm320_vm0, %v2621_v13  ;;  %v1171_v28 = vsub.f32 %v2621_v13, %v1669_v58  ;;  %v1672_v13 = vld [vmem:[%s2016_s15 + $0x48] sm:$0xff] }
 0x2f3   : > { %v958_v35 = vpop.f32.mrf.mxu1 }
 0x2f4   : > { %v1056_v56 = vsel %vm992_vm15, %v958_v35, 0.0 }
 0x2f5   : > { %1121 = vst.msk [vmem:[%s2599_s11 + $0x38] sm:$0xff] %vm320_vm0, %v1056_v56  ;;  %v1172_v43 = vsub.f32 %v1056_v56, %v1667_v53  ;;  %v1187_v56 = vmul.f32 %v1171_v28, %v1171_v28 }
 0x2f7   : > { %v1188_v32 = vmul.f32 %v1172_v43, %v1172_v43 }
 0x2f9   : > { %v1218_v35 = vsel %vm320_vm0, %v1188_v32, 0.0 }
 0x2fb   : > { %v937_v42 = vpop.f32.mrf.mxu0  ;;  %v961_v15 = vpop.f32.mrf.mxu1 }
 0x2fc   : > { %v1049_v44 = vsel %vm985_vm2, %v937_v42, 0.0  ;;  %v2634_v33 = vsel %vm993_vm13, %v961_v15, 0.0 }
 0x2fd   : > { %1114 = vst.msk [vmem:[%s2599_s11] sm:$0xff] %vm320_vm0, %v1049_v44  ;;  %v1165_v41 = vsub.f32 %v1049_v44, %v1660_v47  ;;  %v1173_v24 = vsub.f32 %v2634_v33, %v1670_v3  ;;  %v1673_v47 = vld [vmem:[%s2016_s15 + $0x58] sm:$0xff] }
 0x2fe   : > { %1122 = vst.msk [vmem:[%s2599_s11 + $0x40] sm:$0xff] %vm320_vm0, %v2634_v33 }
 0x2ff   : > { %v1181_v40 = vmul.f32 %v1165_v41, %v1165_v41  ;;  %v1189_v42 = vmul.f32 %v1173_v24, %v1173_v24 }
 0x301   : > { %v1197_v49 = vsel %vm320_vm0, %v1181_v40, 0.0  ;;  %v1221_v41 = vsel %vm320_vm0, %v1189_v42, 0.0  ;;  %v1215_v40 = vsel %vm320_vm0, %v1187_v56, 0.0 }
 0x302   : > { %1198 = vadd.xlane.f32.xlu2 %v1197_v49 }
 0x303   : > { %v940_v17 = vpop.f32.mrf.mxu0  ;;  %v964_v50 = vpop.f32.mrf.mxu1 }
 0x304   : > { %v1050_v20 = vsel %vm986_vm11, %v940_v17, 0.0  ;;  %v2648_v29 = vsel %vm994_vm5, %v964_v50, 0.0  ;;  %v345_v50 = vsel %vm320_vm0, %v312_v48, 0.0 }
 0x305   : > { %1115 = vst.msk [vmem:[%s2599_s11 + $0x8] sm:$0xff] %vm320_vm0, %v1050_v20  ;;  %v1166_v62 = vsub.f32 %v1050_v20, %v1662_v7  ;;  %v1174_v44 = vsub.f32 %v2648_v29, %v1672_v13  ;;  %v1674_v20 = vld [vmem:[%s2016_s15 + $0x60] sm:$0xff] }
 0x306   : > { %1123 = vst.msk [vmem:[%s2599_s11 + $0x48] sm:$0xff] %vm320_vm0, %v2648_v29 }
 0x307   : > { %v1182_v57 = vmul.f32 %v1166_v62, %v1166_v62  ;;  %v1190_v49 = vmul.f32 %v1174_v44, %v1174_v44  ;;  %v313_v62 = vmul.f32 %v1672_v13, %v1672_v13 }
 0x309   : > { %v1200_v63 = vsel %vm320_vm0, %v1182_v57, 0.0  ;;  %v1224_v7 = vsel %vm320_vm0, %v1190_v49, 0.0  ;;  %v315_v57 = vmul.f32 %v1673_v47, %v1673_v47 }
 0x30a   : > { %1207 = vadd.xlane.f32.xlu2 %v1206_v51  ;;  %1201 = vadd.xlane.f32.xlu0 %v1200_v63  ;;  %v348_v63 = vsel %vm320_vm0, %v313_v62, 0.0 }
 0x30b   : > { %v967_v61 = vpop.f32.mrf.mxu1 }
 0x30c   : > { %v1059_v18 = vsel %vm2892_vm3, %v967_v61, 0.0  ;;  %v354_v61 = vsel %vm320_vm0, %v315_v57, 0.0 }
 0x30d   : > { %1124 = vst.msk [vmem:[%s2599_s11 + $0x50] sm:$0xff] %vm320_vm0, %v1059_v18  ;;  %v1175_v30 = vsub.f32 %v1059_v18, %v1671_v25 }
 0x30f   : > { %v1191_v15 = vmul.f32 %v1175_v30, %v1175_v30 }
 0x311   : > { %v976_v54 = vpop.f32.mrf.mxu3  ;;  %v1227_v12 = vsel %vm320_vm0, %v1191_v15, 0.0 }
 0x312   : > { %v1062_v14 = vsel %vm2893_vm4, %v976_v54, 0.0  ;;  %v316_v54 = vmul.f32 %v1674_v20, %v1674_v20 }
 0x313   : > { %1127 = vst.msk [vmem:[%s2599_s11 + $0x68] sm:$0xff] %vm320_vm0, %v1062_v14  ;;  %v1178_v34 = vsub.f32 %v1062_v14, %v2667_v10  ;;  %v970_v36 = vpop.f32.mrf.mxu1  ;;  %v311_v14 = vmul.f32 %v1667_v53, %v1667_v53 }
 0x314   : > { %v1060_v60 = vsel %vm2894_vm6, %v970_v36, 0.0  ;;  %v357_v36 = vsel %vm320_vm0, %v316_v54, 0.0 }
 0x315   : > { %v1194_v9 = vmul.f32 %v1178_v34, %v1178_v34  ;;  %1125 = vst.msk [vmem:[%s2599_s11 + $0x58] sm:$0xff] %vm320_vm0, %v1060_v60  ;;  %v1176_v33 = vsub.f32 %v1060_v60, %v1673_v47  ;;  %v318_v34 = vmul.f32 %v2681_v52, %v2681_v52  ;;  %v342_v60 = vsel %vm320_vm0, %v311_v14, 0.0 }
 0x317   : > { %v1236_v55 = vsel %vm320_vm0, %v1194_v9, 0.0  ;;  %v1192_v17 = vmul.f32 %v1176_v33, %v1176_v33  ;;  %v363_v9 = vsel %vm320_vm0, %v318_v34, 0.0 }
 0x318   : > { %1237 = vadd.xlane.f32.xlu0 %v1236_v55  ;;  %v366_v55 = vsel %vm320_vm0, %v319_v6, 0.0 }
 0x319   : > { %v979_v59 = vpop.f32.mrf.mxu3  ;;  %v1230_v29 = vsel %vm320_vm0, %v1192_v17, 0.0 }
 0x31a   : > { %v1063_v5 = vsel %vm999_vm14, %v979_v59, 0.0  ;;  %v351_v59 = vsel %vm320_vm0, %v314_v27, 0.0 }
 0x31b   : > { %1128 = vst.msk [vmem:[%s2599_s11 + $0x70] sm:$0xff] %vm320_vm0, %v1063_v5  ;;  %v1179_v4 = vsub.f32 %v1063_v5, %v2681_v52  ;;  %v973_v2 = vpop.f32.mrf.mxu1  ;;  %v317_v5 = vmul.f32 %v2667_v10, %v2667_v10 }
 0x31c   : > { %v1061_v23 = vsel %vm2895_vm8, %v973_v2, 0.0 }
 0x31d   : > { %v1195_v19 = vmul.f32 %v1179_v4, %v1179_v4  ;;  %1126 = vst.msk [vmem:[%s2599_s11 + $0x60] sm:$0xff] %vm320_vm0, %v1061_v23  ;;  %v1177_v21 = vsub.f32 %v1061_v23, %v1674_v20  ;;  %v360_v8 = vsel %vm320_vm0, %v317_v5, 0.0  ;;  %v2896_v4 = vlaneseq }
 0x31f   : > { %v1239_v31 = vsel %vm320_vm0, %v1195_v19, 0.0  ;;  %v1193_v51 = vmul.f32 %v1177_v21, %v1177_v21  ;;  %v2729_v2 = vshrl.u32 %v2896_v4, 7 }
 0x320   : > { %1240 = vadd.xlane.f32.xlu1 %v1239_v31  ;;  %1210 = vadd.xlane.f32.xlu0 %v1209_v0  ;;  %v2737_v31 = vstv %s1546_s12 }
 0x321   : > { %v982_v37 = vpop.f32.mrf.mxu3  ;;  %v1233_v18 = vsel %vm320_vm0, %v1193_v51, 0.0  ;;  %v1133_v19 = vadd.s32 8, %v2729_v2  ;;  %v1134_v10 = vadd.s32 16, %v2729_v2  ;;  %v1149_v53 = vadd.s32 %v2737_v31, %v2729_v2 }
 0x322   : > { %v1064_v45 = vsel %vm1000_vm9, %v982_v37, 0.0  ;;  %v1139_v42 = vadd.s32 56, %v2729_v2  ;;  %v1141_v49 = vadd.s32 72, %v2729_v2  ;;  %v1143_v54 = vadd.s32 88, %v2729_v2 }
 0x323   : > { %1129 = vst.msk [vmem:[%s2599_s11 + $0x78] sm:$0xff] %vm320_vm0, %v1064_v45  ;;  %v1180_v39 = vsub.f32 %v1064_v45, %v1668_v26  ;;  %v1150_v0 = vadd.s32 %v2737_v31, %v1133_v19  ;;  %v1151_v37 = vadd.s32 %v2737_v31, %v1134_v10  ;;  %vm1245_vm10 = vcmp.lt.s32.totalorder %v1149_v53, 512 }
 0x324   : > { %v1135_v45 = vadd.s32 24, %v2729_v2  ;;  %v1136_v26 = vadd.s32 32, %v2729_v2  ;;  %v1158_v51 = vadd.s32 %v2737_v31, %v1141_v49  ;;  %v1144_v14 = vadd.s32 96, %v2729_v2 }
 0x325   : > { %v1196_v46 = vmul.f32 %v1180_v39, %v1180_v39  ;;  %vm1247_vm12 = vcmp.lt.s32.totalorder %v1151_v37, 512  ;;  %v1160_v6 = vadd.s32 %v2737_v31, %v1143_v54  ;;  %v1146_v5 = vadd.s32 112, %v2729_v2 }
 0x326   : > { %v1152_v28 = vadd.s32 %v2737_v31, %v1135_v45  ;;  %v1153_v24 = vadd.s32 %v2737_v31, %v1136_v26  ;;  %vm1254_vm7 = vcmp.lt.s32.totalorder %v1158_v51, 512  ;;  %v2905_v51 = vld [vmem:[#allocation13_spill] sm:$0xff] }
 0x327   : > { %v1242_v1 = vsel %vm320_vm0, %v1196_v46, 0.0  ;;  %vm1246_vm0 = vcmp.lt.s32.totalorder %v1150_v0, 512  ;;  %v1137_v46 = vadd.s32 40, %v2729_v2  ;;  %v1147_v0 = vadd.s32 120, %v2729_v2 }
 0x328   : > { %1213 = vadd.xlane.f32.xlu1 %v1212_v22  ;;  %1243 = vadd.xlane.f32.xlu2 %v1242_v1  ;;  %v1138_v1 = vadd.s32 48, %v2729_v2  ;;  %vm1248_vm13 = vcmp.lt.s32.totalorder %v1152_v28, 512  ;;  %vm1249_vm15 = vcmp.lt.s32.totalorder %v1153_v24, 512  ;;  %vm1256_vm1 = vcmp.lt.s32.totalorder %v1160_v6, 512 }
 0x329   : > { %1219 = vadd.xlane.f32.xlu0 %v1218_v35  ;;  %v1154_v22 = vadd.s32 %v2737_v31, %v1137_v46  ;;  %v1163_v53 = vadd.s32 %v2737_v31, %v1146_v5  ;;  %v1164_v37 = vadd.s32 %v2737_v31, %v1147_v0  ;;  %v2898_v46 = vld [vmem:[#allocation16_spill] sm:$0xff] }
 0x32a   : > { %v1155_v13 = vadd.s32 %v2737_v31, %v1138_v1 }
 0x32b   : > { %vm1250_vm2 = vcmp.lt.s32.totalorder %v1154_v22, 512  ;;  %vm1259_vm6 = vcmp.lt.s32.totalorder %v1163_v53, 512  ;;  %vm1260_vm8 = vcmp.lt.s32.totalorder %v1164_v37, 512 }
 0x32c   : > { %vm1251_vm5 = vcmp.lt.s32.totalorder %v1155_v13, 512  ;;  %v2900_v13 = vld [vmem:[#allocation7_spill] sm:$0xff] }
 0x330   : > { %1222 = vadd.xlane.f32.xlu1 %v1221_v41  ;;  %1216 = vadd.xlane.f32.xlu2 %v1215_v40  ;;  %v1156_v41 = vadd.s32 %v2737_v31, %v1139_v42  ;;  %v1140_v40 = vadd.s32 64, %v2729_v2 }
 0x331   : > { %1228 = vadd.xlane.f32.xlu0 %v1227_v12 }
 0x332   : > { %vm1252_vm11 = vcmp.lt.s32.totalorder %v1156_v41, 512  ;;  %v1157_v20 = vadd.s32 %v2737_v31, %v1140_v40  ;;  %v2902_v40 = vld [vmem:[#allocation15_spill] sm:$0xff] }
 0x334   : > { %vm1253_vm14 = vcmp.lt.s32.totalorder %v1157_v20, 512 }
 0x338   : > { %1231 = vadd.xlane.f32.xlu1 %v1230_v29  ;;  %1225 = vadd.xlane.f32.xlu2 %v1224_v7  ;;  %v1142_v29 = vadd.s32 80, %v2729_v2 }
 0x339   : > { %346 = vadd.xlane.f32.xlu0 %v345_v50 }
 0x340   : > { %349 = vadd.xlane.f32.xlu1 %v348_v63  ;;  %1234 = vadd.xlane.f32.xlu2 %v1233_v18  ;;  %v1159_v18 = vadd.s32 %v2737_v31, %v1142_v29 }
 0x341   : > { %355 = vadd.xlane.f32.xlu0 %v354_v61 }
 0x342   : > { %vm1255_vm9 = vcmp.lt.s32.totalorder %v1159_v18, 512 }
 0x345   : > { %v1205_v16 = vpop.xlane.xlu1 %1204 }
 0x346   : > { %v1263_v25 = vsel %vm1247_vm12, %v1205_v16, 0.0 }
 0x348   : > { %358 = vadd.xlane.f32.xlu1 %v357_v36  ;;  %343 = vadd.xlane.f32.xlu2 %v342_v60  ;;  %v1145_v36 = vadd.s32 104, %v2729_v2 }
 0x349   : > { %364 = vadd.xlane.f32.xlu0 %v363_v9 }
 0x34a   : > { %v1162_v16 = vadd.s32 %v2737_v31, %v1145_v36 }
 0x34c   : > { %vm1258_vm4 = vcmp.lt.s32.totalorder %v1162_v16, 512 }
 0x350   : > { %367 = vadd.xlane.f32.xlu1 %v366_v55  ;;  %352 = vadd.xlane.f32.xlu2 %v351_v59 }
 0x358   : > { %361 = vadd.xlane.f32.xlu2 %v360_v8 }
 0x375   : > { %v1199_v23 = vpop.xlane.xlu2 %1198 }
 0x376   : > { %v1261_v58 = vsel %vm1245_vm10, %v1199_v23, 0.0  ;;  %v1161_v23 = vadd.s32 %v2737_v31, %v1144_v14 }
 0x378   : > { %vm1257_vm3 = vcmp.lt.s32.totalorder %v1161_v23, 512 }
 0x37d   : > { %v1202_v52 = vpop.xlane.xlu0 %1201  ;;  %v1208_v43 = vpop.xlane.xlu2 %1207 }
 0x37e   : > { %v1262_v32 = vsel %vm1246_vm0, %v1202_v52, 0.0  ;;  %v1264_v44 = vsel %vm1248_vm13, %v1208_v43, 0.0  ;;  %v2897_v52 = vld [vmem:[#allocation14_spill] sm:$0xff]  ;;  %vm1298_vm0 = vcmask 0  }
 0x37f   : > { %v1277_v3 = vadd.f32 %v1262_v32, %v1261_v58 }
 0x381   : > { %v1278_v30 = vadd.f32 %v1277_v3, %v1263_v25  ;;  %v2899_v3 = vld [vmem:[#allocation19_spill] sm:$0xff] }
 0x383   : > { %v1279_v33 = vadd.f32 %v1278_v30, %v1264_v44 }
 0x38b   : > { %v2733_v11 = vpop.xlane.xlu0 %1237 }
 0x38c   : > { %v1274_v22 = vsel %vm1258_vm4, %v2733_v11, 0.0  ;;  %v2901_v11 = vld [vmem:[#allocation20_spill] sm:$0xff] }
 0x393   : > { %v2745_v38 = vpop.xlane.xlu1 %1240  ;;  %v1211_v39 = vpop.xlane.xlu0 %1210 }
 0x394   : > { %v1265_v47 = vsel %vm1249_vm15, %v1211_v39, 0.0  ;;  %v1275_v31 = vsel %vm1259_vm6, %v2745_v38, 0.0 }
 0x395   : > { %v1280_v48 = vadd.f32 %v1279_v33, %v1265_v47 }
 0x39b   : > { %v2753_v35 = vpop.xlane.xlu2 %1243  ;;  %v1214_v56 = vpop.xlane.xlu1 %1213 }
 0x39c   : > { %v1220_v15 = vpop.xlane.xlu0 %1219  ;;  %v1266_v12 = vsel %vm1250_vm2, %v1214_v56, 0.0  ;;  %v1276_v30 = vsel %vm1260_vm8, %v2753_v35, 0.0 }
 0x39d   : > { %v1281_v17 = vadd.f32 %v1280_v48, %v1266_v12  ;;  %v1268_v63 = vsel %vm1252_vm11, %v1220_v15, 0.0 }
 0x3a3   : > { %v1217_v50 = vpop.xlane.xlu2 %1216  ;;  %v1223_v21 = vpop.xlane.xlu1 %1222 }
 0x3a4   : > { %v1267_v7 = vsel %vm1251_vm5, %v1217_v50, 0.0  ;;  %v1229_v62 = vpop.xlane.xlu0 %1228  ;;  %v1269_v34 = vsel %vm1253_vm14, %v1223_v21, 0.0  ;;  %v2903_v50 = vld [vmem:[#allocation18_spill] sm:$0xff]  ;;  %v2904_v21 = vld [vmem:[#allocation17_spill] sm:$0xff] }
 0x3a5   : > { %v1282_v57 = vadd.f32 %v1281_v17, %v1267_v7  ;;  %v1271_v19 = vsel %vm1255_vm9, %v1229_v62, 0.0 }
 0x3a7   : > { %v1283_v61 = vadd.f32 %v1282_v57, %v1268_v63 }
 0x3a9   : > { %v1284_v60 = vadd.f32 %v1283_v61, %v1269_v34 }
 0x3ab   : > { %v1226_v9 = vpop.xlane.xlu2 %1225  ;;  %v1232_v27 = vpop.xlane.xlu1 %1231 }
 0x3ac   : > { %v1270_v55 = vsel %vm1254_vm7, %v1226_v9, 0.0  ;;  %v347_v59 = vpop.xlane.xlu0 %346  ;;  %v1272_v43 = vsel %vm1256_vm1, %v1232_v27, 0.0 }
 0x3ad   : > { %v1285_v8 = vadd.f32 %v1284_v60, %v1270_v55  ;;  %v1073_v4 = vadd.f32 %v2897_v52, %v347_v59 }
 0x3af   : > { %v1286_v10 = vadd.f32 %v1285_v8, %v1271_v19  ;;  %1089 = vst [vmem:[%s2572_s29 + $0x40] sm:$0xff] %v1073_v4 }
 0x3b1   : > { %v1287_v45 = vadd.f32 %v1286_v10, %v1272_v43 }
 0x3b3   : > { %v1235_v26 = vpop.xlane.xlu2 %1234  ;;  %v350_v39 = vpop.xlane.xlu1 %349 }
 0x3b4   : > { %v1273_v32 = vsel %vm1257_vm3, %v1235_v26, 0.0  ;;  %v1074_v58 = vadd.f32 %v2898_v46, %v350_v39  ;;  %v356_v28 = vpop.xlane.xlu0 %355 }
 0x3b5   : > { %v1288_v2 = vadd.f32 %v1287_v45, %v1273_v32  ;;  %v1076_v24 = vadd.f32 %v2899_v3, %v356_v28 }
 0x3b6   : > { %1090 = vst [vmem:[%s2572_s29 + $0x48] sm:$0xff] %v1074_v58 }
 0x3b7   : > { %v1289_v1 = vadd.f32 %v1288_v2, %v1274_v22  ;;  %1092 = vst [vmem:[%s2572_s29 + $0x58] sm:$0xff] %v1076_v24 }
 0x3b9   : > { %v1290_v25 = vadd.f32 %v1289_v1, %v1275_v31 }
 0x3bb   : > { %v1291_v56 = vadd.f32 %v1290_v25, %v1276_v30  ;;  %v344_v42 = vpop.xlane.xlu2 %343  ;;  %v359_v15 = vpop.xlane.xlu1 %358 }
 0x3bc   : > { %v1072_v44 = vadd.f32 %v2900_v13, %v344_v42  ;;  %v1077_v47 = vadd.f32 %v2901_v11, %v359_v15  ;;  %v365_v33 = vpop.xlane.xlu0 %364 }
 0x3bd   : > { %v1292_v41 = vrot.slane %v1291_v56, 4  ;;  %v1079_v12 = vadd.f32 %v2902_v40, %v365_v33 }
 0x3be   : > { %1088 = vst [vmem:[%s2572_s29 + $0x38] sm:$0xff] %v1072_v44 }
 0x3bf   : > { %v1293_v38 = vadd.f32 %v1292_v41, %v1291_v56  ;;  %1093 = vst [vmem:[%s2572_s29 + $0x60] sm:$0xff] %v1077_v47 }
 0x3c0   : > { %1095 = vst [vmem:[%s2572_s29 + $0x70] sm:$0xff] %v1079_v12 }
 0x3c1   : > { %v1294_v35 = vrot.slane %v1293_v38, 2 }
 0x3c3   : > { %v1295_v48 = vadd.f32 %v1294_v35, %v1293_v38  ;;  %v353_v49 = vpop.xlane.xlu2 %352  ;;  %v368_v17 = vpop.xlane.xlu1 %367 }
 0x3c4   : > { %v1075_v20 = vadd.f32 %v2903_v50, %v353_v49  ;;  %v1080_v29 = vadd.f32 %v2904_v21, %v368_v17 }
 0x3c5   : > { %v1296_v7 = vrot.slane %v1295_v48, 1 }
 0x3c6   : > { %1091 = vst [vmem:[%s2572_s29 + $0x50] sm:$0xff] %v1075_v20 }
 0x3c7   : > { %v1297_v62 = vadd.f32 %v1296_v7, %v1295_v48  ;;  %1096 = vst [vmem:[%s2572_s29 + $0x78] sm:$0xff] %v1080_v29 }
 0x3c9   : > { %1299 = vst.msk [vmem:[%s287_s19] sm:$0x1] %vm1298_vm0, %v1297_v62 }
 0x3cb   : > { %v362_v57 = vpop.xlane.xlu2 %361 }
 0x3cc   : > { %v1078_v63 = vadd.f32 %v2905_v51, %v362_v57 }
 0x3ce   : > { %1094 = vst [vmem:[%s2572_s29 + $0x68] sm:$0xff] %v1078_v63 }
 0x3cf   : > { %1702 = shalt.err (!%p1699_p4)
}
 0x3d0   : > { %s1740_s26 = smov 128   ;;  %s1741_s29 = smov 8  }
 0x3d1   : > { %1617 = dma.vmem_to_hbm [thread:$0]  (%p1815_p5), %s1327_s28, 2048, %s1329_s20, %s1301_s25, %s1740_s26, %s1740_s26, %s1741_s29  }
 0x3d2 PF: > { %p1623_p7 = scmp.ge.s32.totalorder %s1737_s24, 2  ;;  %s1354_s16 = sand.u32 1, %s1725_s21  }
 0x3d3   : > { %s1355_s17 = scalar_lea.sflag [#allocation3], %s1354_s16 }
 0x3d4   : > { %p1620_p8 = pnand %p1623_p7, %p1819_p6 }
 0x3d6   : > { %p1621_p9 = pneg %p1620_p8 }
 0x3d8   : > { %1720 = dma.done.wait (%p1621_p9), %s1355_s17, 2048  }
 0x3d9   : > { %1722 = vsyncadd (%p1621_p9), %s1355_s17, 4294965248  ;;  %p17_p10 = scmp.ge.s32.totalorder %s1802_s27, 6   ;;  %s2906_s21 = smov %s1729_s22 }
 0x3da   : > { %s2907_s22 = smov %s1733_s23  ;;  %s2908_s23 = smov %s1813_s30 }
 0x3db   : > { %s2909_s24 = smov %s1802_s27  ;;  %19 = sbr.rel (!%p17_p10) target bundleno = 3 (0x3), region = 103 }
 0x3e0   :  { %1383 = vsyncpa [#allocation3], 1 }
 0x3e1   :  { %1385 = vsyncpa [#allocation3 + $0x1], 1 }

// kernel: _vq_forward_impl.1
= control target key start
LH: loop header
LB: loop body
LE: loop exit
PB: predicated region body
PF: predicated region fallthrough
CT: control target
= control target key end

     0   :  { %12 = vsyncpa [#allocation3], 0  ;;  %s2835_s0 = inlined_call_operand.vmem [shape: f32[512,8], index: 0, kind: input, shape index: {}]   ;;  %s2836_s1 = inlined_call_operand.vmem [shape: f32[128,8], index: 1, kind: input, shape index: {}]   ;;  %s2837_s2 = inlined_call_operand.vmem [shape: f32[1,128], index: 2, kind: input, shape index: {}]   ;;  %s2838_s3 = inlined_call_operand.hbm [shape: f32[512,128], index: 3, kind: output, shape index: {0}]   ;;  %s2839_s4 = inlined_call_operand.vmem [shape: s32[512,1], index: 4, kind: output, shape index: {1}]   ;;  %s2840_s5 = inlined_call_operand.vmem [shape: f32[512,8], index: 5, kind: output, shape index: {2}]   ;;  %s2841_s6 = inlined_call_operand.vmem [shape: f32[4,1,1], index: 6, kind: output, shape index: {3}]  }
   0x1   :  { %14 = vsyncpa [#allocation3 + $0x1], 0  ;;  %s1777_s21 = smov 0   ;;  %s1779_s22 = smov 0  }
   0x2   :  { %s1781_s23 = smov 0   ;;  %s1783_s24 = smov 0  }
   0x3 LB: > { %s1798_s25 = sadd.s32 4294967295, %s1737_s24   ;;  %s1471_s26 = sadd.s32 4294967294, %s1737_s24   ;;  %s1737_s24 = sphi %s1783_s24, %s2909_s24   ;;  %s1733_s23 = sphi %s1781_s23, %s2908_s23   ;;  %s1729_s22 = sphi %s1779_s22, %s2907_s22   ;;  %s1725_s21 = sphi %s1777_s21, %s2906_s21  }
   0x4   : > { %s1802_s27 = sadd.s32 1, %s1737_s24   ;;  %s95_s28 = sadd.s32 1, %s1733_s23 }
   0x5   : > { %s92_s29 = ssub.s32 %s1737_s24, %s1802_s27  ;;  %p105_p0 = scmp.ne.s32.totalorder %s1733_s23, %s1729_s22 }
   0x6   : > { %p93_p1 = scmp.eq.s32.totalorder %s92_s29, 0  ;;  %p106_p2 = scmp.eq.s32.totalorder %s1798_s25, 3 }
   0x7   : > { %p111_p3 = scmp.ne.s32.totalorder %s1729_s22, %s1725_s21  ;;  %p112_p4 = scmp.eq.s32.totalorder %s1471_s26, 3 }
   0x8   : > { %s1813_s30 = scalar_select %p93_p1, %s1733_s23, %s95_s28  }
   0x9   : > { %p1815_p5 = por %p106_p2, %p105_p0  ;;  %p1819_p6 = por %p112_p4, %p111_p3 }
   0xa   : > { %p1474_p7 = scmp.ge.s32.totalorder %s1737_s24, 1  ;;  %p223_p8 = scmp.lt.s32.totalorder %s1737_s24, 5 }
   0xc   : > { %p224_p9 = pnand %p1474_p7, %p223_p8 }
   0xe   : > { %227 = sbr.rel (%p224_p9) target bundleno = 978 (0x3d2), region = 32 }
  0x13   : > { %vm320_vm0 = vcmask 64512   ;;  %v1828_v0 = vld [vmem:[%s2836_s1 + $0x78] sm:$0xff]  ;;  %v1837_v1 = vld [vmem:[%s2836_s1 + $0x70] sm:$0xff]  ;;  %v1850_v2 = vld [vmem:[%s2836_s1 + $0x68] sm:$0xff]  ;;  %s1476_s11 = sshll.u32 %s1798_s25, 4  ;;  %s244_s26 = sand.u32 1, %s1729_s22  }
  0x14   : > { %1482 = vmatpush.xpose.msk.msra.mxu0 %vm320_vm0, %v1828_v0  ;;  %1553 = vmatpush.xpose.msk.msra.mxu2 %vm320_vm0, %v1828_v0  ;;  %v1858_v3 = vld [vmem:[%s2836_s1 + $0x60] sm:$0xff]  ;;  %v1868_v4 = vld [vmem:[%s2836_s1 + $0x58] sm:$0xff]  ;;  %v1876_v5 = vld [vmem:[%s2836_s1 + $0x50] sm:$0xff]  ;;  %p267_p10 = scmp.lt.s32.totalorder %s1476_s11, 63  ;;  %s1475_s28 = sshll.u32 %s244_s26, 7 }
  0x15   : > { %1554 = vmatpush.xpose.msk.msra.mxu3 %vm320_vm0, %v1828_v0  ;;  %1585 = vmatpush.msra.mxu1 %v1828_v0  ;;  %v1886_v6 = vld [vmem:[%s2836_s1 + $0x48] sm:$0xff]  ;;  %v1894_v7 = vld [vmem:[%s2836_s1 + $0x40] sm:$0xff]  ;;  %v1904_v8 = vld [vmem:[%s2836_s1 + $0x38] sm:$0xff]  ;;  %s2572_s29 = scalar_lea.vmem [#allocation2], %s1475_s28  ;;  %p285_p11 = scmp.lt.s32.totalorder %s1798_s25, 3 }
  0x16   : > { %v1912_v9 = vld [vmem:[%s2836_s1 + $0x30] sm:$0xff]  ;;  %v1922_v10 = vld [vmem:[%s2836_s1 + $0x28] sm:$0xff]  ;;  %v1930_v11 = vld [vmem:[%s2836_s1 + $0x20] sm:$0xff]  ;;  %s2911_s11 = smov (!%p267_p10, %s1476_s11), 63  ;;  %s1326_s28 = sshll.u32 %s2572_s29, 4  ;;  %s1327_s28 = int_to_ptr.vmem [resolvable:$true] %s1326_s28 }
  0x17   : > { %1587 = vmatpush.msra.mxu1 %v1837_v1  ;;  %v1940_v12 = vld [vmem:[%s2836_s1 + $0x18] sm:$0xff]  ;;  %v1948_v13 = vld [vmem:[%s2836_s1 + $0x10] sm:$0xff]  ;;  %v1958_v14 = vld [vmem:[%s2836_s1 + $0x8] sm:$0xff]  ;;  %s2006_s12 = sshll.u32 %s2911_s11, 3 }
  0x18   : > { %1483 = vmatpush.xpose.msk.msra.mxu0 %vm320_vm0, %v1837_v1  ;;  %1555 = vmatpush.xpose.msk.msra.mxu2 %vm320_vm0, %v1837_v1  ;;  %v1966_v15 = vld [vmem:[%s2836_s1] sm:$0xff]  ;;  %s2016_s15 = scalar_lea.vmem %s2835_s0, %s2006_s12  ;;  %s2447_s20 = scalar_lea.vmem %s2839_s4, %s2006_s12 }
  0x19   : > { %1556 = vmatpush.xpose.msk.msra.mxu3 %vm320_vm0, %v1837_v1  ;;  %1589 = vmatpush.msra.mxu1 %v1850_v2  ;;  %v2025_v16 = vld [vmem:[%s2016_s15] sm:$0xff]  ;;  %v2028_v17 = vld [vmem:[%s2016_s15 + $0x28] sm:$0xff]  ;;  %v2048_v20 = vld [vmem:[%s2016_s15 + $0x30] sm:$0xff]  ;;  %s2599_s11 = scalar_lea.vmem %s2840_s5, %s2006_s12  ;;  %s1546_s12 = sshll.u32 %s1798_s25, 7 }
  0x1a   : > { %v300_v18 = vld [vmem:[%s2016_s15 + $0x60] sm:$0xff]  ;;  %v2045_v19 = vld [vmem:[%s2016_s15 + $0x8] sm:$0xff]  ;;  %v2064_v22 = vld [vmem:[%s2016_s15 + $0x10] sm:$0xff]  ;;  %s286_s13 = scalar_select %p285_p11, %s1798_s25, 3 }
  0x1b   : > { %1591 = vmatpush.msra.mxu1 %v1858_v3  ;;  %v301_v21 = vld [vmem:[%s2016_s15 + $0x68] sm:$0xff]  ;;  %v295_v23 = vld [vmem:[%s2016_s15 + $0x38] sm:$0xff]  ;;  %v302_v24 = vld [vmem:[%s2016_s15 + $0x70] sm:$0xff]  ;;  %s1325_s16 = scalar_lea.hbm %s2838_s3, %s1546_s12  ;;  %s1301_s25 = scalar_lea.sflag [#allocation3], %s244_s26 }
  0x1c   : > { %1484 = vmatpush.xpose.msk.msra.mxu0 %vm320_vm0, %v1850_v2  ;;  %1557 = vmatpush.xpose.msk.msra.mxu2 %vm320_vm0, %v1850_v2  ;;  %v2080_v25 = vld [vmem:[%s2016_s15 + $0x18] sm:$0xff]  ;;  %v296_v26 = vld [vmem:[%s2016_s15 + $0x40] sm:$0xff]  ;;  %v297_v29 = vld [vmem:[%s2016_s15 + $0x48] sm:$0xff]  ;;  %s287_s19 = scalar_lea.vmem %s2841_s6, %s286_s13  ;;  %s1695_s13 = scalar_lea.hbm %s2838_s3, 512 }
  0x1d   : > { %1558 = vmatpush.xpose.msk.msra.mxu3 %vm320_vm0, %v1850_v2  ;;  %1593 = vmatpush.msra.mxu1 %v1868_v4  ;;  %v303_v27 = vld [vmem:[%s2016_s15 + $0x78] sm:$0xff]  ;;  %v2096_v28 = vld [vmem:[%s2016_s15 + $0x20] sm:$0xff]  ;;  %v298_v30 = vld [vmem:[%s2016_s15 + $0x50] sm:$0xff] }
  0x1e   : > { %v299_v31 = vld [vmem:[%s2016_s15 + $0x58] sm:$0xff]  ;;  %v1659_v36 = vld [vmem:[%s2837_s2] ss:$0 sm:$0xff] }
  0x1f   : > { %1595 = vmatpush.msra.mxu1 %v1876_v5 }
  0x20   : > { %1485 = vmatpush.xpose.msk.msra.mxu0 %vm320_vm0, %v1858_v3  ;;  %1559 = vmatpush.xpose.msk.msra.mxu2 %vm320_vm0, %v1858_v3 }
  0x21   : > { %1560 = vmatpush.xpose.msk.msra.mxu3 %vm320_vm0, %v1858_v3  ;;  %1597 = vmatpush.msra.mxu1 %v1886_v6 }
  0x23   : > { %1599 = vmatpush.msra.mxu1 %v1894_v7 }
  0x24   : > { %1486 = vmatpush.xpose.msk.msra.mxu0 %vm320_vm0, %v1868_v4  ;;  %1561 = vmatpush.xpose.msk.msra.mxu2 %vm320_vm0, %v1868_v4 }
  0x25   : > { %1562 = vmatpush.xpose.msk.msra.mxu3 %vm320_vm0, %v1868_v4  ;;  %1601 = vmatpush.msra.mxu1 %v1904_v8 }
  0x27   : > { %1603 = vmatpush.msra.mxu1 %v1912_v9 }
  0x28   : > { %1487 = vmatpush.xpose.msk.msra.mxu0 %vm320_vm0, %v1876_v5  ;;  %1563 = vmatpush.xpose.msk.msra.mxu2 %vm320_vm0, %v1876_v5 }
  0x29   : > { %1564 = vmatpush.xpose.msk.msra.mxu3 %vm320_vm0, %v1876_v5  ;;  %1605 = vmatpush.msra.mxu1 %v1922_v10 }
  0x2b   : > { %1607 = vmatpush.msra.mxu1 %v1930_v11 }
  0x2c   : > { %1488 = vmatpush.xpose.msk.msra.mxu0 %vm320_vm0, %v1886_v6  ;;  %1565 = vmatpush.xpose.msk.msra.mxu2 %vm320_vm0, %v1886_v6 }
  0x2d   : > { %1566 = vmatpush.xpose.msk.msra.mxu3 %vm320_vm0, %v1886_v6  ;;  %1609 = vmatpush.msra.mxu1 %v1940_v12 }
  0x2f   : > { %1611 = vmatpush.msra.mxu1 %v1948_v13 }
  0x30   : > { %1489 = vmatpush.xpose.msk.msra.mxu0 %vm320_vm0, %v1894_v7  ;;  %1567 = vmatpush.xpose.msk.msra.mxu2 %vm320_vm0, %v1894_v7 }
  0x31   : > { %1568 = vmatpush.xpose.msk.msra.mxu3 %vm320_vm0, %v1894_v7  ;;  %1613 = vmatpush.msra.mxu1 %v1958_v14 }
  0x33   : > { %1615 = vmatpush.msra.mxu1 %v1966_v15 }
  0x34   : > { %1490 = vmatpush.xpose.msk.msra.mxu0 %vm320_vm0, %v1904_v8  ;;  %1569 = vmatpush.xpose.msk.msra.mxu2 %vm320_vm0, %v1904_v8 }
  0x35   : > { %1570 = vmatpush.xpose.msk.msra.mxu3 %vm320_vm0, %v1904_v8 }
  0x38   : > { %1491 = vmatpush.xpose.msk.msra.mxu0 %vm320_vm0, %v1912_v9  ;;  %1571 = vmatpush.xpose.msk.msra.mxu2 %vm320_vm0, %v1912_v9 }
  0x39   : > { %1572 = vmatpush.xpose.msk.msra.mxu3 %vm320_vm0, %v1912_v9 }
  0x3c   : > { %1492 = vmatpush.xpose.msk.msra.mxu0 %vm320_vm0, %v1922_v10  ;;  %1573 = vmatpush.xpose.msk.msra.mxu2 %vm320_vm0, %v1922_v10 }
  0x3d   : > { %1574 = vmatpush.xpose.msk.msra.mxu3 %vm320_vm0, %v1922_v10 }
  0x40   : > { %1493 = vmatpush.xpose.msk.msra.mxu0 %vm320_vm0, %v1930_v11  ;;  %1575 = vmatpush.xpose.msk.msra.mxu2 %vm320_vm0, %v1930_v11 }
  0x41   : > { %1576 = vmatpush.xpose.msk.msra.mxu3 %vm320_vm0, %v1930_v11 }
  0x44   : > { %1494 = vmatpush.xpose.msk.msra.mxu0 %vm320_vm0, %v1940_v12  ;;  %1577 = vmatpush.xpose.msk.msra.mxu2 %vm320_vm0, %v1940_v12 }
  0x45   : > { %1578 = vmatpush.xpose.msk.msra.mxu3 %vm320_vm0, %v1940_v12 }
  0x48   : > { %1495 = vmatpush.xpose.msk.msra.mxu0 %vm320_vm0, %v1948_v13  ;;  %1579 = vmatpush.xpose.msk.msra.mxu2 %vm320_vm0, %v1948_v13 }
  0x49   : > { %1580 = vmatpush.xpose.msk.msra.mxu3 %vm320_vm0, %v1948_v13 }
  0x4c   : > { %1496 = vmatpush.xpose.msk.msra.mxu0 %vm320_vm0, %v1958_v14  ;;  %1581 = vmatpush.xpose.msk.msra.mxu2 %vm320_vm0, %v1958_v14 }
  0x4d   : > { %1582 = vmatpush.xpose.msk.msra.mxu3 %vm320_vm0, %v1958_v14 }
  0x50   : > { %1497 = vmatpush.xpose.msk.msra.mxu0 %vm320_vm0, %v1966_v15  ;;  %1583 = vmatpush.xpose.msk.msra.mxu2 %vm320_vm0, %v1966_v15 }
  0x51   : > { %1584 = vmatpush.xpose.msk.msra.mxu3 %vm320_vm0, %v1966_v15 }
  0x53   : > { %1498 = vmatmul.msk.f32.vlgmr.msra.gmra.mxu0 %vm320_vm0, %v2025_v16  ;;  %1503 = vmatmul.msk.f32.vlgmr.msra.gmra.mxu2 %vm320_vm0, %v2028_v17 }
  0x54   : > { %920 = vmatpush.msrb.mxu0 %v1828_v0  ;;  %1510 = vmatmul.msk.f32.vlgmr.msra.gmra.mxu3 %vm320_vm0, %v300_v18 }
  0x55   : > { %1586 = vmatpush.msrb.mxu3 %v1828_v0 }
  0x56   : > { %921 = vmatpush.msrb.mxu0 %v1837_v1 }
  0x57   : > { %1588 = vmatpush.msrb.mxu3 %v1837_v1 }
  0x58   : > { %922 = vmatpush.msrb.mxu0 %v1850_v2 }
  0x59   : > { %1590 = vmatpush.msrb.mxu3 %v1850_v2 }
  0x5a   : > { %923 = vmatpush.msrb.mxu0 %v1858_v3 }
  0x5b   : > { %1592 = vmatpush.msrb.mxu3 %v1858_v3  ;;  %1499 = vmatmul.msk.f32.gmra.mxu0 %vm320_vm0, %v2045_v19 }
  0x5c   : > { %924 = vmatpush.msrb.mxu0 %v1868_v4  ;;  %1504 = vmatmul.msk.f32.gmra.mxu2 %vm320_vm0, %v2048_v20 }
  0x5d   : > { %1511 = vmatmul.msk.f32.gmra.mxu3 %vm320_vm0, %v301_v21  ;;  %v2842_v21 = vlaneseq }
  0x5e   : > { %925 = vmatpush.msrb.mxu0 %v1876_v5  ;;  %1594 = vmatpush.msrb.mxu3 %v1868_v4 }
  0x60   : > { %926 = vmatpush.msrb.mxu0 %v1886_v6  ;;  %1596 = vmatpush.msrb.mxu3 %v1876_v5 }
  0x62   : > { %927 = vmatpush.msrb.mxu0 %v1894_v7  ;;  %1598 = vmatpush.msrb.mxu3 %v1886_v6 }
  0x63   : > { %1500 = vmatmul.msk.f32.gmra.mxu0 %vm320_vm0, %v2064_v22 }
  0x64   : > { %928 = vmatpush.msrb.mxu0 %v1904_v8  ;;  %1505 = vmatmul.msk.f32.gmra.mxu2 %vm320_vm0, %v295_v23  ;;  %v2163_v23 = vand.u32 127, %v2842_v21 }
  0x65   : > { %1512 = vmatmul.msk.f32.gmra.mxu3 %vm320_vm0, %v302_v24 }
  0x66   : > { %929 = vmatpush.msrb.mxu0 %v1912_v9  ;;  %1600 = vmatpush.msrb.mxu3 %v1894_v7 }
  0x68   : > { %930 = vmatpush.msrb.mxu0 %v1922_v10  ;;  %1602 = vmatpush.msrb.mxu3 %v1904_v8 }
  0x6a   : > { %931 = vmatpush.msrb.mxu0 %v1930_v11  ;;  %1604 = vmatpush.msrb.mxu3 %v1912_v9 }
  0x6b   : > { %1501 = vmatmul.msk.f32.gmra.mxu0 %vm320_vm0, %v2080_v25 }
  0x6c   : > { %932 = vmatpush.msrb.mxu0 %v1940_v12  ;;  %1506 = vmatmul.msk.f32.gmra.mxu2 %vm320_vm0, %v296_v26 }
  0x6d   : > { %1513 = vmatmul.msk.f32.gmra.mxu3 %vm320_vm0, %v303_v27 }
  0x6e   : > { %933 = vmatpush.msrb.mxu0 %v1948_v13  ;;  %1606 = vmatpush.msrb.mxu3 %v1922_v10 }
  0x70   : > { %934 = vmatpush.msrb.mxu0 %v1958_v14  ;;  %1608 = vmatpush.msrb.mxu3 %v1930_v11 }
  0x72   : > { %935 = vmatpush.msrb.mxu0 %v1966_v15  ;;  %1610 = vmatpush.msrb.mxu3 %v1940_v12 }
  0x73   : > { %1502 = vmatmul.msk.f32.gmra.mxu0 %vm320_vm0, %v2096_v28 }
  0x74   : > { %1507 = vmatmul.msk.f32.gmra.mxu2 %vm320_vm0, %v297_v29  ;;  %1612 = vmatpush.msrb.mxu3 %v1948_v13 }
  0x76   : > { %1614 = vmatpush.msrb.mxu3 %v1958_v14 }
  0x78   : > { %1616 = vmatpush.msrb.mxu3 %v1966_v15 }
  0x7c   : > { %1508 = vmatmul.msk.f32.gmra.mxu2 %vm320_vm0, %v298_v30 }
  0x84   : > { %1509 = vmatmul.msk.f32.gmra.mxu2 %vm320_vm0, %v299_v31 }
  0xd0   : > { %v501_v32 = vpop.f32.mrf.mxu0 }
  0xd1   : > { %v549_v49 = vmul.f32 2.0, %v501_v32 }
  0xd3   : > { %v2126_v51 = vsub.f32 %v1659_v36, %v549_v49 }
  0xd5   : > { %2871 = vst [vmem:[#allocation9_spill] sm:$0xff] %v2126_v51 }
  0xd6   : > { %v516_v33 = vpop.f32.mrf.mxu2 }
  0xd7   : > { %v537_v47 = vpop.f32.mrf.mxu3  ;;  %v554_v56 = vmul.f32 2.0, %v516_v33 }
  0xd8   : > { %v504_v34 = vpop.f32.mrf.mxu0  ;;  %v561_v15 = vmul.f32 2.0, %v537_v47 }
  0xd9   : > { %v550_v57 = vmul.f32 2.0, %v504_v34  ;;  %v2132_v58 = vsub.f32 %v1659_v36, %v554_v56 }
  0xda   : > { %v2159_v18 = vsub.f32 %v1659_v36, %v561_v15 }
  0xdb   : > { %2873 = vst [vmem:[#allocation11_spill] sm:$0xff] %v2132_v58  ;;  %v2134_v59 = vsub.f32 %v1659_v36, %v550_v57 }
  0xdc   : > { %2882 = vst [vmem:[#allocation20_spill] sm:$0xff] %v2159_v18 }
  0xdd   : > { %2874 = vst [vmem:[#allocation12_spill] sm:$0xff] %v2134_v59 }
  0xdf   : > { %v519_v35 = vpop.f32.mrf.mxu2 }
  0xe0   : > { %v555_v37 = vmul.f32 2.0, %v519_v35  ;;  %v507_v38 = vpop.f32.mrf.mxu0  ;;  %v540_v54 = vpop.f32.mrf.mxu3 }
  0xe1   : > { %v551_v40 = vmul.f32 2.0, %v507_v38  ;;  %v562_v60 = vmul.f32 2.0, %v540_v54 }
  0xe2   : > { %v2114_v39 = vsub.f32 %v1659_v36, %v555_v37 }
  0xe3   : > { %v2116_v41 = vsub.f32 %v1659_v36, %v551_v40  ;;  %v2138_v0 = vsub.f32 %v1659_v36, %v562_v60 }
  0xe4   : > { %2867 = vst [vmem:[#allocation5_spill] sm:$0xff] %v2114_v39  ;;  %596 = vmin.xlane.f32.xlu2 %v2114_v39 }
  0xe5   : > { %2868 = vst [vmem:[#allocation6_spill] sm:$0xff] %v2116_v41  ;;  %588 = vmin.xlane.f32.xlu0 %v2116_v41 }
  0xe6   : > { %2875 = vst [vmem:[#allocation13_spill] sm:$0xff] %v2138_v0 }
  0xe7   : > { %v522_v42 = vpop.f32.mrf.mxu2 }
  0xe8   : > { %v556_v43 = vmul.f32 2.0, %v522_v42  ;;  %v510_v44 = vpop.f32.mrf.mxu0  ;;  %v543_v62 = vpop.f32.mrf.mxu3 }
  0xe9   : > { %v552_v46 = vmul.f32 2.0, %v510_v44  ;;  %v563_v2 = vmul.f32 2.0, %v543_v62 }
  0xea   : > { %v2120_v45 = vsub.f32 %v1659_v36, %v556_v43 }
  0xeb   : > { %v2122_v48 = vsub.f32 %v1659_v36, %v552_v46  ;;  %v2144_v4 = vsub.f32 %v1659_v36, %v563_v2 }
  0xec   : > { %2869 = vst [vmem:[#allocation7_spill] sm:$0xff] %v2120_v45  ;;  %598 = vmin.xlane.f32.xlu2 %v2120_v45 }
  0xed   : > { %2870 = vst [vmem:[#allocation8_spill] sm:$0xff] %v2122_v48  ;;  %590 = vmin.xlane.f32.xlu0 %v2122_v48 }
  0xee   : > { %2877 = vst [vmem:[#allocation15_spill] sm:$0xff] %v2144_v4 }
  0xef   : > { %v525_v55 = vpop.f32.mrf.mxu2 }
  0xf0   : > { %v513_v50 = vpop.f32.mrf.mxu0  ;;  %v557_v61 = vmul.f32 2.0, %v525_v55  ;;  %v546_v5 = vpop.f32.mrf.mxu3 }
  0xf1   : > { %v553_v52 = vmul.f32 2.0, %v513_v50  ;;  %v564_v8 = vmul.f32 2.0, %v546_v5 }
  0xf2   : > { %v2140_v1 = vsub.f32 %v1659_v36, %v557_v61 }
  0xf3   : > { %v2128_v53 = vsub.f32 %v1659_v36, %v553_v52  ;;  %v2150_v10 = vsub.f32 %v1659_v36, %v564_v8 }
  0xf4   : > { %584 = vmin.xlane.f32.xlu2 %v2126_v51  ;;  %2876 = vst [vmem:[#allocation14_spill] sm:$0xff] %v2140_v1 }
  0xf5   : > { %2872 = vst [vmem:[#allocation10_spill] sm:$0xff] %v2128_v53  ;;  %592 = vmin.xlane.f32.xlu1 %v2128_v53 }
  0xf6   : > { %2879 = vst [vmem:[#allocation17_spill] sm:$0xff] %v2150_v10 }
  0xf7   : > { %v528_v63 = vpop.f32.mrf.mxu2 }
  0xf8   : > { %v558_v3 = vmul.f32 2.0, %v528_v63 }
  0xfa   : > { %v2146_v7 = vsub.f32 %v1659_v36, %v558_v3 }
  0xfc   : > { %586 = vmin.xlane.f32.xlu2 %v2134_v59  ;;  %2878 = vst [vmem:[#allocation16_spill] sm:$0xff] %v2146_v7 }
  0xfd   : > { %594 = vmin.xlane.f32.xlu1 %v2132_v58 }
  0xff   : > { %v531_v6 = vpop.f32.mrf.mxu2 }
 0x100   : > { %v559_v9 = vmul.f32 2.0, %v531_v6 }
 0x102   : > { %v2152_v11 = vsub.f32 %v1659_v36, %v559_v9 }
 0x104   : > { %610 = vmin.xlane.f32.xlu2 %v2138_v0  ;;  %2880 = vst [vmem:[#allocation18_spill] sm:$0xff] %v2152_v11 }
 0x105   : > { %600 = vmin.xlane.f32.xlu1 %v2140_v1 }
 0x107   : > { %v534_v12 = vpop.f32.mrf.mxu2 }
 0x108   : > { %v560_v13 = vmul.f32 2.0, %v534_v12 }
 0x10a   : > { %v2156_v14 = vsub.f32 %v1659_v36, %v560_v13 }
 0x10c   : > { %612 = vmin.xlane.f32.xlu2 %v2144_v4  ;;  %2881 = vst [vmem:[#allocation19_spill] sm:$0xff] %v2156_v14 }
 0x10d   : > { %602 = vmin.xlane.f32.xlu1 %v2146_v7 }
 0x114   : > { %614 = vmin.xlane.f32.xlu2 %v2150_v10 }
 0x115   : > { %604 = vmin.xlane.f32.xlu1 %v2152_v11 }
 0x11d   : > { %606 = vmin.xlane.f32.xlu1 %v2156_v14 }
 0x125   : > { %608 = vmin.xlane.f32.xlu1 %v2159_v18 }
 0x157   : > { %v2184_v33 = vpop.xlane.xlu2 %596 }
 0x158   : > { %v2165_v24 = vpop.xlane.xlu0 %588  ;;  %vm622_vm5 = vcmp.eq.f32.partialorder %v2114_v39, %v2184_v33 }
 0x159   : > { %vm618_vm1 = vcmp.eq.f32.partialorder %v2116_v41, %v2165_v24  ;;  %v2215_v47 = vsel %vm622_vm5, %v2163_v23, 128 }
 0x15a   : > { %v2170_v26 = vsel %vm618_vm1, %v2163_v23, 128  ;;  %v733_v52 = vshra.s32 %v2215_v47, 16 }
 0x15b   : > { %v677_v27 = vshra.s32 %v2170_v26, 16 }
 0x15c   : > { %v2231_v56 = vcvt.s32.f32 %v733_v52 }
 0x15d   : > { %v2173_v29 = vcvt.s32.f32 %v677_v27 }
 0x15f   : > { %680 = vmin.xlane.f32.xlu0 %v2173_v29  ;;  %v2199_v40 = vpop.xlane.xlu2 %598 }
 0x160   : > { %v2176_v30 = vpop.xlane.xlu0 %590  ;;  %vm623_vm7 = vcmp.eq.f32.partialorder %v2120_v45, %v2199_v40 }
 0x161   : > { %vm619_vm2 = vcmp.eq.f32.partialorder %v2122_v48, %v2176_v30  ;;  %v2236_v60 = vsel %vm623_vm7, %v2163_v23, 128  ;;  %v676_v48 = vand.u32 65535, %v2170_v26 }
 0x162   : > { %v2181_v31 = vsel %vm619_vm2, %v2163_v23, 128  ;;  %v747_v62 = vshra.s32 %v2236_v60, 16 }
 0x163   : > { %v691_v32 = vshra.s32 %v2181_v31, 16  ;;  %v678_v41 = vcvt.s32.f32 %v676_v48 }
 0x164   : > { %v2253_v5 = vcvt.s32.f32 %v747_v62 }
 0x165   : > { %v2186_v34 = vcvt.s32.f32 %v691_v32 }
 0x167   : > { %694 = vmin.xlane.f32.xlu0 %v2186_v34  ;;  %v2218_v49 = vpop.xlane.xlu2 %584 }
 0x168   : > { %v2189_v35 = vpop.xlane.xlu1 %592  ;;  %vm616_vm9 = vcmp.eq.f32.partialorder %v2126_v51, %v2218_v49 }
 0x169   : > { %vm620_vm3 = vcmp.eq.f32.partialorder %v2128_v53, %v2189_v35  ;;  %v2258_v8 = vsel %vm616_vm9, %v2163_v23, 128 }
 0x16a   : > { %v2194_v36 = vsel %vm620_vm3, %v2163_v23, 128  ;;  %v649_v12 = vshra.s32 %v2258_v8, 16 }
 0x16b   : > { %v705_v37 = vshra.s32 %v2194_v36, 16  ;;  %v704_v26 = vand.u32 65535, %v2194_v36 }
 0x16c   : > { %v2275_v32 = vcvt.s32.f32 %v649_v12 }
 0x16d   : > { %v2197_v38 = vcvt.s32.f32 %v705_v37  ;;  %v706_v48 = vcvt.s32.f32 %v704_v26 }
 0x16f   : > { %708 = vmin.xlane.f32.xlu0 %v2197_v38  ;;  %v2245_v63 = vpop.xlane.xlu2 %586 }
 0x170   : > { %v2202_v42 = vpop.xlane.xlu1 %594  ;;  %vm617_vm11 = vcmp.eq.f32.partialorder %v2134_v59, %v2245_v63 }
 0x171   : > { %vm621_vm4 = vcmp.eq.f32.partialorder %v2132_v58, %v2202_v42 }
 0x172   : > { %v2207_v43 = vsel %vm621_vm4, %v2163_v23, 128 }
 0x173   : > { %v719_v44 = vshra.s32 %v2207_v43, 16 }
 0x175   : > { %v2212_v46 = vcvt.s32.f32 %v719_v44  ;;  %v2280_v44 = vsel %vm617_vm11, %v2163_v23, 128 }
 0x177   : > { %722 = vmin.xlane.f32.xlu0 %v2212_v46  ;;  %v2273_v27 = vpop.xlane.xlu2 %610 }
 0x178   : > { %v2220_v50 = vpop.xlane.xlu1 %600  ;;  %vm629_vm13 = vcmp.eq.f32.partialorder %v2138_v0, %v2273_v27 }
 0x179   : > { %vm624_vm6 = vcmp.eq.f32.partialorder %v2140_v1, %v2220_v50  ;;  %v2300_v21 = vsel %vm629_vm13, %v2163_v23, 128 }
 0x17a   : > { %v2226_v54 = vsel %vm624_vm6, %v2163_v23, 128  ;;  %v831_v0 = vshra.s32 %v2300_v21, 16 }
 0x17b   : > { %v761_v55 = vshra.s32 %v2226_v54, 16  ;;  %v760_v36 = vand.u32 65535, %v2226_v54 }
 0x17d   : > { %v2233_v57 = vcvt.s32.f32 %v761_v55  ;;  %v663_v55 = vshra.s32 %v2280_v44, 16  ;;  %v762_v26 = vcvt.s32.f32 %v760_v36 }
 0x17f   : > { %736 = vmin.xlane.f32.xlu0 %v2231_v56  ;;  %764 = vmin.xlane.f32.xlu2 %v2233_v57  ;;  %v2295_v12 = vcvt.s32.f32 %v663_v55 }
 0x180   : > { %v2240_v61 = vpop.xlane.xlu1 %602 }
 0x181   : > { %vm625_vm8 = vcmp.eq.f32.partialorder %v2146_v7, %v2240_v61 }
 0x182   : > { %v2248_v2 = vsel %vm625_vm8, %v2163_v23, 128 }
 0x183   : > { %v775_v3 = vshra.s32 %v2248_v2, 16 }
 0x185   : > { %v2255_v6 = vcvt.s32.f32 %v775_v3 }
 0x187   : > { %750 = vmin.xlane.f32.xlu0 %v2253_v5  ;;  %778 = vmin.xlane.f32.xlu2 %v2255_v6 }
 0x188   : > { %v2262_v9 = vpop.xlane.xlu1 %604 }
 0x189   : > { %vm626_vm10 = vcmp.eq.f32.partialorder %v2152_v11, %v2262_v9  ;;  %v2302_v11 = vpop.xlane.xlu2 %612 }
 0x18a   : > { %v2268_v13 = vsel %vm626_vm10, %v2163_v23, 128  ;;  %vm630_vm15 = vcmp.eq.f32.partialorder %v2144_v4, %v2302_v11 }
 0x18b   : > { %v789_v15 = vshra.s32 %v2268_v13, 16  ;;  %v2322_v1 = vsel %vm630_vm15, %v2163_v23, 128 }
 0x18c   : > { %v845_v58 = vshra.s32 %v2322_v1, 16 }
 0x18d   : > { %v2277_v37 = vcvt.s32.f32 %v789_v15 }
 0x18e   : > { %v2331_v4 = vcvt.s32.f32 %v845_v58 }
 0x18f   : > { %652 = vmin.xlane.f32.xlu0 %v2275_v32  ;;  %792 = vmin.xlane.f32.xlu2 %v2277_v37 }
 0x190   : > { %v2284_v52 = vpop.xlane.xlu1 %606 }
 0x191   : > { %vm627_vm12 = vcmp.eq.f32.partialorder %v2156_v14, %v2284_v52  ;;  %v2317_v14 = vcvt.s32.f32 %v831_v0 }
 0x192   : > { %v2290_v62 = vsel %vm627_vm12, %v2163_v23, 128 }
 0x193   : > { %v803_v3 = vshra.s32 %v2290_v62, 16 }
 0x195   : > { %v2297_v15 = vcvt.s32.f32 %v803_v3 }
 0x197   : > { %666 = vmin.xlane.f32.xlu0 %v2295_v12  ;;  %806 = vmin.xlane.f32.xlu2 %v2297_v15 }
 0x198   : > { %v2306_v45 = vpop.xlane.xlu1 %608 }
 0x199   : > { %vm628_vm14 = vcmp.eq.f32.partialorder %v2159_v18, %v2306_v45  ;;  %v2326_v18 = vpop.xlane.xlu2 %614 }
 0x19a   : > { %v2312_v55 = vsel %vm628_vm14, %v2163_v23, 128  ;;  %2883 = vst [vmem:[#allocation21_spill] sm:$0xff] %v2326_v18  ;;  %vm631_vm1 = vcmp.eq.f32.partialorder %v2150_v10, %v2326_v18  ;;  %v690_v10 = vand.u32 65535, %v2181_v31 }
 0x19b   : > { %v817_v3 = vshra.s32 %v2312_v55, 16  ;;  %v2334_v0 = vsel %vm631_vm1, %v2163_v23, 128 }
 0x19c   : > { %v692_v51 = vcvt.s32.f32 %v690_v10 }
 0x19d   : > { %v2319_v7 = vcvt.s32.f32 %v817_v3  ;;  %v859_v3 = vshra.s32 %v2334_v0, 16 }
 0x19f   : > { %834 = vmin.xlane.f32.xlu0 %v2317_v14  ;;  %820 = vmin.xlane.f32.xlu2 %v2319_v7  ;;  %v2338_v39 = vcvt.s32.f32 %v859_v3 }
 0x1a7   : > { %848 = vmin.xlane.f32.xlu0 %v2331_v4 }
 0x1af   : > { %862 = vmin.xlane.f32.xlu0 %v2338_v39 }
 0x1d2   : > { %v2342_v53 = vpop.xlane.xlu0 %680 }
 0x1d3   : > { %vm682_vm2 = vcmp.eq.f32.partialorder %v2173_v29, %v2342_v53  ;;  %v718_v29 = vand.u32 65535, %v2207_v43 }
 0x1d4   : > { %v683_v58 = vsel %vm682_vm2, %v678_v41, inf }
 0x1d5   : > { %684 = vmin.xlane.f32.xlu1 %v683_v58  ;;  %v720_v10 = vcvt.s32.f32 %v718_v29 }
 0x1da   : > { %v2347_v18 = vpop.xlane.xlu0 %694 }
 0x1db   : > { %vm696_vm3 = vcmp.eq.f32.partialorder %v2186_v34, %v2347_v18  ;;  %v732_v34 = vand.u32 65535, %v2215_v47  ;;  %v746_v47 = vand.u32 65535, %v2236_v60 }
 0x1dc   : > { %v697_v3 = vsel %vm696_vm3, %v692_v51, inf  ;;  %vm1097_vm3 = vcmask 7168  }
 0x1dd   : > { %698 = vmin.xlane.f32.xlu1 %v697_v3 }
 0x1e2   : > { %v2352_v59 = vpop.xlane.xlu0 %708 }
 0x1e3   : > { %vm710_vm4 = vcmp.eq.f32.partialorder %v2197_v38, %v2352_v59  ;;  %v734_v38 = vcvt.s32.f32 %v732_v34 }
 0x1e4   : > { %v711_v41 = vsel %vm710_vm4, %v706_v48, inf  ;;  %vm987_vm4 = vcmp.lt.f32.partialorder %v2165_v24, inf }
 0x1e5   : > { %712 = vmin.xlane.f32.xlu1 %v711_v41  ;;  %v748_v41 = vcvt.s32.f32 %v746_v47 }
 0x1ea   : > { %v2357_v31 = vpop.xlane.xlu0 %722 }
 0x1eb   : > { %vm724_vm5 = vcmp.eq.f32.partialorder %v2212_v46, %v2357_v31 }
 0x1ec   : > { %v725_v51 = vsel %vm724_vm5, %v720_v10, inf }
 0x1ed   : > { %726 = vmin.xlane.f32.xlu1 %v725_v51 }
 0x1f2   : > { %v2363_v58 = vpop.xlane.xlu0 %736  ;;  %v2365_v3 = vpop.xlane.xlu2 %764 }
 0x1f3   : > { %vm738_vm6 = vcmp.eq.f32.partialorder %v2231_v56, %v2363_v58  ;;  %vm766_vm7 = vcmp.eq.f32.partialorder %v2233_v57, %v2365_v3  ;;  %v648_v56 = vand.u32 65535, %v2258_v8  ;;  %v774_v57 = vand.u32 65535, %v2248_v2 }
 0x1f4   : > { %v739_v43 = vsel %vm738_vm6, %v734_v38, inf  ;;  %v767_v46 = vsel %vm766_vm7, %v762_v26, inf  ;;  %v788_v8 = vand.u32 65535, %v2268_v13  ;;  %v662_v2 = vand.u32 65535, %v2280_v44 }
 0x1f5   : > { %740 = vmin.xlane.f32.xlu1 %v739_v43  ;;  %768 = vmin.xlane.f32.xlu2 %v767_v46  ;;  %v650_v51 = vcvt.s32.f32 %v648_v56  ;;  %v776_v34 = vcvt.s32.f32 %v774_v57  ;;  %v830_v13 = vand.u32 65535, %v2300_v21  ;;  %v802_v44 = vand.u32 65535, %v2290_v62 }
 0x1f6   : > { %v790_v38 = vcvt.s32.f32 %v788_v8  ;;  %v664_v26 = vcvt.s32.f32 %v662_v2  ;;  %v844_v21 = vand.u32 65535, %v2322_v1  ;;  %v816_v62 = vand.u32 65535, %v2312_v55 }
 0x1f7   : > { %v832_v47 = vcvt.s32.f32 %v830_v13  ;;  %v305_v1 = vmul.f32 %v2045_v19, %v2045_v19  ;;  %v304_v55 = vmul.f32 %v2025_v16, %v2025_v16  ;;  %v306_v19 = vmul.f32 %v2064_v22, %v2064_v22 }
 0x1f8   : > { %v846_v57 = vcvt.s32.f32 %v844_v21  ;;  %v308_v16 = vmul.f32 %v2096_v28, %v2096_v28  ;;  %v687_v13 = vcvt.f32.s32 %v2342_v53  ;;  %v1739_v53 = vmov 1.0  }
 0x1f9   : > { %v324_v8 = vsel %vm320_vm0, %v305_v1, 0.0  ;;  %vm988_vm6 = vcmp.lt.f32.partialorder %v2176_v30, inf }
 0x1fa   : > { %v2372_v48 = vpop.xlane.xlu0 %750  ;;  %v2374_v54 = vpop.xlane.xlu2 %778 }
 0x1fb   : > { %vm752_vm8 = vcmp.eq.f32.partialorder %v2253_v5, %v2372_v48  ;;  %vm780_vm9 = vcmp.eq.f32.partialorder %v2255_v6, %v2374_v54 }
 0x1fc   : > { %v753_v29 = vsel %vm752_vm8, %v748_v41, inf  ;;  %v781_v5 = vsel %vm780_vm9, %v776_v34, inf  ;;  %v804_v41 = vcvt.s32.f32 %v802_v44  ;;  %vm989_vm8 = vcmp.lt.f32.partialorder %v2189_v35, inf }
 0x1fd   : > { %754 = vmin.xlane.f32.xlu1 %v753_v29 }
 0x202   : > { %v2382_v10 = vpop.xlane.xlu0 %652  ;;  %v2384_v60 = vpop.xlane.xlu2 %792 }
 0x203   : > { %vm654_vm10 = vcmp.eq.f32.partialorder %v2275_v32, %v2382_v10  ;;  %vm794_vm11 = vcmp.eq.f32.partialorder %v2277_v37, %v2384_v60 }
 0x204   : > { %v655_v36 = vsel %vm654_vm10, %v650_v51, inf  ;;  %v795_v32 = vsel %vm794_vm11, %v790_v38, inf  ;;  %v818_v51 = vcvt.s32.f32 %v816_v62  ;;  %v327_v38 = vsel %vm320_vm0, %v306_v19, 0.0 }
 0x205   : > { %656 = vmin.xlane.f32.xlu0 %v655_v36  ;;  %782 = vmin.xlane.f32.xlu1 %v781_v5  ;;  %v858_v36 = vand.u32 65535, %v2334_v0  ;;  %v307_v0 = vmul.f32 %v2080_v25, %v2080_v25  ;;  %vm990_vm10 = vcmp.lt.f32.partialorder %v2202_v42, inf  ;;  %v743_v19 = vcvt.f32.s32 %v2363_v58 }
 0x207   : > { %v860_v5 = vcvt.s32.f32 %v858_v36 }
 0x20a   : > { %v2392_v6 = vpop.xlane.xlu0 %666  ;;  %v2396_v43 = vpop.xlane.xlu2 %806 }
 0x20b   : > { %vm668_vm12 = vcmp.eq.f32.partialorder %v2295_v12, %v2392_v6  ;;  %vm808_vm13 = vcmp.eq.f32.partialorder %v2297_v15, %v2396_v43 }
 0x20c   : > { %v669_v46 = vsel %vm668_vm12, %v664_v26, inf  ;;  %v809_v29 = vsel %vm808_vm13, %v804_v41, inf  ;;  %v333_v26 = vsel %vm320_vm0, %v308_v16, 0.0  ;;  %v771_v16 = vcvt.f32.s32 %v2365_v3 }
 0x20d   : > { %796 = vmin.xlane.f32.xlu0 %v795_v32  ;;  %670 = vmin.xlane.f32.xlu2 %v669_v46  ;;  %v310_v32 = vmul.f32 %v2048_v20, %v2048_v20  ;;  %v309_v46 = vmul.f32 %v2028_v17, %v2028_v17  ;;  %v701_v17 = vcvt.f32.s32 %v2347_v18  ;;  %vm991_vm12 = vcmp.lt.f32.partialorder %v2184_v33, inf }
 0x20e   : > { %vm993_vm13 = vcmp.lt.f32.partialorder %v2220_v50, inf  ;;  %v757_v3 = vcvt.f32.s32 %v2372_v48  ;;  %v785_v48 = vcvt.f32.s32 %v2374_v54 }
 0x20f   : > { %v339_v28 = vsel %vm320_vm0, %v310_v32, 0.0  ;;  %v336_v25 = vsel %vm320_vm0, %v309_v46, 0.0  ;;  %v702_v21 = vshll.u32 %v701_v17, 16  ;;  %v659_v17 = vcvt.f32.s32 %v2382_v10 }
 0x210   : > { %v799_v10 = vcvt.f32.s32 %v2384_v60 }
 0x212   : > { %v2402_v37 = vpop.xlane.xlu0 %834  ;;  %v2406_v56 = vpop.xlane.xlu2 %820 }
 0x213   : > { %vm836_vm14 = vcmp.eq.f32.partialorder %v2317_v14, %v2402_v37  ;;  %vm822_vm15 = vcmp.eq.f32.partialorder %v2319_v7, %v2406_v56 }
 0x214   : > { %v837_v12 = vsel %vm836_vm14, %v832_v47, inf  ;;  %v823_v34 = vsel %vm822_vm15, %v818_v51, inf  ;;  %v688_v47 = vshll.u32 %v687_v13, 16  ;;  %v715_v51 = vcvt.f32.s32 %v2352_v59 }
 0x215   : > { %838 = vmin.xlane.f32.xlu1 %v837_v12  ;;  %810 = vmin.xlane.f32.xlu2 %v809_v29  ;;  %vm992_vm15 = vcmp.lt.f32.partialorder %v2199_v40, inf }
 0x21a   : > { %v2412_v15 = vpop.xlane.xlu0 %848 }
 0x21b   : > { %vm850_vm1 = vcmp.eq.f32.partialorder %v2331_v4, %v2412_v15  ;;  %v321_v4 = vsel %vm320_vm0, %v304_v55, 0.0  ;;  %v729_v55 = vcvt.f32.s32 %v2357_v31 }
 0x21c   : > { %v851_v14 = vsel %vm850_vm1, %v846_v57, inf }
 0x21d   : > { %852 = vmin.xlane.f32.xlu0 %v851_v14  ;;  %824 = vmin.xlane.f32.xlu1 %v823_v34  ;;  %v716_v34 = vshll.u32 %v715_v51, 16 }
 0x222   : > { %v2421_v7 = vpop.xlane.xlu0 %862 }
 0x223   : > { %vm864_vm2 = vcmp.eq.f32.partialorder %v2338_v39, %v2421_v7  ;;  %v330_v39 = vsel %vm320_vm0, %v307_v0, 0.0 }
 0x224   : > { %v865_v2 = vsel %vm864_vm2, %v860_v5, inf  ;;  %vm985_vm2 = vcmp.lt.f32.partialorder %v2218_v49, inf }
 0x225   : > { %866 = vmin.xlane.f32.xlu2 %v865_v2  ;;  %325 = vadd.xlane.f32.xlu1 %v324_v8  ;;  %v730_v8 = vshll.u32 %v729_v55, 16  ;;  %v800_v55 = vshll.u32 %v799_v10, 16  ;;  %v2885_v10 = vld [vmem:[#allocation9_spill] sm:$0xff] }
 0x226   : > { %322 = vadd.xlane.f32.xlu0 %v321_v4 }
 0x22d   : > { %328 = vadd.xlane.f32.xlu2 %v327_v38  ;;  %334 = vadd.xlane.f32.xlu1 %v333_v26  ;;  %v744_v26 = vshll.u32 %v743_v19, 16  ;;  %v813_v19 = vcvt.f32.s32 %v2396_v43 }
 0x22e   : > { %331 = vadd.xlane.f32.xlu0 %v330_v39  ;;  %v772_v39 = vshll.u32 %v771_v16, 16  ;;  %v841_v16 = vcvt.f32.s32 %v2402_v37 }
 0x235   : > { %340 = vadd.xlane.f32.xlu1 %v339_v28 }
 0x236   : > { %337 = vadd.xlane.f32.xlu0 %v336_v25 }
 0x248   : > { %v685_v44 = vpop.xlane.xlu1 %684 }
 0x249   : > { %v686_v41 = vcvt.f32.s32 %v685_v44 }
 0x24b   : > { %v689_v12 = vadd.s32 %v688_v47, %v686_v41  ;;  %v758_v47 = vshll.u32 %v757_v3, 16  ;;  %v855_v3 = vcvt.f32.s32 %v2412_v15 }
 0x24d   : > { %vm874_vm5 = vcmp.eq.s32.totalorder %v2163_v23, %v689_v12  ;;  %v1003_v20 = vsel %vm987_vm4, %v689_v12, 0 }
 0x24e   : > { %1532 = vmatmul.msk.f32.vlgmr.msra.gmra.mxu1 %vm874_vm5, %v1739_v53  ;;  %1100 = vst.msk [vmem:[%s2447_s20 + $0x10] sm:$0xff] %vm1097_vm3, %v1003_v20  ;;  %vm994_vm5 = vcmp.lt.f32.partialorder %v2240_v61, inf }
 0x250   : > { %v699_v29 = vpop.xlane.xlu1 %698 }
 0x251   : > { %v700_v62 = vcvt.f32.s32 %v699_v29 }
 0x253   : > { %v703_v57 = vadd.s32 %v702_v21, %v700_v62  ;;  %v786_v62 = vshll.u32 %v785_v48, 16 }
 0x255   : > { %vm875_vm7 = vcmp.eq.s32.totalorder %v2163_v23, %v703_v57  ;;  %v1004_v18 = vsel %vm988_vm6, %v703_v57, 0  ;;  %v660_v57 = vshll.u32 %v659_v17, 16 }
 0x256   : > { %1533 = vmatmul.msk.f32.gmra.mxu1 %vm875_vm7, %v1739_v53  ;;  %1101 = vst.msk [vmem:[%s2447_s20 + $0x18] sm:$0xff] %vm1097_vm3, %v1004_v18 }
 0x258   : > { %v713_v14 = vpop.xlane.xlu1 %712 }
 0x259   : > { %v714_v36 = vcvt.f32.s32 %v713_v14 }
 0x25b   : > { %v717_v1 = vadd.s32 %v716_v34, %v714_v36  ;;  %v673_v34 = vcvt.f32.s32 %v2392_v6 }
 0x25d   : > { %vm876_vm9 = vcmp.eq.s32.totalorder %v2163_v23, %v717_v1  ;;  %v1005_v59 = vsel %vm989_vm8, %v717_v1, 0 }
 0x25e   : > { %1534 = vmatmul.msk.f32.gmra.mxu1 %vm876_vm9, %v1739_v53  ;;  %1102 = vst.msk [vmem:[%s2447_s20 + $0x20] sm:$0xff] %vm1097_vm3, %v1005_v59  ;;  %v674_v59 = vshll.u32 %v673_v34, 16 }
 0x260   : > { %v727_v5 = vpop.xlane.xlu1 %726 }
 0x261   : > { %v728_v4 = vcvt.f32.s32 %v727_v5 }
 0x263   : > { %v731_v2 = vadd.s32 %v730_v8, %v728_v4 }
 0x265   : > { %vm877_vm11 = vcmp.eq.s32.totalorder %v2163_v23, %v731_v2  ;;  %v1006_v31 = vsel %vm990_vm10, %v731_v2, 0 }
 0x266   : > { %1535 = vmatmul.msk.f32.gmra.mxu1 %vm877_vm11, %v1739_v53  ;;  %1103 = vst.msk [vmem:[%s2447_s20 + $0x28] sm:$0xff] %vm1097_vm3, %v1006_v31  ;;  %vm986_vm11 = vcmp.lt.f32.partialorder %v2245_v63, inf }
 0x268   : > { %v769_v0 = vpop.xlane.xlu2 %768  ;;  %v741_v38 = vpop.xlane.xlu1 %740 }
 0x269   : > { %v770_v32 = vcvt.f32.s32 %v769_v0  ;;  %v742_v46 = vcvt.f32.s32 %v741_v38  ;;  %v814_v38 = vshll.u32 %v813_v19, 16 }
 0x26b   : > { %v773_v58 = vadd.s32 %v772_v39, %v770_v32  ;;  %v745_v28 = vadd.s32 %v744_v26, %v742_v46  ;;  %v842_v26 = vshll.u32 %v841_v16, 16 }
 0x26d   : > { %vm878_vm14 = vcmp.eq.s32.totalorder %v2163_v23, %v745_v28  ;;  %v1007_v25 = vsel %vm991_vm12, %v745_v28, 0  ;;  %v1009_v13 = vsel %vm993_vm13, %v773_v58, 0  ;;  %vm880_vm9 = vcmp.eq.s32.totalorder %v2163_v23, %v773_v58 }
 0x26e   : > { %1536 = vmatmul.msk.f32.gmra.mxu1 %vm878_vm14, %v1739_v53  ;;  %1104 = vst.msk [vmem:[%s2447_s20 + $0x30] sm:$0xff] %vm1097_vm3, %v1007_v25  ;;  %vm2861_vm14 = vcmp.lt.f32.partialorder %v2262_v9, inf  ;;  %v827_v28 = vcvt.f32.s32 %v2406_v56 }
 0x26f   : > { %1106 = vst.msk [vmem:[%s2447_s20 + $0x40] sm:$0xff] %vm1097_vm3, %v1009_v13 }
 0x270   : > { %v755_v44 = vpop.xlane.xlu1 %754 }
 0x271   : > { %v756_v41 = vcvt.f32.s32 %v755_v44  ;;  %v828_v44 = vshll.u32 %v827_v28, 16 }
 0x273   : > { %v759_v12 = vadd.s32 %v758_v47, %v756_v41  ;;  %v856_v47 = vshll.u32 %v855_v3, 16 }
 0x275   : > { %vm879_vm1 = vcmp.eq.s32.totalorder %v2163_v23, %v759_v12  ;;  %v1008_v20 = vsel %vm992_vm15, %v759_v12, 0 }
 0x276   : > { %1537 = vmatmul.msk.f32.gmra.mxu1 %vm879_vm1, %v1739_v53  ;;  %1105 = vst.msk [vmem:[%s2447_s20 + $0x38] sm:$0xff] %vm1097_vm3, %v1008_v20  ;;  %v869_v20 = vcvt.f32.s32 %v2421_v7 }
 0x278   : > { %v657_v29 = vpop.xlane.xlu0 %656  ;;  %v783_v21 = vpop.xlane.xlu1 %782 }
 0x279   : > { %v658_v51 = vcvt.f32.s32 %v657_v29  ;;  %v784_v18 = vcvt.f32.s32 %v783_v21 }
 0x27b   : > { %v661_v54 = vadd.s32 %v660_v57, %v658_v51  ;;  %v787_v14 = vadd.s32 %v786_v62, %v784_v18  ;;  %v870_v57 = vshll.u32 %v869_v20, 16  ;;  %v2884_v18 = vld [vmem:[#allocation12_spill] sm:$0xff] }
 0x27d   : > { %vm872_vm7 = vcmp.eq.s32.totalorder %v2163_v23, %v661_v54  ;;  %v1001_v36 = vsel %vm985_vm2, %v661_v54, 0  ;;  %v1010_v1 = vsel %vm994_vm5, %v787_v14, 0 }
 0x27e   : > { %1530 = vmatmul.msk.f32.vlgmr.msrb.gmra.mxu0 %vm872_vm7, %v1739_v53  ;;  %1538 = vmatmul.msk.f32.gmra.mxu1 %vm880_vm9, %v1739_v53  ;;  %1098 = vst.msk [vmem:[%s2447_s20] sm:$0xff] %vm1097_vm3, %v1001_v36  ;;  %vm881_vm7 = vcmp.eq.s32.totalorder %v2163_v23, %v787_v14  ;;  %vm2863_vm9 = vcmp.lt.f32.partialorder %v2273_v27, inf }
 0x27f   : > { %1107 = vst.msk [vmem:[%s2447_s20 + $0x48] sm:$0xff] %vm1097_vm3, %v1010_v1  ;;  %v2886_v1 = vld [vmem:[#allocation21_spill] sm:$0xff] }
 0x280   : > { %v797_v60 = vpop.xlane.xlu0 %796  ;;  %v671_v6 = vpop.xlane.xlu2 %670 }
 0x281   : > { %v798_v5 = vcvt.f32.s32 %v797_v60  ;;  %v672_v8 = vcvt.f32.s32 %v671_v6 }
 0x283   : > { %v801_v4 = vadd.s32 %v800_v55, %v798_v5  ;;  %v675_v2 = vadd.s32 %v674_v59, %v672_v8  ;;  %v2887_v59 = vld [vmem:[#allocation6_spill] sm:$0xff] }
 0x284   : > { %v2888_v8 = vld [vmem:[#allocation10_spill] sm:$0xff] }
 0x285   : > { %vm873_vm1 = vcmp.eq.s32.totalorder %v2163_v23, %v675_v2  ;;  %v1002_v31 = vsel %vm986_vm11, %v675_v2, 0  ;;  %v1011_v0 = vsel %vm2861_vm14, %v801_v4, 0 }
 0x286   : > { %1531 = vmatmul.msk.f32.gmra.mxu0 %vm873_vm1, %v1739_v53  ;;  %1539 = vmatmul.msk.f32.gmra.mxu1 %vm881_vm7, %v1739_v53  ;;  %1099 = vst.msk [vmem:[%s2447_s20 + $0x8] sm:$0xff] %vm1097_vm3, %v1002_v31  ;;  %vm2862_vm1 = vcmp.lt.f32.partialorder %v2284_v52, inf  ;;  %vm882_vm7 = vcmp.eq.s32.totalorder %v2163_v23, %v801_v4  ;;  %v2890_v31 = vld [vmem:[#allocation5_spill] sm:$0xff] }
 0x287   : > { %1108 = vst.msk [vmem:[%s2447_s20 + $0x50] sm:$0xff] %vm1097_vm3, %v1011_v0 }
 0x288   : > { %v811_v43 = vpop.xlane.xlu2 %810  ;;  %v839_v37 = vpop.xlane.xlu1 %838 }
 0x289   : > { %v812_v39 = vcvt.f32.s32 %v811_v43  ;;  %v840_v32 = vcvt.f32.s32 %v839_v37  ;;  %v2891_v43 = vld [vmem:[#allocation11_spill] sm:$0xff] }
 0x28b   : > { %v815_v46 = vadd.s32 %v814_v38, %v812_v39  ;;  %v843_v58 = vadd.s32 %v842_v26, %v840_v32 }
 0x28d   : > { %vm885_vm14 = vcmp.eq.s32.totalorder %v2163_v23, %v843_v58  ;;  %v1014_v25 = vsel %vm2863_vm9, %v843_v58, 0  ;;  %v1012_v13 = vsel %vm2862_vm1, %v815_v46, 0  ;;  %vm883_vm1 = vcmp.eq.s32.totalorder %v2163_v23, %v815_v46 }
 0x28e   : > { %1540 = vmatmul.msk.f32.gmra.mxu1 %vm882_vm7, %v1739_v53  ;;  %1543 = vmatmul.msk.f32.vlgmr.msrb.gmra.mxu3 %vm885_vm14, %v1739_v53  ;;  %1111 = vst.msk [vmem:[%s2447_s20 + $0x68] sm:$0xff] %vm1097_vm3, %v1014_v25  ;;  %vm999_vm14 = vcmp.lt.f32.partialorder %v2302_v11, inf  ;;  %vm2864_vm7 = vcmp.lt.f32.partialorder %v2306_v45, inf }
 0x28f   : > { %1109 = vst.msk [vmem:[%s2447_s20 + $0x58] sm:$0xff] %vm1097_vm3, %v1012_v13 }
 0x290   : > { %v853_v56 = vpop.xlane.xlu0 %852  ;;  %v825_v15 = vpop.xlane.xlu1 %824 }
 0x291   : > { %v854_v41 = vcvt.f32.s32 %v853_v56  ;;  %v826_v12 = vcvt.f32.s32 %v825_v15 }
 0x293   : > { %v857_v48 = vadd.s32 %v856_v47, %v854_v41  ;;  %v829_v17 = vadd.s32 %v828_v44, %v826_v12  ;;  %v1660_v47 = vld [vmem:[%s2016_s15] sm:$0xff]  ;;  %v1661_v12 = vld [vmem:[%s2016_s15 + $0x18] sm:$0xff] }
 0x295   : > { %vm886_vm9 = vcmp.eq.s32.totalorder %v2163_v23, %v857_v48  ;;  %v1015_v29 = vsel %vm999_vm14, %v857_v48, 0  ;;  %v1013_v21 = vsel %vm2864_vm7, %v829_v17, 0 }
 0x296   : > { %1541 = vmatmul.msk.f32.gmra.mxu1 %vm883_vm1, %v1739_v53  ;;  %1544 = vmatmul.msk.f32.gmra.mxu3 %vm886_vm9, %v1739_v53  ;;  %1112 = vst.msk [vmem:[%s2447_s20 + $0x70] sm:$0xff] %vm1097_vm3, %v1015_v29  ;;  %vm1000_vm9 = vcmp.lt.f32.partialorder %v2886_v1, inf  ;;  %vm884_vm1 = vcmp.eq.s32.totalorder %v2163_v23, %v829_v17 }
 0x297   : > { %1110 = vst.msk [vmem:[%s2447_s20 + $0x60] sm:$0xff] %vm1097_vm3, %v1013_v21 }
 0x298   : > { %v867_v7 = vpop.xlane.xlu2 %866  ;;  %v326_v62 = vpop.xlane.xlu1 %325 }
 0x299   : > { %v868_v51 = vcvt.f32.s32 %v867_v7  ;;  %v1066_v54 = vadd.f32 %v2884_v18, %v326_v62  ;;  %v323_v14 = vpop.xlane.xlu0 %322  ;;  %v1662_v7 = vld [vmem:[%s2016_s15 + $0x8] sm:$0xff] }
 0x29a   : > { %v1065_v34 = vadd.f32 %v2885_v10, %v323_v14  ;;  %v2667_v10 = vld [vmem:[%s2016_s15 + $0x68] sm:$0xff] }
 0x29b   : > { %v871_v36 = vadd.s32 %v870_v57, %v868_v51  ;;  %1082 = vst [vmem:[%s2572_s29 + $0x8] sm:$0xff] %v1066_v54 }
 0x29c   : > { %1081 = vst [vmem:[%s2572_s29] sm:$0xff] %v1065_v34 }
 0x29d   : > { %vm887_vm7 = vcmp.eq.s32.totalorder %v2163_v23, %v871_v36  ;;  %v1016_v60 = vsel %vm1000_vm9, %v871_v36, 0  ;;  %v2889_v23 = vld [vmem:[#allocation8_spill] sm:$0xff] }
 0x29e   : > { %1542 = vmatmul.msk.f32.gmra.mxu1 %vm884_vm1, %v1739_v53  ;;  %1545 = vmatmul.msk.f32.gmra.mxu3 %vm887_vm7, %v1739_v53  ;;  %1113 = vst.msk [vmem:[%s2447_s20 + $0x78] sm:$0xff] %vm1097_vm3, %v1016_v60  ;;  %vm2892_vm3 = vcmp.lt.f32.partialorder %v2262_v9, inf  ;;  %s1328_s20 = sshll.u32 %s1325_s16, 4  ;;  %s1329_s20 = int_to_ptr.hbm [resolvable:$true] %s1328_s20 }
 0x29f   : > { %s1689_s9 = sshra.s32 %s1329_s20, 4  ;;  %s1690_s9 = int_to_ptr.hbm [resolvable:$true] %s1689_s9 }
 0x2a0   : > { %v329_v6 = vpop.xlane.xlu2 %328  ;;  %v335_v55 = vpop.xlane.xlu1 %334  ;;  %s1691_s10 = scalar_lea.hbm %s1690_s9, 128  ;;  %p1696_p1 = scmp.lt.s32.totalorder %s1690_s9, %s2838_s3 }
 0x2a1   : > { %v1067_v5 = vadd.f32 %v2887_v59, %v329_v6  ;;  %v1069_v4 = vadd.f32 %v2888_v8, %v335_v55  ;;  %v332_v2 = vpop.xlane.xlu0 %331  ;;  %v1664_v6 = vld [vmem:[%s2016_s15 + $0x20] sm:$0xff]  ;;  %p1692_p12 = scmp.ne.s32.totalorder %s1690_s9, %s1691_s10  ;;  %p1697_p2 = scmp.lt.s32.totalorder %s1695_s13, %s1691_s10 }
 0x2a2   : > { %v1068_v19 = vadd.f32 %v2889_v23, %v332_v2 }
 0x2a3   : > { %1083 = vst [vmem:[%s2572_s29 + $0x10] sm:$0xff] %v1067_v5  ;;  %p1693_p13 = pnand %p1692_p12, %p1815_p5  ;;  %p1698_p3 = por %p1697_p2, %p1696_p1 }
 0x2a4   : > { %1085 = vst [vmem:[%s2572_s29 + $0x20] sm:$0xff] %v1069_v4 }
 0x2a5   : > { %1084 = vst [vmem:[%s2572_s29 + $0x18] sm:$0xff] %v1068_v19  ;;  %p1694_p0 = pneg %p1693_p13 }
 0x2a7   : > { %p1699_p4 = pnand %p1698_p3, %p1694_p0 }
 0x2a8   : > { %v341_v16 = vpop.xlane.xlu1 %340 }
 0x2a9   : > { %v1071_v0 = vadd.f32 %v2890_v31, %v341_v16  ;;  %v338_v53 = vpop.xlane.xlu0 %337  ;;  %v1666_v16 = vld [vmem:[%s2016_s15 + $0x28] sm:$0xff] }
 0x2aa   : > { %v1070_v37 = vadd.f32 %v2891_v43, %v338_v53  ;;  %v1667_v53 = vld [vmem:[%s2016_s15 + $0x38] sm:$0xff] }
 0x2ab   : > { %1087 = vst [vmem:[%s2572_s29 + $0x30] sm:$0xff] %v1071_v0 }
 0x2ac   : > { %1086 = vst [vmem:[%s2572_s29 + $0x28] sm:$0xff] %v1070_v37 }
 0x2cb   : > { %v943_v38 = vpop.f32.mrf.mxu1 }
 0x2cc   : > { %v1051_v26 = vsel %vm987_vm4, %v943_v38, 0.0  ;;  %vm2893_vm4 = vcmp.lt.f32.partialorder %v2273_v27, inf }
 0x2cd   : > { %1116 = vst.msk [vmem:[%s2599_s11 + $0x10] sm:$0xff] %vm320_vm0, %v1051_v26  ;;  %v1167_v39 = vsub.f32 %v1051_v26, %v2064_v22  ;;  %v1668_v26 = vld [vmem:[%s2016_s15 + $0x78] sm:$0xff] }
 0x2cf   : > { %v1183_v32 = vmul.f32 %v1167_v39, %v1167_v39 }
 0x2d1   : > { %v1203_v46 = vsel %vm320_vm0, %v1183_v32, 0.0 }
 0x2d2   : > { %1204 = vadd.xlane.f32.xlu1 %v1203_v46 }
 0x2d3   : > { %v946_v58 = vpop.f32.mrf.mxu1 }
 0x2d4   : > { %v1052_v28 = vsel %vm988_vm6, %v946_v58, 0.0  ;;  %vm2894_vm6 = vcmp.lt.f32.partialorder %v2284_v52, inf  ;;  %v2681_v52 = vld [vmem:[%s2016_s15 + $0x70] sm:$0xff] }
 0x2d5   : > { %1117 = vst.msk [vmem:[%s2599_s11 + $0x18] sm:$0xff] %vm320_vm0, %v1052_v28  ;;  %v1168_v48 = vsub.f32 %v1052_v28, %v1661_v12  ;;  %v1669_v58 = vld [vmem:[%s2016_s15 + $0x30] sm:$0xff] }
 0x2d7   : > { %v1184_v21 = vmul.f32 %v1168_v48, %v1168_v48 }
 0x2d9   : > { %v1206_v51 = vsel %vm320_vm0, %v1184_v21, 0.0 }
 0x2db   : > { %v949_v3 = vpop.f32.mrf.mxu1 }
 0x2dc   : > { %v1053_v24 = vsel %vm989_vm8, %v949_v3, 0.0  ;;  %vm2895_vm8 = vcmp.lt.f32.partialorder %v2306_v45, inf  ;;  %v1670_v3 = vld [vmem:[%s2016_s15 + $0x40] sm:$0xff] }
 0x2dd   : > { %1118 = vst.msk [vmem:[%s2599_s11 + $0x20] sm:$0xff] %vm320_vm0, %v1053_v24  ;;  %v1169_v27 = vsub.f32 %v1053_v24, %v1664_v6  ;;  %v312_v48 = vmul.f32 %v1670_v3, %v1670_v3  ;;  %v319_v6 = vmul.f32 %v1668_v26, %v1668_v26 }
 0x2df   : > { %v1185_v8 = vmul.f32 %v1169_v27, %v1169_v27 }
 0x2e1   : > { %v1209_v0 = vsel %vm320_vm0, %v1185_v8, 0.0 }
 0x2e3   : > { %v952_v22 = vpop.f32.mrf.mxu1 }
 0x2e4   : > { %v1054_v25 = vsel %vm990_vm10, %v952_v22, 0.0 }
 0x2e5   : > { %1119 = vst.msk [vmem:[%s2599_s11 + $0x28] sm:$0xff] %vm320_vm0, %v1054_v25  ;;  %v1170_v11 = vsub.f32 %v1054_v25, %v1666_v16  ;;  %v1671_v25 = vld [vmem:[%s2016_s15 + $0x50] sm:$0xff] }
 0x2e6   : > { %v314_v27 = vmul.f32 %v1671_v25, %v1671_v25 }
 0x2e7   : > { %v1186_v38 = vmul.f32 %v1170_v11, %v1170_v11 }
 0x2e9   : > { %v1212_v22 = vsel %vm320_vm0, %v1186_v38, 0.0 }
 0x2eb   : > { %v955_v30 = vpop.f32.mrf.mxu1 }
 0x2ec   : > { %v2621_v13 = vsel %vm991_vm12, %v955_v30, 0.0 }
 0x2ed   : > { %1120 = vst.msk [vmem:[%s2599_s11 + $0x30] sm:$0xff] %vm320_vm0, %v2621_v13  ;;  %v1171_v28 = vsub.f32 %v2621_v13, %v1669_v58  ;;  %v1672_v13 = vld [vmem:[%s2016_s15 + $0x48] sm:$0xff] }
 0x2f3   : > { %v958_v35 = vpop.f32.mrf.mxu1 }
 0x2f4   : > { %v1056_v56 = vsel %vm992_vm15, %v958_v35, 0.0 }
 0x2f5   : > { %1121 = vst.msk [vmem:[%s2599_s11 + $0x38] sm:$0xff] %vm320_vm0, %v1056_v56  ;;  %v1172_v43 = vsub.f32 %v1056_v56, %v1667_v53  ;;  %v1187_v56 = vmul.f32 %v1171_v28, %v1171_v28 }
 0x2f7   : > { %v1188_v32 = vmul.f32 %v1172_v43, %v1172_v43 }
 0x2f9   : > { %v1218_v35 = vsel %vm320_vm0, %v1188_v32, 0.0 }
 0x2fb   : > { %v937_v42 = vpop.f32.mrf.mxu0  ;;  %v961_v15 = vpop.f32.mrf.mxu1 }
 0x2fc   : > { %v1049_v44 = vsel %vm985_vm2, %v937_v42, 0.0  ;;  %v2634_v33 = vsel %vm993_vm13, %v961_v15, 0.0 }
 0x2fd   : > { %1114 = vst.msk [vmem:[%s2599_s11] sm:$0xff] %vm320_vm0, %v1049_v44  ;;  %v1165_v41 = vsub.f32 %v1049_v44, %v1660_v47  ;;  %v1173_v24 = vsub.f32 %v2634_v33, %v1670_v3  ;;  %v1673_v47 = vld [vmem:[%s2016_s15 + $0x58] sm:$0xff] }
 0x2fe   : > { %1122 = vst.msk [vmem:[%s2599_s11 + $0x40] sm:$0xff] %vm320_vm0, %v2634_v33 }
 0x2ff   : > { %v1181_v40 = vmul.f32 %v1165_v41, %v1165_v41  ;;  %v1189_v42 = vmul.f32 %v1173_v24, %v1173_v24 }
 0x301   : > { %v1197_v49 = vsel %vm320_vm0, %v1181_v40, 0.0  ;;  %v1221_v41 = vsel %vm320_vm0, %v1189_v42, 0.0  ;;  %v1215_v40 = vsel %vm320_vm0, %v1187_v56, 0.0 }
 0x302   : > { %1198 = vadd.xlane.f32.xlu2 %v1197_v49 }
 0x303   : > { %v940_v17 = vpop.f32.mrf.mxu0  ;;  %v964_v50 = vpop.f32.mrf.mxu1 }
 0x304   : > { %v1050_v20 = vsel %vm986_vm11, %v940_v17, 0.0  ;;  %v2648_v29 = vsel %vm994_vm5, %v964_v50, 0.0  ;;  %v345_v50 = vsel %vm320_vm0, %v312_v48, 0.0 }
 0x305   : > { %1115 = vst.msk [vmem:[%s2599_s11 + $0x8] sm:$0xff] %vm320_vm0, %v1050_v20  ;;  %v1166_v62 = vsub.f32 %v1050_v20, %v1662_v7  ;;  %v1174_v44 = vsub.f32 %v2648_v29, %v1672_v13  ;;  %v1674_v20 = vld [vmem:[%s2016_s15 + $0x60] sm:$0xff] }
 0x306   : > { %1123 = vst.msk [vmem:[%s2599_s11 + $0x48] sm:$0xff] %vm320_vm0, %v2648_v29 }
 0x307   : > { %v1182_v57 = vmul.f32 %v1166_v62, %v1166_v62  ;;  %v1190_v49 = vmul.f32 %v1174_v44, %v1174_v44  ;;  %v313_v62 = vmul.f32 %v1672_v13, %v1672_v13 }
 0x309   : > { %v1200_v63 = vsel %vm320_vm0, %v1182_v57, 0.0  ;;  %v1224_v7 = vsel %vm320_vm0, %v1190_v49, 0.0  ;;  %v315_v57 = vmul.f32 %v1673_v47, %v1673_v47 }
 0x30a   : > { %1207 = vadd.xlane.f32.xlu2 %v1206_v51  ;;  %1201 = vadd.xlane.f32.xlu0 %v1200_v63  ;;  %v348_v63 = vsel %vm320_vm0, %v313_v62, 0.0 }
 0x30b   : > { %v967_v61 = vpop.f32.mrf.mxu1 }
 0x30c   : > { %v1059_v18 = vsel %vm2892_vm3, %v967_v61, 0.0  ;;  %v354_v61 = vsel %vm320_vm0, %v315_v57, 0.0 }
 0x30d   : > { %1124 = vst.msk [vmem:[%s2599_s11 + $0x50] sm:$0xff] %vm320_vm0, %v1059_v18  ;;  %v1175_v30 = vsub.f32 %v1059_v18, %v1671_v25 }
 0x30f   : > { %v1191_v15 = vmul.f32 %v1175_v30, %v1175_v30 }
 0x311   : > { %v976_v54 = vpop.f32.mrf.mxu3  ;;  %v1227_v12 = vsel %vm320_vm0, %v1191_v15, 0.0 }
 0x312   : > { %v1062_v14 = vsel %vm2893_vm4, %v976_v54, 0.0  ;;  %v316_v54 = vmul.f32 %v1674_v20, %v1674_v20 }
 0x313   : > { %1127 = vst.msk [vmem:[%s2599_s11 + $0x68] sm:$0xff] %vm320_vm0, %v1062_v14  ;;  %v1178_v34 = vsub.f32 %v1062_v14, %v2667_v10  ;;  %v970_v36 = vpop.f32.mrf.mxu1  ;;  %v311_v14 = vmul.f32 %v1667_v53, %v1667_v53 }
 0x314   : > { %v1060_v60 = vsel %vm2894_vm6, %v970_v36, 0.0  ;;  %v357_v36 = vsel %vm320_vm0, %v316_v54, 0.0 }
 0x315   : > { %v1194_v9 = vmul.f32 %v1178_v34, %v1178_v34  ;;  %1125 = vst.msk [vmem:[%s2599_s11 + $0x58] sm:$0xff] %vm320_vm0, %v1060_v60  ;;  %v1176_v33 = vsub.f32 %v1060_v60, %v1673_v47  ;;  %v318_v34 = vmul.f32 %v2681_v52, %v2681_v52  ;;  %v342_v60 = vsel %vm320_vm0, %v311_v14, 0.0 }
 0x317   : > { %v1236_v55 = vsel %vm320_vm0, %v1194_v9, 0.0  ;;  %v1192_v17 = vmul.f32 %v1176_v33, %v1176_v33  ;;  %v363_v9 = vsel %vm320_vm0, %v318_v34, 0.0 }
 0x318   : > { %1237 = vadd.xlane.f32.xlu0 %v1236_v55  ;;  %v366_v55 = vsel %vm320_vm0, %v319_v6, 0.0 }
 0x319   : > { %v979_v59 = vpop.f32.mrf.mxu3  ;;  %v1230_v29 = vsel %vm320_vm0, %v1192_v17, 0.0 }
 0x31a   : > { %v1063_v5 = vsel %vm999_vm14, %v979_v59, 0.0  ;;  %v351_v59 = vsel %vm320_vm0, %v314_v27, 0.0 }
 0x31b   : > { %1128 = vst.msk [vmem:[%s2599_s11 + $0x70] sm:$0xff] %vm320_vm0, %v1063_v5  ;;  %v1179_v4 = vsub.f32 %v1063_v5, %v2681_v52  ;;  %v973_v2 = vpop.f32.mrf.mxu1  ;;  %v317_v5 = vmul.f32 %v2667_v10, %v2667_v10 }
 0x31c   : > { %v1061_v23 = vsel %vm2895_vm8, %v973_v2, 0.0 }
 0x31d   : > { %v1195_v19 = vmul.f32 %v1179_v4, %v1179_v4  ;;  %1126 = vst.msk [vmem:[%s2599_s11 + $0x60] sm:$0xff] %vm320_vm0, %v1061_v23  ;;  %v1177_v21 = vsub.f32 %v1061_v23, %v1674_v20  ;;  %v360_v8 = vsel %vm320_vm0, %v317_v5, 0.0  ;;  %v2896_v4 = vlaneseq }
 0x31f   : > { %v1239_v31 = vsel %vm320_vm0, %v1195_v19, 0.0  ;;  %v1193_v51 = vmul.f32 %v1177_v21, %v1177_v21  ;;  %v2729_v2 = vshrl.u32 %v2896_v4, 7 }
 0x320   : > { %1240 = vadd.xlane.f32.xlu1 %v1239_v31  ;;  %1210 = vadd.xlane.f32.xlu0 %v1209_v0  ;;  %v2737_v31 = vstv %s1546_s12 }
 0x321   : > { %v982_v37 = vpop.f32.mrf.mxu3  ;;  %v1233_v18 = vsel %vm320_vm0, %v1193_v51, 0.0  ;;  %v1133_v19 = vadd.s32 8, %v2729_v2  ;;  %v1134_v10 = vadd.s32 16, %v2729_v2  ;;  %v1149_v53 = vadd.s32 %v2737_v31, %v2729_v2 }
 0x322   : > { %v1064_v45 = vsel %vm1000_vm9, %v982_v37, 0.0  ;;  %v1139_v42 = vadd.s32 56, %v2729_v2  ;;  %v1141_v49 = vadd.s32 72, %v2729_v2  ;;  %v1143_v54 = vadd.s32 88, %v2729_v2 }
 0x323   : > { %1129 = vst.msk [vmem:[%s2599_s11 + $0x78] sm:$0xff] %vm320_vm0, %v1064_v45  ;;  %v1180_v39 = vsub.f32 %v1064_v45, %v1668_v26  ;;  %v1150_v0 = vadd.s32 %v2737_v31, %v1133_v19  ;;  %v1151_v37 = vadd.s32 %v2737_v31, %v1134_v10  ;;  %vm1245_vm10 = vcmp.lt.s32.totalorder %v1149_v53, 512 }
 0x324   : > { %v1135_v45 = vadd.s32 24, %v2729_v2  ;;  %v1136_v26 = vadd.s32 32, %v2729_v2  ;;  %v1158_v51 = vadd.s32 %v2737_v31, %v1141_v49  ;;  %v1144_v14 = vadd.s32 96, %v2729_v2 }
 0x325   : > { %v1196_v46 = vmul.f32 %v1180_v39, %v1180_v39  ;;  %vm1247_vm12 = vcmp.lt.s32.totalorder %v1151_v37, 512  ;;  %v1160_v6 = vadd.s32 %v2737_v31, %v1143_v54  ;;  %v1146_v5 = vadd.s32 112, %v2729_v2 }
 0x326   : > { %v1152_v28 = vadd.s32 %v2737_v31, %v1135_v45  ;;  %v1153_v24 = vadd.s32 %v2737_v31, %v1136_v26  ;;  %vm1254_vm7 = vcmp.lt.s32.totalorder %v1158_v51, 512  ;;  %v2905_v51 = vld [vmem:[#allocation13_spill] sm:$0xff] }
 0x327   : > { %v1242_v1 = vsel %vm320_vm0, %v1196_v46, 0.0  ;;  %vm1246_vm0 = vcmp.lt.s32.totalorder %v1150_v0, 512  ;;  %v1137_v46 = vadd.s32 40, %v2729_v2  ;;  %v1147_v0 = vadd.s32 120, %v2729_v2 }
 0x328   : > { %1213 = vadd.xlane.f32.xlu1 %v1212_v22  ;;  %1243 = vadd.xlane.f32.xlu2 %v1242_v1  ;;  %v1138_v1 = vadd.s32 48, %v2729_v2  ;;  %vm1248_vm13 = vcmp.lt.s32.totalorder %v1152_v28, 512  ;;  %vm1249_vm15 = vcmp.lt.s32.totalorder %v1153_v24, 512  ;;  %vm1256_vm1 = vcmp.lt.s32.totalorder %v1160_v6, 512 }
 0x329   : > { %1219 = vadd.xlane.f32.xlu0 %v1218_v35  ;;  %v1154_v22 = vadd.s32 %v2737_v31, %v1137_v46  ;;  %v1163_v53 = vadd.s32 %v2737_v31, %v1146_v5  ;;  %v1164_v37 = vadd.s32 %v2737_v31, %v1147_v0  ;;  %v2898_v46 = vld [vmem:[#allocation16_spill] sm:$0xff] }
 0x32a   : > { %v1155_v13 = vadd.s32 %v2737_v31, %v1138_v1 }
 0x32b   : > { %vm1250_vm2 = vcmp.lt.s32.totalorder %v1154_v22, 512  ;;  %vm1259_vm6 = vcmp.lt.s32.totalorder %v1163_v53, 512  ;;  %vm1260_vm8 = vcmp.lt.s32.totalorder %v1164_v37, 512 }
 0x32c   : > { %vm1251_vm5 = vcmp.lt.s32.totalorder %v1155_v13, 512  ;;  %v2900_v13 = vld [vmem:[#allocation7_spill] sm:$0xff] }
 0x330   : > { %1222 = vadd.xlane.f32.xlu1 %v1221_v41  ;;  %1216 = vadd.xlane.f32.xlu2 %v1215_v40  ;;  %v1156_v41 = vadd.s32 %v2737_v31, %v1139_v42  ;;  %v1140_v40 = vadd.s32 64, %v2729_v2 }
 0x331   : > { %1228 = vadd.xlane.f32.xlu0 %v1227_v12 }
 0x332   : > { %vm1252_vm11 = vcmp.lt.s32.totalorder %v1156_v41, 512  ;;  %v1157_v20 = vadd.s32 %v2737_v31, %v1140_v40  ;;  %v2902_v40 = vld [vmem:[#allocation15_spill] sm:$0xff] }
 0x334   : > { %vm1253_vm14 = vcmp.lt.s32.totalorder %v1157_v20, 512 }
 0x338   : > { %1231 = vadd.xlane.f32.xlu1 %v1230_v29  ;;  %1225 = vadd.xlane.f32.xlu2 %v1224_v7  ;;  %v1142_v29 = vadd.s32 80, %v2729_v2 }
 0x339   : > { %346 = vadd.xlane.f32.xlu0 %v345_v50 }
 0x340   : > { %349 = vadd.xlane.f32.xlu1 %v348_v63  ;;  %1234 = vadd.xlane.f32.xlu2 %v1233_v18  ;;  %v1159_v18 = vadd.s32 %v2737_v31, %v1142_v29 }
 0x341   : > { %355 = vadd.xlane.f32.xlu0 %v354_v61 }
 0x342   : > { %vm1255_vm9 = vcmp.lt.s32.totalorder %v1159_v18, 512 }
 0x345   : > { %v1205_v16 = vpop.xlane.xlu1 %1204 }
 0x346   : > { %v1263_v25 = vsel %vm1247_vm12, %v1205_v16, 0.0 }
 0x348   : > { %358 = vadd.xlane.f32.xlu1 %v357_v36  ;;  %343 = vadd.xlane.f32.xlu2 %v342_v60  ;;  %v1145_v36 = vadd.s32 104, %v2729_v2 }
 0x349   : > { %364 = vadd.xlane.f32.xlu0 %v363_v9 }
 0x34a   : > { %v1162_v16 = vadd.s32 %v2737_v31, %v1145_v36 }
 0x34c   : > { %vm1258_vm4 = vcmp.lt.s32.totalorder %v1162_v16, 512 }
 0x350   : > { %367 = vadd.xlane.f32.xlu1 %v366_v55  ;;  %352 = vadd.xlane.f32.xlu2 %v351_v59 }
 0x358   : > { %361 = vadd.xlane.f32.xlu2 %v360_v8 }
 0x375   : > { %v1199_v23 = vpop.xlane.xlu2 %1198 }
 0x376   : > { %v1261_v58 = vsel %vm1245_vm10, %v1199_v23, 0.0  ;;  %v1161_v23 = vadd.s32 %v2737_v31, %v1144_v14 }
 0x378   : > { %vm1257_vm3 = vcmp.lt.s32.totalorder %v1161_v23, 512 }
 0x37d   : > { %v1202_v52 = vpop.xlane.xlu0 %1201  ;;  %v1208_v43 = vpop.xlane.xlu2 %1207 }
 0x37e   : > { %v1262_v32 = vsel %vm1246_vm0, %v1202_v52, 0.0  ;;  %v1264_v44 = vsel %vm1248_vm13, %v1208_v43, 0.0  ;;  %v2897_v52 = vld [vmem:[#allocation14_spill] sm:$0xff]  ;;  %vm1298_vm0 = vcmask 0  }
 0x37f   : > { %v1277_v3 = vadd.f32 %v1262_v32, %v1261_v58 }
 0x381   : > { %v1278_v30 = vadd.f32 %v1277_v3, %v1263_v25  ;;  %v2899_v3 = vld [vmem:[#allocation19_spill] sm:$0xff] }
 0x383   : > { %v1279_v33 = vadd.f32 %v1278_v30, %v1264_v44 }
 0x38b   : > { %v2733_v11 = vpop.xlane.xlu0 %1237 }
 0x38c   : > { %v1274_v22 = vsel %vm1258_vm4, %v2733_v11, 0.0  ;;  %v2901_v11 = vld [vmem:[#allocation20_spill] sm:$0xff] }
 0x393   : > { %v2745_v38 = vpop.xlane.xlu1 %1240  ;;  %v1211_v39 = vpop.xlane.xlu0 %1210 }
 0x394   : > { %v1265_v47 = vsel %vm1249_vm15, %v1211_v39, 0.0  ;;  %v1275_v31 = vsel %vm1259_vm6, %v2745_v38, 0.0 }
 0x395   : > { %v1280_v48 = vadd.f32 %v1279_v33, %v1265_v47 }
 0x39b   : > { %v2753_v35 = vpop.xlane.xlu2 %1243  ;;  %v1214_v56 = vpop.xlane.xlu1 %1213 }
 0x39c   : > { %v1220_v15 = vpop.xlane.xlu0 %1219  ;;  %v1266_v12 = vsel %vm1250_vm2, %v1214_v56, 0.0  ;;  %v1276_v30 = vsel %vm1260_vm8, %v2753_v35, 0.0 }
 0x39d   : > { %v1281_v17 = vadd.f32 %v1280_v48, %v1266_v12  ;;  %v1268_v63 = vsel %vm1252_vm11, %v1220_v15, 0.0 }
 0x3a3   : > { %v1217_v50 = vpop.xlane.xlu2 %1216  ;;  %v1223_v21 = vpop.xlane.xlu1 %1222 }
 0x3a4   : > { %v1267_v7 = vsel %vm1251_vm5, %v1217_v50, 0.0  ;;  %v1229_v62 = vpop.xlane.xlu0 %1228  ;;  %v1269_v34 = vsel %vm1253_vm14, %v1223_v21, 0.0  ;;  %v2903_v50 = vld [vmem:[#allocation18_spill] sm:$0xff]  ;;  %v2904_v21 = vld [vmem:[#allocation17_spill] sm:$0xff] }
 0x3a5   : > { %v1282_v57 = vadd.f32 %v1281_v17, %v1267_v7  ;;  %v1271_v19 = vsel %vm1255_vm9, %v1229_v62, 0.0 }
 0x3a7   : > { %v1283_v61 = vadd.f32 %v1282_v57, %v1268_v63 }
 0x3a9   : > { %v1284_v60 = vadd.f32 %v1283_v61, %v1269_v34 }
 0x3ab   : > { %v1226_v9 = vpop.xlane.xlu2 %1225  ;;  %v1232_v27 = vpop.xlane.xlu1 %1231 }
 0x3ac   : > { %v1270_v55 = vsel %vm1254_vm7, %v1226_v9, 0.0  ;;  %v347_v59 = vpop.xlane.xlu0 %346  ;;  %v1272_v43 = vsel %vm1256_vm1, %v1232_v27, 0.0 }
 0x3ad   : > { %v1285_v8 = vadd.f32 %v1284_v60, %v1270_v55  ;;  %v1073_v4 = vadd.f32 %v2897_v52, %v347_v59 }
 0x3af   : > { %v1286_v10 = vadd.f32 %v1285_v8, %v1271_v19  ;;  %1089 = vst [vmem:[%s2572_s29 + $0x40] sm:$0xff] %v1073_v4 }
 0x3b1   : > { %v1287_v45 = vadd.f32 %v1286_v10, %v1272_v43 }
 0x3b3   : > { %v1235_v26 = vpop.xlane.xlu2 %1234  ;;  %v350_v39 = vpop.xlane.xlu1 %349 }
 0x3b4   : > { %v1273_v32 = vsel %vm1257_vm3, %v1235_v26, 0.0  ;;  %v1074_v58 = vadd.f32 %v2898_v46, %v350_v39  ;;  %v356_v28 = vpop.xlane.xlu0 %355 }
 0x3b5   : > { %v1288_v2 = vadd.f32 %v1287_v45, %v1273_v32  ;;  %v1076_v24 = vadd.f32 %v2899_v3, %v356_v28 }
 0x3b6   : > { %1090 = vst [vmem:[%s2572_s29 + $0x48] sm:$0xff] %v1074_v58 }
 0x3b7   : > { %v1289_v1 = vadd.f32 %v1288_v2, %v1274_v22  ;;  %1092 = vst [vmem:[%s2572_s29 + $0x58] sm:$0xff] %v1076_v24 }
 0x3b9   : > { %v1290_v25 = vadd.f32 %v1289_v1, %v1275_v31 }
 0x3bb   : > { %v1291_v56 = vadd.f32 %v1290_v25, %v1276_v30  ;;  %v344_v42 = vpop.xlane.xlu2 %343  ;;  %v359_v15 = vpop.xlane.xlu1 %358 }
 0x3bc   : > { %v1072_v44 = vadd.f32 %v2900_v13, %v344_v42  ;;  %v1077_v47 = vadd.f32 %v2901_v11, %v359_v15  ;;  %v365_v33 = vpop.xlane.xlu0 %364 }
 0x3bd   : > { %v1292_v41 = vrot.slane %v1291_v56, 4  ;;  %v1079_v12 = vadd.f32 %v2902_v40, %v365_v33 }
 0x3be   : > { %1088 = vst [vmem:[%s2572_s29 + $0x38] sm:$0xff] %v1072_v44 }
 0x3bf   : > { %v1293_v38 = vadd.f32 %v1292_v41, %v1291_v56  ;;  %1093 = vst [vmem:[%s2572_s29 + $0x60] sm:$0xff] %v1077_v47 }
 0x3c0   : > { %1095 = vst [vmem:[%s2572_s29 + $0x70] sm:$0xff] %v1079_v12 }
 0x3c1   : > { %v1294_v35 = vrot.slane %v1293_v38, 2 }
 0x3c3   : > { %v1295_v48 = vadd.f32 %v1294_v35, %v1293_v38  ;;  %v353_v49 = vpop.xlane.xlu2 %352  ;;  %v368_v17 = vpop.xlane.xlu1 %367 }
 0x3c4   : > { %v1075_v20 = vadd.f32 %v2903_v50, %v353_v49  ;;  %v1080_v29 = vadd.f32 %v2904_v21, %v368_v17 }
 0x3c5   : > { %v1296_v7 = vrot.slane %v1295_v48, 1 }
 0x3c6   : > { %1091 = vst [vmem:[%s2572_s29 + $0x50] sm:$0xff] %v1075_v20 }
 0x3c7   : > { %v1297_v62 = vadd.f32 %v1296_v7, %v1295_v48  ;;  %1096 = vst [vmem:[%s2572_s29 + $0x78] sm:$0xff] %v1080_v29 }
 0x3c9   : > { %1299 = vst.msk [vmem:[%s287_s19] sm:$0x1] %vm1298_vm0, %v1297_v62 }
 0x3cb   : > { %v362_v57 = vpop.xlane.xlu2 %361 }
 0x3cc   : > { %v1078_v63 = vadd.f32 %v2905_v51, %v362_v57 }
 0x3ce   : > { %1094 = vst [vmem:[%s2572_s29 + $0x68] sm:$0xff] %v1078_v63 }
 0x3cf   : > { %1702 = shalt.err (!%p1699_p4)
}
 0x3d0   : > { %s1740_s26 = smov 128   ;;  %s1741_s29 = smov 8  }
 0x3d1   : > { %1617 = dma.vmem_to_hbm [thread:$0]  (%p1815_p5), %s1327_s28, 2048, %s1329_s20, %s1301_s25, %s1740_s26, %s1740_s26, %s1741_s29  }
 0x3d2 PF: > { %p1623_p7 = scmp.ge.s32.totalorder %s1737_s24, 2  ;;  %s1354_s16 = sand.u32 1, %s1725_s21  }
 0x3d3   : > { %s1355_s17 = scalar_lea.sflag [#allocation3], %s1354_s16 }
 0x3d4   : > { %p1620_p8 = pnand %p1623_p7, %p1819_p6 }
 0x3d6   : > { %p1621_p9 = pneg %p1620_p8 }
 0x3d8   : > { %1720 = dma.done.wait (%p1621_p9), %s1355_s17, 2048  }
 0x3d9   : > { %1722 = vsyncadd (%p1621_p9), %s1355_s17, 4294965248  ;;  %p17_p10 = scmp.ge.s32.totalorder %s1802_s27, 6   ;;  %s2906_s21 = smov %s1729_s22 }
 0x3da   : > { %s2907_s22 = smov %s1733_s23  ;;  %s2908_s23 = smov %s1813_s30 }
 0x3db   : > { %s2909_s24 = smov %s1802_s27  ;;  %19 = sbr.rel (!%p17_p10) target bundleno = 3 (0x3), region = 103 }
 0x3e0   :  { %1383 = vsyncpa [#allocation3], 1 }
 0x3e1   :  { %1385 = vsyncpa [#allocation3 + $0x1], 1 }

</bundles_post_ra>
